<compile_context>
chip_gen: v7x
topology: tpu7x:2x2x1
jax: 0.10.0
libtpu: 0.0.40
codegen_flags: <defaults>
</compile_context>

<pallas_src>
import functools

import jax
import jax.numpy as jnp
from jax import lax
from jax.experimental import pallas as pl
from jax.experimental.pallas import tpu as pltpu

_LANE = 128    # channel dims padded to a multiple of the lane width
_WTILE = 16    # W padded to a multiple of this (bf16 sublane packing = 16)
_LPAD = 16     # halo columns each side of the scratch (keeps interior aligned)


def _round_up(x, m):
    return (x + m - 1) // m * m


def _leaky(v):
    # LeakyReLU(negative_slope=0.1) == max(v, 0.1*v): one VPU op cheaper than
    # cmp + mul + select.
    return jnp.maximum(v, 0.1 * v)


def _residual_block_kernel(x_ref, w1_ref, b1_ref, w2_ref, b2_ref, o_ref,
                           hpad_ref, *, H, W, Wp, Cp, C2p, num_repeats):
    """All `num_repeats` residual repeats for one image, fused in VMEM.

    x_ref:    (1, H, Wp, Cp)         input image (NHWC, W- and C-padded)
    w1_ref:   (Cp, C2p)              1x1 conv weights, BN1 scale folded (mm dtype)
    b1_ref:   (1, C2p)               BN1 bias (incl. conv bias), f32
    w2_ref:   (9*C2p, Cp)            3x3 conv weights, full im2col layout
                                     ((ky, kx, cin) -> cout), BN2 scale folded
    b2_ref:   (1, Cp)                BN2 bias (incl. conv bias), f32
    o_ref:    (1, H, Wp, Cp)         output image
    hpad_ref: (H+2, Wp+2*LPAD, C2p)  mm-dtype scratch holding the halo-padded
                                     h1; rows 0 / H+1 and the column halos are
                                     permanently zero (3x3 zero padding).
    """
    mm_dtype = w1_ref.dtype
    LPAD = _LPAD
    M = H * Wp
    zw = Wp + 2 * LPAD

    # Zero the scratch halos once per image (interior is rewritten every
    # repeat).  Done unconditionally each grid step so it stays correct under
    # megacore sharding of the batch axis.
    hpad_ref[0:1, 0:zw, :] = jnp.zeros((1, zw, C2p), mm_dtype)
    hpad_ref[H + 1:H + 2, 0:zw, :] = jnp.zeros((1, zw, C2p), mm_dtype)
    hpad_ref[1:H + 1, 0:LPAD, :] = jnp.zeros((H, LPAD, C2p), mm_dtype)
    hpad_ref[1:H + 1, LPAD + Wp:zw, :] = jnp.zeros((H, LPAD, C2p), mm_dtype)

    # Weights / biases: read once, outside the repeat loop.
    w1 = w1_ref[...]                       # (Cp, C2p)   mm dtype
    w2 = w2_ref[...]                       # (9*C2p, Cp) mm dtype
    b1 = b1_ref[...]                       # (1, C2p)    f32
    b2 = b2_ref[...]                       # (1, Cp)     f32

    # Residual carry as a lane-dense 2D slab (M, Cp), f32.
    x = x_ref[...].reshape(M, Cp).astype(jnp.float32)

    def one_repeat(xc):
        # ---- CNNBlock1: 1x1 conv == channel matmul, + BN bias, LeakyReLU ----
        h1 = jnp.dot(xc.astype(mm_dtype), w1,
                     preferred_element_type=jnp.float32)       # (M, C2p) f32
        h1 = _leaky(h1 + b1)

        # Stage h1 into the halo-padded scratch.  The interior starts at
        # column LPAD (sublane-aligned) and spans Wp columns -> unmasked vst.
        hpad_ref[1:H + 1, LPAD:LPAD + Wp, :] = (
            h1.astype(mm_dtype).reshape(H, Wp, C2p))
        if Wp > W:
            # The wrapper's W-padding columns of h1 are garbage (bias leaks
            # in); keep them zero so the 3x3 conv's right-edge zero padding
            # stays exact for the last real column.
            hpad_ref[1:H + 1, LPAD + W:LPAD + Wp, :] = jnp.zeros(
                (H, Wp - W, C2p), mm_dtype)

        # ---- CNNBlock2: 3x3 conv (pad=1) as ONE im2col matmul, K = 9*C2p ----
        # Tap (ky, kx) for output pixel (h, w) lives at scratch
        # [ky + h, LPAD - 1 + kx + w]; the halos provide the zero padding.
        taps = jnp.concatenate(
            [hpad_ref[ky:ky + H, LPAD - 1 + kx:LPAD - 1 + kx + Wp, :]
                 .reshape(M, C2p)
             for ky in range(3) for kx in range(3)],
            axis=-1)                                           # (M, 9*C2p)
        acc = jnp.dot(taps, w2, preferred_element_type=jnp.float32)
        h2 = _leaky(acc + b2)                                  # (M, Cp) f32
        return xc + h2                                         # residual add

    if num_repeats <= 2:
        for _ in range(num_repeats):       # full static unroll
            x = one_repeat(x)
    else:
        x = lax.fori_loop(0, num_repeats, lambda _, v: one_repeat(v), x,
                          unroll=2)

    o_ref[...] = x.reshape(1, H, Wp, Cp).astype(o_ref.dtype)


def _pick_vmem_limit(footprint_bytes):
    """Explicit scoped-VMEM limit: defaults (16 MiB v5e / 32 MiB v6e,v7x) are
    too small for realistic shapes; cap per generation's physical VMEM."""
    cap = 100 * 1024 * 1024                        # v5e / v6e: 128 MiB physical
    try:
        kind = jax.devices()[0].device_kind.lower()
        if "v7" in kind:
            cap = 52 * 1024 * 1024                 # v7x: 64 MiB physical per TC
    except Exception:
        pass
    want = int(1.5 * footprint_bytes) + (8 << 20)
    return int(max(32 << 20, min(want, cap)))


def residual_block_forward_nhwc(x_nhwc, kparams, num_repeats):
    """ResidualBlock.forward in NHWC (preferred: no layout transposes)."""
    N, H, W, C = x_nhwc.shape
    Cp, C2p = kparams["w1"].shape
    Wp = _round_up(W, _WTILE)
    mm_dtype = kparams["w1"].dtype

    x_in = x_nhwc
    if (Wp, Cp) != (W, C):
        x_in = jnp.pad(x_nhwc, ((0, 0), (0, 0), (0, Wp - W), (0, Cp - C)))

    kernel = functools.partial(_residual_block_kernel, H=H, W=W, Wp=Wp,
                               Cp=Cp, C2p=C2p, num_repeats=num_repeats)

    itm = jnp.dtype(mm_dtype).itemsize
    block_bytes = H * Wp * Cp * x_in.dtype.itemsize
    scratch_bytes = (H + 2) * (Wp + 2 * _LPAD) * C2p * itm
    taps_bytes = H * Wp * 9 * C2p * itm
    temps_bytes = 4 * H * Wp * max(Cp, C2p) * 4       # x / h1 / acc / h2 (f32)
    weight_bytes = (Cp * C2p + 9 * C2p * Cp) * itm
    footprint = 4 * block_bytes + scratch_bytes + taps_bytes + temps_bytes \
        + weight_bytes

    flops = 2 * N * num_repeats * H * Wp * C2p * Cp * 10     # 1x1 + 3x3 matmuls
    bytes_accessed = (2 * N * H * Wp * Cp * x_in.dtype.itemsize
                      + weight_bytes
                      + (kparams["b1"].size + kparams["b2"].size) * 4)

    out = pl.pallas_call(
        kernel,
        out_shape=jax.ShapeDtypeStruct((N, H, Wp, Cp), x_nhwc.dtype),
        grid_spec=pltpu.PrefetchScalarGridSpec(
            num_scalar_prefetch=0,
            grid=(N,),
            in_specs=[
                pl.BlockSpec((1, H, Wp, Cp), lambda n: (n, 0, 0, 0)),
                pl.BlockSpec((Cp, C2p), lambda n: (0, 0)),
                pl.BlockSpec((1, C2p), lambda n: (0, 0)),
                pl.BlockSpec((9 * C2p, Cp), lambda n: (0, 0)),
                pl.BlockSpec((1, Cp), lambda n: (0, 0)),
            ],
            out_specs=pl.BlockSpec((1, H, Wp, Cp), lambda n: (n, 0, 0, 0)),
            scratch_shapes=[
                pltpu.VMEM((H + 2, Wp + 2 * _LPAD, C2p), mm_dtype)],
        ),
        compiler_params=pltpu.CompilerParams(
            dimension_semantics=("parallel",),
            vmem_limit_bytes=_pick_vmem_limit(footprint)),
        cost_estimate=pl.CostEstimate(flops=flops, transcendentals=0,
                                      bytes_accessed=bytes_accessed),
    )(x_in, kparams["w1"], kparams["b1"], kparams["w2"], kparams["b2"])

    if (Wp, Cp) != (W, C):
        out = out[:, :, :W, :C]
    return out


def residual_block_forward(x_nchw, kparams, num_repeats):
    """ResidualBlock.forward with PyTorch NCHW input/output layout."""
    x = jnp.transpose(x_nchw, (0, 2, 3, 1))          # NCHW -> NHWC
    y = residual_block_forward_nhwc(x, kparams, num_repeats)
    return jnp.transpose(y, (0, 3, 1, 2))            # NHWC -> NCHW


# ----------------------------------------------------------------------------
# Parameter construction (deterministic, synthetic) + pure-JAX reference
# ----------------------------------------------------------------------------
def make_torch_params(key, C):
    """Synthetic parameters in PyTorch layout (OIHW convs, separate BN)."""
    C2 = C // 2
    ks = jax.random.split(key, 10)
    eps = 1e-5
    w1_oihw = jax.random.normal(ks[0], (C2, C, 1, 1), jnp.float32) * 0.1
    cb1 = jax.random.normal(ks[1], (C2,), jnp.float32) * 0.1
    g1 = 1.0 + 0.1 * jax.random.normal(ks[2], (C2,), jnp.float32)
    be1 = 0.1 * jax.random.normal(ks[3], (C2,), jnp.float32)
    rm1 = 0.1 * jax.random.normal(ks[4], (C2,), jnp.float32)
    rv1 = 1.0 + 0.1 * jax.random.uniform(ks[5], (C2,), jnp.float32)

    w2_oihw = jax.random.normal(ks[6], (C, C2, 3, 3), jnp.float32) * 0.1
    cb2 = jax.random.normal(ks[7], (C,), jnp.float32) * 0.1
    g2 = 1.0 + 0.1 * jax.random.normal(ks[8], (C,), jnp.float32)
    be2 = 0.1 * jax.random.normal(ks[9], (C,), jnp.float32)
    rm2 = 0.05 * jnp.ones((C,), jnp.float32)
    rv2 = jnp.ones((C,), jnp.float32)
    return dict(w1=w1_oihw, cb1=cb1, g1=g1, be1=be1, rm1=rm1, rv1=rv1,
                w2=w2_oihw, cb2=cb2, g2=g2, be2=be2, rm2=rm2, rv2=rv2, eps=eps)


def fold_and_pad_params(tp, matmul_dtype=jnp.bfloat16):
    """Fold eval-mode BN (+ conv bias) into the weights/biases, pad channels
    to a multiple of 128, build the full-K (9*C2p) im2col w2 layout, and cast
    the matmul weights to the MXU dtype (bf16 by default)."""
    C2, C = tp["w1"].shape[0], tp["w1"].shape[1]
    Cp = _round_up(C, _LANE)
    C2p = _round_up(C2, _LANE)
    eps = tp["eps"]

    s1 = tp["g1"] / jnp.sqrt(tp["rv1"] + eps)
    b1 = tp["be1"] + s1 * (tp["cb1"] - tp["rm1"])
    s2 = tp["g2"] / jnp.sqrt(tp["rv2"] + eps)
    b2 = tp["be2"] + s2 * (tp["cb2"] - tp["rm2"])

    # Conv1: OIHW (C2, C, 1, 1) -> (Cin=C, Cout=C2), BN1 scale folded in.
    w1 = jnp.transpose(tp["w1"][:, :, 0, 0], (1, 0)) * s1[None, :]
    # Conv2: OIHW (C, C2, 3, 3) -> (ky, kx, Cin=C2, Cout=C), BN2 scale folded.
    w2 = jnp.transpose(tp["w2"], (2, 3, 1, 0)) * s2[None, None, None, :]

    w1p = jnp.zeros((Cp, C2p), jnp.float32).at[:C, :C2].set(w1)
    b1p = jnp.zeros((1, C2p), jnp.float32).at[:, :C2].set(b1)
    w2p = jnp.zeros((3, 3, C2p, Cp), jnp.float32).at[:, :, :C2, :C].set(w2)
    b2p = jnp.zeros((1, Cp), jnp.float32).at[:, :C].set(b2)

    return {
        "w1": w1p.astype(matmul_dtype),
        "b1": b1p,
        "w2": w2p.reshape(9 * C2p, Cp).astype(matmul_dtype),  # full im2col K
        "b2": b2p,
    }


def reference_forward(x_nchw, tp, num_repeats):
    """Pure-JAX (lax.conv) reference of ResidualBlock.forward (eval-mode BN)."""
    def bn(y, g, b, m, v):
        g = g[None, :, None, None]; b = b[None, :, None, None]
        m = m[None, :, None, None]; v = v[None, :, None, None]
        return g * (y - m) / jnp.sqrt(v + tp["eps"]) + b

    def leaky(y):
        return jnp.where(y > 0, y, 0.1 * y)

    dn = ("NCHW", "OIHW", "NCHW")
    prec = lax.Precision.HIGHEST
    x = x_nchw
    for _ in range(num_repeats):
        h = lax.conv_general_dilated(x, tp["w1"], (1, 1), "VALID",
                                     dimension_numbers=dn, precision=prec)
        h = h + tp["cb1"][None, :, None, None]
        h = leaky(bn(h, tp["g1"], tp["be1"], tp["rm1"], tp["rv1"]))
        y = lax.conv_general_dilated(h, tp["w2"], (1, 1), ((1, 1), (1, 1)),
                                     dimension_numbers=dn, precision=prec)
        y = y + tp["cb2"][None, :, None, None]
        y = leaky(bn(y, tp["g2"], tp["be2"], tp["rm2"], tp["rv2"]))
        x = x + y
    return x


if __name__ == "__main__":
    # ---- Check 1: canonical small shape (N=2, C=4, H=W=16, 2 repeats) ------
    N, C, H, W = 2, 4, 16, 16
    num_repeats = 2

    key = jax.random.PRNGKey(0)
    k_x, k_p = jax.random.split(key)
    x = jax.random.normal(k_x, (N, C, H, W), jnp.float32)
    tp = make_torch_params(k_p, C)
    ref = reference_forward(x, tp, num_repeats)

    # f32-matmul path: structural check.
    out_f32 = residual_block_forward(
        x, fold_and_pad_params(tp, matmul_dtype=jnp.float32), num_repeats)
    out_f32 = jax.block_until_ready(out_f32)
    assert out_f32.shape == (N, C, H, W)
    err_f32 = float(jnp.max(jnp.abs(out_f32 - ref)))
    assert err_f32 < 3e-2, f"f32 path max abs err {err_f32}"

    # bf16-matmul path (production config).
    out_bf16 = residual_block_forward(
        x, fold_and_pad_params(tp, matmul_dtype=jnp.bfloat16), num_repeats)
    out_bf16 = jax.block_until_ready(out_bf16)
    assert out_bf16.shape == (N, C, H, W)
    err_bf16 = float(jnp.max(jnp.abs(out_bf16 - ref)))
    assert err_bf16 < 7e-2, f"bf16 path max abs err {err_bf16}"

    # ---- Check 2: W not a multiple of 16 (padded-W zero-strip path) and ----
    # ---- num_repeats > 2 (fori_loop path).                             ----
    N2, C2c, H2, W2, nr2 = 1, 6, 6, 10, 4
    k2x, k2p = jax.random.split(jax.random.PRNGKey(1))
    x2 = jax.random.normal(k2x, (N2, C2c, H2, W2), jnp.float32)
    tp2 = make_torch_params(k2p, C2c)
    ref2 = reference_forward(x2, tp2, nr2)
    out2 = residual_block_forward(
        x2, fold_and_pad_params(tp2, matmul_dtype=jnp.float32), nr2)
    out2 = jax.block_until_ready(out2)
    assert out2.shape == (N2, C2c, H2, W2)
    err2 = float(jnp.max(jnp.abs(out2 - ref2)))
    assert err2 < 3e-2, f"padded-W / fori path max abs err {err2}"

    print("KERNEL_OK")
</pallas_src>

<mosaic_0001>
module attributes {stable_mosaic.version = 11 : i64} {
  func.func @_residual_block_kernel(%arg0: i32, %arg1: memref<1x16x16x128xf32, #tpu.memory_space<vmem>>, %arg2: memref<128x128xf32, #tpu.memory_space<vmem>>, %arg3: memref<1x128xf32, #tpu.memory_space<vmem>>, %arg4: memref<1152x128xf32, #tpu.memory_space<vmem>>, %arg5: memref<1x128xf32, #tpu.memory_space<vmem>>, %arg6: memref<1x16x16x128xf32, #tpu.memory_space<vmem>>, %arg7: memref<18x48x128xf32, #tpu.memory_space<vmem>>) attributes {dimension_semantics = [#tpu.dimension_semantics<parallel>], iteration_bounds = array<i64: 2>, scalar_prefetch = 0 : i64, scratch_operands = 1 : i64, tpu.core_type = #tpu.core_type<tc>, window_params = [{transform_indices = @transform_0, window_bounds = array<i64: 1, 16, 16, 128>}, {pipeline_mode = #tpu.pipeline_mode<synchronous>, transform_indices = @transform_1, window_bounds = array<i64: 128, 128>}, {pipeline_mode = #tpu.pipeline_mode<synchronous>, transform_indices = @transform_2, window_bounds = array<i64: 1, 128>}, {pipeline_mode = #tpu.pipeline_mode<synchronous>, transform_indices = @transform_3, window_bounds = array<i64: 1152, 128>}, {pipeline_mode = #tpu.pipeline_mode<synchronous>, transform_indices = @transform_4, window_bounds = array<i64: 1, 128>}, {transform_indices = @transform_5, window_bounds = array<i64: 1, 16, 16, 128>}]} {
    %cst = arith.constant 0.000000e+00 : f32
    %0 = vector.broadcast %cst : f32 to vector<1x48x128xf32>
    %c0 = arith.constant 0 : index
    %c0_0 = arith.constant 0 : index
    %c0_1 = arith.constant 0 : index
    %1 = vector.load %arg7[%c0, %c0_0, %c0_1] : memref<18x48x128xf32, #tpu.memory_space<vmem>>, vector<1x48x128xf32>
    tpu.vector_store %arg7[%c0, %c0_0, %c0_1], %0 {strides = array<i32>} : memref<18x48x128xf32, #tpu.memory_space<vmem>>, vector<1x48x128xf32>,
    %cst_2 = arith.constant 0.000000e+00 : f32
    %2 = vector.broadcast %cst_2 : f32 to vector<1x48x128xf32>
    %c17 = arith.constant 17 : index
    %c0_3 = arith.constant 0 : index
    %c0_4 = arith.constant 0 : index
    %3 = vector.load %arg7[%c17, %c0_3, %c0_4] : memref<18x48x128xf32, #tpu.memory_space<vmem>>, vector<1x48x128xf32>
    tpu.vector_store %arg7[%c17, %c0_3, %c0_4], %2 {strides = array<i32>} : memref<18x48x128xf32, #tpu.memory_space<vmem>>, vector<1x48x128xf32>,
    %cst_5 = arith.constant 0.000000e+00 : f32
    %4 = vector.broadcast %cst_5 : f32 to vector<16x16x128xf32>
    %c1 = arith.constant 1 : index
    %c0_6 = arith.constant 0 : index
    %c0_7 = arith.constant 0 : index
    %5 = vector.load %arg7[%c1, %c0_6, %c0_7] : memref<18x48x128xf32, #tpu.memory_space<vmem>>, vector<16x16x128xf32>
    tpu.vector_store %arg7[%c1, %c0_6, %c0_7], %4 {strides = array<i32>} : memref<18x48x128xf32, #tpu.memory_space<vmem>>, vector<16x16x128xf32>,
    %cst_8 = arith.constant 0.000000e+00 : f32
    %6 = vector.broadcast %cst_8 : f32 to vector<16x16x128xf32>
    %c1_9 = arith.constant 1 : index
    %c32 = arith.constant 32 : index
    %c0_10 = arith.constant 0 : index
    %7 = vector.load %arg7[%c1_9, %c32, %c0_10] : memref<18x48x128xf32, #tpu.memory_space<vmem>>, vector<16x16x128xf32>
    tpu.vector_store %arg7[%c1_9, %c32, %c0_10], %6 {strides = array<i32>} : memref<18x48x128xf32, #tpu.memory_space<vmem>>, vector<16x16x128xf32>,
    %c0_11 = arith.constant 0 : index
    %c0_12 = arith.constant 0 : index
    %8 = vector.load %arg2[%c0_11, %c0_12] : memref<128x128xf32, #tpu.memory_space<vmem>>, vector<128x128xf32>
    %c0_13 = arith.constant 0 : index
    %c0_14 = arith.constant 0 : index
    %9 = vector.load %arg4[%c0_13, %c0_14] : memref<1152x128xf32, #tpu.memory_space<vmem>>, vector<1152x128xf32>
    %c0_15 = arith.constant 0 : index
    %c0_16 = arith.constant 0 : index
    %10 = vector.load %arg3[%c0_15, %c0_16] : memref<1x128xf32, #tpu.memory_space<vmem>>, vector<1x128xf32>
    %c0_17 = arith.constant 0 : index
    %c0_18 = arith.constant 0 : index
    %11 = vector.load %arg5[%c0_17, %c0_18] : memref<1x128xf32, #tpu.memory_space<vmem>>, vector<1x128xf32>
    %c0_19 = arith.constant 0 : index
    %c0_20 = arith.constant 0 : index
    %c0_21 = arith.constant 0 : index
    %c0_22 = arith.constant 0 : index
    %12 = vector.load %arg1[%c0_19, %c0_20, %c0_21, %c0_22] : memref<1x16x16x128xf32, #tpu.memory_space<vmem>>, vector<1x16x16x128xf32>
    %13 = vector.shape_cast %12 : vector<1x16x16x128xf32> to vector<256x128xf32>
    %cst_23 = arith.constant dense<0.000000e+00> : vector<256x128xf32>
    %14 = tpu.matmul %13, %8, %cst_23 {dimension_numbers = #tpu.dot_dimension_numbers<[1], [0], [0], [1], [0, 0, 1, 1], [], []>} : vector<256x128xf32>, vector<128x128xf32>, vector<256x128xf32> -> vector<256x128xf32>
    %15 = vector.broadcast %10 : vector<1x128xf32> to vector<256x128xf32>
    %16 = arith.addf %14, %15 : vector<256x128xf32>
    %cst_24 = arith.constant 1.000000e-01 : f32
    %17 = vector.broadcast %cst_24 : f32 to vector<256x128xf32>
    %18 = arith.mulf %17, %16 : vector<256x128xf32>
    %19 = arith.maximumf %16, %18 : vector<256x128xf32>
    %20 = vector.shape_cast %19 : vector<256x128xf32> to vector<16x16x128xf32>
    %c1_25 = arith.constant 1 : index
    %c16 = arith.constant 16 : index
    %c0_26 = arith.constant 0 : index
    %21 = vector.load %arg7[%c1_25, %c16, %c0_26] : memref<18x48x128xf32, #tpu.memory_space<vmem>>, vector<16x16x128xf32>
    tpu.vector_store %arg7[%c1_25, %c16, %c0_26], %20 {strides = array<i32>} : memref<18x48x128xf32, #tpu.memory_space<vmem>>, vector<16x16x128xf32>,
    %c0_27 = arith.constant 0 : index
    %c15 = arith.constant 15 : index
    %c0_28 = arith.constant 0 : index
    %22 = vector.load %arg7[%c0_27, %c15, %c0_28] : memref<18x48x128xf32, #tpu.memory_space<vmem>>, vector<16x16x128xf32>
    %23 = vector.shape_cast %22 : vector<16x16x128xf32> to vector<256x128xf32>
    %c0_29 = arith.constant 0 : index
    %c16_30 = arith.constant 16 : index
    %c0_31 = arith.constant 0 : index
    %24 = vector.load %arg7[%c0_29, %c16_30, %c0_31] : memref<18x48x128xf32, #tpu.memory_space<vmem>>, vector<16x16x128xf32>
    %25 = vector.shape_cast %24 : vector<16x16x128xf32> to vector<256x128xf32>
    %c0_32 = arith.constant 0 : index
    %c17_33 = arith.constant 17 : index
    %c0_34 = arith.constant 0 : index
    %26 = vector.load %arg7[%c0_32, %c17_33, %c0_34] : memref<18x48x128xf32, #tpu.memory_space<vmem>>, vector<16x16x128xf32>
    %27 = vector.shape_cast %26 : vector<16x16x128xf32> to vector<256x128xf32>
    %c1_35 = arith.constant 1 : index
    %c15_36 = arith.constant 15 : index
    %c0_37 = arith.constant 0 : index
    %28 = vector.load %arg7[%c1_35, %c15_36, %c0_37] : memref<18x48x128xf32, #tpu.memory_space<vmem>>, vector<16x16x128xf32>
    %29 = vector.shape_cast %28 : vector<16x16x128xf32> to vector<256x128xf32>
    %c1_38 = arith.constant 1 : index
    %c16_39 = arith.constant 16 : index
    %c0_40 = arith.constant 0 : index
    %30 = vector.load %arg7[%c1_38, %c16_39, %c0_40] : memref<18x48x128xf32, #tpu.memory_space<vmem>>, vector<16x16x128xf32>
    %31 = vector.shape_cast %30 : vector<16x16x128xf32> to vector<256x128xf32>
    %c1_41 = arith.constant 1 : index
    %c17_42 = arith.constant 17 : index
    %c0_43 = arith.constant 0 : index
    %32 = vector.load %arg7[%c1_41, %c17_42, %c0_43] : memref<18x48x128xf32, #tpu.memory_space<vmem>>, vector<16x16x128xf32>
    %33 = vector.shape_cast %32 : vector<16x16x128xf32> to vector<256x128xf32>
    %c2 = arith.constant 2 : index
    %c15_44 = arith.constant 15 : index
    %c0_45 = arith.constant 0 : index
    %34 = vector.load %arg7[%c2, %c15_44, %c0_45] : memref<18x48x128xf32, #tpu.memory_space<vmem>>, vector<16x16x128xf32>
    %35 = vector.shape_cast %34 : vector<16x16x128xf32> to vector<256x128xf32>
    %c2_46 = arith.constant 2 : index
    %c16_47 = arith.constant 16 : index
    %c0_48 = arith.constant 0 : index
    %36 = vector.load %arg7[%c2_46, %c16_47, %c0_48] : memref<18x48x128xf32, #tpu.memory_space<vmem>>, vector<16x16x128xf32>
    %37 = vector.shape_cast %36 : vector<16x16x128xf32> to vector<256x128xf32>
    %c2_49 = arith.constant 2 : index
    %c17_50 = arith.constant 17 : index
    %c0_51 = arith.constant 0 : index
    %38 = vector.load %arg7[%c2_49, %c17_50, %c0_51] : memref<18x48x128xf32, #tpu.memory_space<vmem>>, vector<16x16x128xf32>
    %39 = vector.shape_cast %38 : vector<16x16x128xf32> to vector<256x128xf32>
    %40 = tpu.concatenate %23, %25, %27, %29, %31, %33, %35, %37, %39 in 1 : vector<256x128xf32>, vector<256x128xf32>, vector<256x128xf32>, vector<256x128xf32>, vector<256x128xf32>, vector<256x128xf32>, vector<256x128xf32>, vector<256x128xf32>, vector<256x128xf32> -> vector<256x1152xf32>
    %cst_52 = arith.constant dense<0.000000e+00> : vector<256x128xf32>
    %41 = tpu.matmul %40, %9, %cst_52 {dimension_numbers = #tpu.dot_dimension_numbers<[1], [0], [0], [1], [0, 0, 1, 1], [], []>} : vector<256x1152xf32>, vector<1152x128xf32>, vector<256x128xf32> -> vector<256x128xf32>
    %42 = vector.broadcast %11 : vector<1x128xf32> to vector<256x128xf32>
    %43 = arith.addf %41, %42 : vector<256x128xf32>
    %cst_53 = arith.constant 1.000000e-01 : f32
    %44 = vector.broadcast %cst_53 : f32 to vector<256x128xf32>
    %45 = arith.mulf %44, %43 : vector<256x128xf32>
    %46 = arith.maximumf %43, %45 : vector<256x128xf32>
    %47 = arith.addf %13, %46 : vector<256x128xf32>
    %cst_54 = arith.constant dense<0.000000e+00> : vector<256x128xf32>
    %48 = tpu.matmul %47, %8, %cst_54 {dimension_numbers = #tpu.dot_dimension_numbers<[1], [0], [0], [1], [0, 0, 1, 1], [], []>} : vector<256x128xf32>, vector<128x128xf32>, vector<256x128xf32> -> vector<256x128xf32>
    %49 = vector.broadcast %10 : vector<1x128xf32> to vector<256x128xf32>
    %50 = arith.addf %48, %49 : vector<256x128xf32>
    %cst_55 = arith.constant 1.000000e-01 : f32
    %51 = vector.broadcast %cst_55 : f32 to vector<256x128xf32>
    %52 = arith.mulf %51, %50 : vector<256x128xf32>
    %53 = arith.maximumf %50, %52 : vector<256x128xf32>
    %54 = vector.shape_cast %53 : vector<256x128xf32> to vector<16x16x128xf32>
    %c1_56 = arith.constant 1 : index
    %c16_57 = arith.constant 16 : index
    %c0_58 = arith.constant 0 : index
    %55 = vector.load %arg7[%c1_56, %c16_57, %c0_58] : memref<18x48x128xf32, #tpu.memory_space<vmem>>, vector<16x16x128xf32>
    tpu.vector_store %arg7[%c1_56, %c16_57, %c0_58], %54 {strides = array<i32>} : memref<18x48x128xf32, #tpu.memory_space<vmem>>, vector<16x16x128xf32>,
    %c0_59 = arith.constant 0 : index
    %c15_60 = arith.constant 15 : index
    %c0_61 = arith.constant 0 : index
    %56 = vector.load %arg7[%c0_59, %c15_60, %c0_61] : memref<18x48x128xf32, #tpu.memory_space<vmem>>, vector<16x16x128xf32>
    %57 = vector.shape_cast %56 : vector<16x16x128xf32> to vector<256x128xf32>
    %c0_62 = arith.constant 0 : index
    %c16_63 = arith.constant 16 : index
    %c0_64 = arith.constant 0 : index
    %58 = vector.load %arg7[%c0_62, %c16_63, %c0_64] : memref<18x48x128xf32, #tpu.memory_space<vmem>>, vector<16x16x128xf32>
    %59 = vector.shape_cast %58 : vector<16x16x128xf32> to vector<256x128xf32>
    %c0_65 = arith.constant 0 : index
    %c17_66 = arith.constant 17 : index
    %c0_67 = arith.constant 0 : index
    %60 = vector.load %arg7[%c0_65, %c17_66, %c0_67] : memref<18x48x128xf32, #tpu.memory_space<vmem>>, vector<16x16x128xf32>
    %61 = vector.shape_cast %60 : vector<16x16x128xf32> to vector<256x128xf32>
    %c1_68 = arith.constant 1 : index
    %c15_69 = arith.constant 15 : index
    %c0_70 = arith.constant 0 : index
    %62 = vector.load %arg7[%c1_68, %c15_69, %c0_70] : memref<18x48x128xf32, #tpu.memory_space<vmem>>, vector<16x16x128xf32>
    %63 = vector.shape_cast %62 : vector<16x16x128xf32> to vector<256x128xf32>
    %c1_71 = arith.constant 1 : index
    %c16_72 = arith.constant 16 : index
    %c0_73 = arith.constant 0 : index
    %64 = vector.load %arg7[%c1_71, %c16_72, %c0_73] : memref<18x48x128xf32, #tpu.memory_space<vmem>>, vector<16x16x128xf32>
    %65 = vector.shape_cast %64 : vector<16x16x128xf32> to vector<256x128xf32>
    %c1_74 = arith.constant 1 : index
    %c17_75 = arith.constant 17 : index
    %c0_76 = arith.constant 0 : index
    %66 = vector.load %arg7[%c1_74, %c17_75, %c0_76] : memref<18x48x128xf32, #tpu.memory_space<vmem>>, vector<16x16x128xf32>
    %67 = vector.shape_cast %66 : vector<16x16x128xf32> to vector<256x128xf32>
    %c2_77 = arith.constant 2 : index
    %c15_78 = arith.constant 15 : index
    %c0_79 = arith.constant 0 : index
    %68 = vector.load %arg7[%c2_77, %c15_78, %c0_79] : memref<18x48x128xf32, #tpu.memory_space<vmem>>, vector<16x16x128xf32>
    %69 = vector.shape_cast %68 : vector<16x16x128xf32> to vector<256x128xf32>
    %c2_80 = arith.constant 2 : index
    %c16_81 = arith.constant 16 : index
    %c0_82 = arith.constant 0 : index
    %70 = vector.load %arg7[%c2_80, %c16_81, %c0_82] : memref<18x48x128xf32, #tpu.memory_space<vmem>>, vector<16x16x128xf32>
    %71 = vector.shape_cast %70 : vector<16x16x128xf32> to vector<256x128xf32>
    %c2_83 = arith.constant 2 : index
    %c17_84 = arith.constant 17 : index
    %c0_85 = arith.constant 0 : index
    %72 = vector.load %arg7[%c2_83, %c17_84, %c0_85] : memref<18x48x128xf32, #tpu.memory_space<vmem>>, vector<16x16x128xf32>
    %73 = vector.shape_cast %72 : vector<16x16x128xf32> to vector<256x128xf32>
    %74 = tpu.concatenate %57, %59, %61, %63, %65, %67, %69, %71, %73 in 1 : vector<256x128xf32>, vector<256x128xf32>, vector<256x128xf32>, vector<256x128xf32>, vector<256x128xf32>, vector<256x128xf32>, vector<256x128xf32>, vector<256x128xf32>, vector<256x128xf32> -> vector<256x1152xf32>
    %cst_86 = arith.constant dense<0.000000e+00> : vector<256x128xf32>
    %75 = tpu.matmul %74, %9, %cst_86 {dimension_numbers = #tpu.dot_dimension_numbers<[1], [0], [0], [1], [0, 0, 1, 1], [], []>} : vector<256x1152xf32>, vector<1152x128xf32>, vector<256x128xf32> -> vector<256x128xf32>
    %76 = vector.broadcast %11 : vector<1x128xf32> to vector<256x128xf32>
    %77 = arith.addf %75, %76 : vector<256x128xf32>
    %cst_87 = arith.constant 1.000000e-01 : f32
    %78 = vector.broadcast %cst_87 : f32 to vector<256x128xf32>
    %79 = arith.mulf %78, %77 : vector<256x128xf32>
    %80 = arith.maximumf %77, %79 : vector<256x128xf32>
    %81 = arith.addf %47, %80 : vector<256x128xf32>
    %82 = vector.shape_cast %81 : vector<256x128xf32> to vector<1x16x16x128xf32>
    %c0_88 = arith.constant 0 : index
    %c0_89 = arith.constant 0 : index
    %c0_90 = arith.constant 0 : index
    %c0_91 = arith.constant 0 : index
    %83 = vector.load %arg6[%c0_88, %c0_89, %c0_90, %c0_91] : memref<1x16x16x128xf32, #tpu.memory_space<vmem>>, vector<1x16x16x128xf32>
    tpu.vector_store %arg6[%c0_88, %c0_89, %c0_90, %c0_91], %82 {strides = array<i32>} : memref<1x16x16x128xf32, #tpu.memory_space<vmem>>, vector<1x16x16x128xf32>,
    return
  }
  func.func @transform_0(%arg0: i32) -> (i32, i32, i32, i32) {
    %c0_i32 = arith.constant 0 : i32
    %c0_i32_0 = arith.constant 0 : i32
    %c0_i32_1 = arith.constant 0 : i32
    %c0_i32_2 = arith.constant 0 : i32
    return %arg0, %c0_i32, %c0_i32_0, %c0_i32_1 : i32, i32, i32, i32
  }
  func.func @transform_1(%arg0: i32) -> (i32, i32) {
    %c0_i32 = arith.constant 0 : i32
    %c0_i32_0 = arith.constant 0 : i32
    %c0_i32_1 = arith.constant 0 : i32
    return %c0_i32, %c0_i32_0 : i32, i32
  }
  func.func @transform_2(%arg0: i32) -> (i32, i32) {
    %c0_i32 = arith.constant 0 : i32
    %c0_i32_0 = arith.constant 0 : i32
    %c0_i32_1 = arith.constant 0 : i32
    return %c0_i32, %c0_i32_0 : i32, i32
  }
  func.func @transform_3(%arg0: i32) -> (i32, i32) {
    %c0_i32 = arith.constant 0 : i32
    %c0_i32_0 = arith.constant 0 : i32
    %c0_i32_1 = arith.constant 0 : i32
    return %c0_i32, %c0_i32_0 : i32, i32
  }
  func.func @transform_4(%arg0: i32) -> (i32, i32) {
    %c0_i32 = arith.constant 0 : i32
    %c0_i32_0 = arith.constant 0 : i32
    %c0_i32_1 = arith.constant 0 : i32
    return %c0_i32, %c0_i32_0 : i32, i32
  }
  func.func @transform_5(%arg0: i32) -> (i32, i32, i32, i32) {
    %c0_i32 = arith.constant 0 : i32
    %c0_i32_0 = arith.constant 0 : i32
    %c0_i32_1 = arith.constant 0 : i32
    %c0_i32_2 = arith.constant 0 : i32
    return %arg0, %c0_i32, %c0_i32_0, %c0_i32_1 : i32, i32, i32, i32
  }
}

</mosaic_0001>

<bundles_post_ra>
// kernel: tpu_custom_call.1
= control target key start
LH: loop header
LB: loop body
LE: loop exit
PB: predicated region body
PF: predicated region fallthrough
CT: control target
= control target key end

     0   :  { %10 = vsyncpa [#allocation4], 0  ;;  %s8417_s0 = inlined_call_operand.hbm [shape: f32[2,16,16,128], index: 0, kind: input, shape index: {}]   ;;  %s8418_s1 = inlined_call_operand.hbm [shape: f32[128,128], index: 1, kind: input, shape index: {}]   ;;  %s8419_s2 = inlined_call_operand.vmem [shape: f32[1,128], index: 2, kind: input, shape index: {}]   ;;  %s8420_s3 = inlined_call_operand.hbm [shape: f32[1152,128], index: 3, kind: input, shape index: {}]   ;;  %s8421_s4 = inlined_call_operand.vmem [shape: f32[1,128], index: 4, kind: input, shape index: {}]   ;;  %s8422_s5 = inlined_call_operand.hbm [shape: f32[2,16,16,128], index: 5, kind: output, shape index: {}]  }
   0x1   :  { %12 = vsyncpa [#allocation4 + $0x1], 0 }
   0x2   :  { %13 = vsyncpa [#allocation7], 0 }
   0x3   :  { %14 = vsyncpa [#allocation5], 0 }
   0x4   :  { %16 = vsyncpa [#allocation5 + $0x1], 0  ;;  %s6157_s18 = smov 0   ;;  %s6159_s19 = smov 0  }
   0x5   :  { %s6161_s20 = smov 0   ;;  %s6163_s21 = smov 0  }
   0x6 LB: > { %s6178_s22 = sadd.s32 4294967295, %s6115_s21   ;;  %s4355_s23 = sadd.s32 4294967294, %s6115_s21   ;;  %s6115_s21 = sphi %s6163_s21, %s8900_s21   ;;  %s6111_s20 = sphi %s6161_s20, %s8899_s20   ;;  %s6107_s19 = sphi %s6159_s19, %s8898_s19   ;;  %s6103_s18 = sphi %s6157_s18, %s8897_s18  }
   0x7   : > { %p42_p0 = scmp.ne.s32.totalorder %s6107_s19, %s6103_s18  ;;  %p8423_p1 = scmp.eq.s32.totalorder %s6178_s22, 0 }
   0x8   : > { %p156_p3 = scmp.eq.s32.totalorder %s4355_s23, 1  ;;  %p4356_p5 = scmp.ge.s32.totalorder %s6115_s21, 1 }
   0x9   : > { %p6187_p4 = por %p8423_p1, %p42_p0  ;;  %p163_p7 = scmp.lt.s32.totalorder %s6115_s21, 3 }
   0xa   : > { %p6192_p6 = por %p156_p3, %p42_p0  ;;  %s6117_s27 = smov [#allocation6]  }
   0xb   : > { %s8587_s24 = scalar_select %p6187_p4, 1, 0 }
   0xc   : > { %s8588_s25 = scalar_select %p6192_p6, 1, 0 }
   0xd   : > { %p6197_p8 = pnand %p4356_p5, %p163_p7  ;;  %s175_s28 = sshll.u32 %s6117_s27, 4  ;;  %s6201_s28 = int_to_ptr.vmem [resolvable:$true] %s175_s28 }
   0xe   : > { %s6118_s30 = smov [#allocation8]   ;;  %s5959_s9 = scalar_lea.hbm %s8418_s1, 2048 }
   0xf   : > { %p5861_p9 = pneg %p6197_p8  ;;  %s191_s6 = sshll.u32 %s6118_s30, 4  ;;  %s6212_s6 = int_to_ptr.vmem [resolvable:$true] %s191_s6 }
  0x10   : > { %p5960_p12 = scmp.ne.s32.totalorder %s8418_s1, %s5959_s9  ;;  %p5966_p5 = scmp.lt.u32.totalorder %s5959_s9, %s8418_s1 }
  0x11   : > { %p6208_p11 = pnand %p5861_p9, %p8423_p1 }
  0x13   : > { %p5961_p13 = pneg %p6208_p11 }
  0x15   : > { %p5962_p0 = pnand %p5961_p13, %p5960_p12 }
  0x17   : > { %p5963_p3 = pneg %p5962_p0 }
  0x19   : > { %p5968_p7 = pnand %p5966_p5, %p5963_p3 }
  0x1b   : > { %5971 = shalt.err (!%p5968_p7)
}
  0x1c   : > { %s5972_s14 = scalar_lea.vmem %s6201_s28, 2048  ;;  %p5980_p2 = scmp.lt.s32.totalorder %s6201_s28, %s6201_s28 }
  0x1d   : > { %p5973_p9 = scmp.ne.s32.totalorder %s6201_s28, %s5972_s14  ;;  %p5981_p12 = scmp.lt.s32.totalorder %s5972_s14, %s5972_s14 }
  0x1f   : > { %p5975_p10 = pnand %p5973_p9, %p5961_p13  ;;  %p5982_p0 = por %p5981_p12, %p5980_p2 }
  0x21   : > { %p5976_p1 = pneg %p5975_p10 }
  0x23   : > { %p5983_p6 = pnand %p5982_p0, %p5976_p1 }
  0x25   : > { %5986 = shalt.err (!%p5983_p6)
}
  0x26   : > { %s6119_s15 = smov 128   ;;  %s6120_s16 = smov 8  }
  0x27   : > { %5864 = dma.hbm_to_vmem [thread:$0]  (!%p6208_p11), %s8418_s1, 2048, %s6201_s28, [#allocation7], %s6119_s15, %s6119_s15, %s6120_s16  }
  0x28   : > { %s5987_s7 = scalar_lea.hbm %s8420_s3, 18432 }
  0x29   : > { %p5988_p1 = scmp.ne.s32.totalorder %s8420_s3, %s5987_s7  ;;  %p5994_p10 = scmp.lt.u32.totalorder %s5987_s7, %s8420_s3 }
  0x2b   : > { %p5990_p2 = pnand %p5988_p1, %p5961_p13 }
  0x2d   : > { %p5991_p6 = pneg %p5990_p2 }
  0x2f   : > { %p5996_p3 = pnand %p5994_p10, %p5991_p6 }
  0x31   : > { %5999 = shalt.err (!%p5996_p3)
}
  0x32   : > { %s6000_s28 = scalar_lea.vmem %s6212_s6, 18432  ;;  %p6008_p12 = scmp.lt.s32.totalorder %s6212_s6, %s6212_s6 }
  0x33   : > { %p6001_p5 = scmp.ne.s32.totalorder %s6212_s6, %s6000_s28  ;;  %p6009_p0 = scmp.lt.s32.totalorder %s6000_s28, %s6000_s28 }
  0x35   : > { %p6003_p7 = pnand %p6001_p5, %p5961_p13  ;;  %p6010_p1 = por %p6009_p0, %p6008_p12 }
  0x37   : > { %p6004_p9 = pneg %p6003_p7 }
  0x39   : > { %p6011_p2 = pnand %p6010_p1, %p6004_p9 }
  0x3b   : > { %6014 = shalt.err (!%p6011_p2)
}
  0x3c   : > { %5867 = dma.hbm_to_vmem [thread:$0]  (!%p6208_p11), %s8420_s3, 18432, %s6212_s6, [#allocation7], %s6119_s15, %s6119_s15, %s6120_s16  }
  0x3d   : > { %s6273_s29 = sadd.s32 1, %s6115_s21   ;;  %s29_s14 = sadd.s32 1, %s6111_s20 }
  0x3e   : > { %s26_s17 = ssub.s32 %s6115_s21, %s6273_s29  ;;  %p36_p13 = scmp.ne.s32.totalorder %s6111_s20, %s6107_s19 }
  0x3f   : > { %p27_p6 = scmp.eq.s32.totalorder %s26_s17, 0  ;;  %p37_p10 = scmp.eq.s32.totalorder %s6115_s21, 0 }
  0x40   : > { %p8591_p3 = scmp.eq.s32.totalorder %s6178_s22, 1  ;;  %p5878_p7 = scmp.lt.s32.totalorder %s6115_s21, 2 }
  0x41   : > { %s6289_s27 = scalar_select %p27_p6, %s6111_s20, %s29_s14  }
  0x42   : > { %p6283_p5 = por %p8591_p3, %p36_p13  ;;  %p38_p9 = por %p37_p10, %p36_p13 }
  0x43   : > { %s208_s30 = sand.u32 1, %s6111_s20   ;;  %s4375_s6 = sshll.u32 %s6115_s21, 12 }
  0x44   : > { %s8592_s23 = scalar_select %p6283_p5, 1, 0 }
  0x45   : > { %s4360_s7 = sshll.u32 %s208_s30, 8  ;;  %s6296_s10 = scalar_lea.hbm %s8417_s0, %s4375_s6 }
  0x46   : > { %s212_s11 = scalar_lea.vmem [#allocation3], %s4360_s7  ;;  %p6300_p11 = pnand %p5878_p7, %p38_p9 }
  0x47   : > { %s219_s28 = sshll.u32 %s212_s11, 4  ;;  %s6304_s13 = scalar_lea.sflag [#allocation4], %s208_s30  ;;  %s6298_s28 = int_to_ptr.vmem [resolvable:$true] %s219_s28 }
  0x48   : > { %s6015_s14 = scalar_lea.hbm %s6296_s10, 4096  ;;  %p6017_p0 = pneg %p6300_p11 }
  0x49   : > { %p6016_p12 = scmp.ne.s32.totalorder %s6296_s10, %s6015_s14  ;;  %s6020_s6 = scalar_lea.hbm %s8417_s0, 8192 }
  0x4a   : > { %p6021_p13 = scmp.lt.u32.totalorder %s6296_s10, %s8417_s0  ;;  %p6022_p6 = scmp.lt.u32.totalorder %s6020_s6, %s6015_s14 }
  0x4b   : > { %p6018_p1 = pnand %p6017_p0, %p6016_p12  ;;  %p6024_p3 = scmp.lt.u32.totalorder %s6015_s14, %s6296_s10 }
  0x4c   : > { %p6023_p10 = por %p6022_p6, %p6021_p13 }
  0x4d   : > { %p6019_p2 = pneg %p6018_p1 }
  0x4e   : > { %p6025_p7 = por %p6024_p3, %p6023_p10 }
  0x50   : > { %p6026_p9 = pnand %p6025_p7, %p6019_p2 }
  0x52   : > { %6029 = shalt.err (!%p6026_p9)
}
  0x53   : > { %s6030_s30 = scalar_lea.vmem %s6298_s28, 4096  ;;  %s6121_s11 = smov [#allocation3]  }
  0x54   : > { %p6031_p12 = scmp.ne.s32.totalorder %s6298_s28, %s6030_s30  ;;  %s6035_s17 = sshll.u32 %s6121_s11, 4  ;;  %s6036_s17 = int_to_ptr.vmem [resolvable:$false] %s6035_s17 }
  0x55   : > { %s6037_s7 = scalar_lea.vmem %s6036_s17, 8192  ;;  %p6038_p4 = scmp.lt.s32.totalorder %s6298_s28, %s6036_s17 }
  0x56   : > { %p6033_p1 = pnand %p6031_p12, %p6017_p0  ;;  %p6039_p13 = scmp.lt.s32.totalorder %s6037_s7, %s6030_s30 }
  0x58   : > { %p6034_p5 = pneg %p6033_p1  ;;  %p6040_p6 = por %p6039_p13, %p6038_p4 }
  0x5a   : > { %p6041_p10 = pnand %p6040_p6, %p6034_p5 }
  0x5c   : > { %6044 = shalt.err (!%p6041_p10)
}
  0x5d   : > { %5871 = dma.hbm_to_vmem [thread:$0]  (!%p6300_p11), %s6296_s10, 4096, %s6298_s28, %s6304_s13, %s6119_s15, %s6119_s15, %s6120_s16  }
  0x5e   : > { %231 = sbr.rel (%p6197_p8) target bundleno = 1938 (0x792), region = 40 }
  0x65   : > { %s6338_s14 = sand.u32 1, %s6107_s19   ;;  %p8594_p4 = scmp.ne.s32.totalorder %s8587_s24, 0 }
  0x66   : > { %s4364_s6 = sshll.u32 %s6338_s14, 8  ;;  %s234_s8 = scalar_lea.sflag [#allocation4], %s6338_s14 }
  0x67   : > { %s6344_s12 = scalar_lea.vmem [#allocation3], %s4364_s6 }
  0x68   : > { %6090 = dma.done.wait (%p8594_p4), %s234_s8, 4096  }
  0x69   : > { %6092 = vsyncadd (%p8594_p4), %s234_s8, 4294963200  ;;  %p8595_p5 = scmp.eq.s32.totalorder %s6178_s22, 0 }
  0x6b   : > { %6094 = dma.done.wait (%p8595_p5), [#allocation7], 20480   ;;  %p8596_p8 = pmov %p8595_p5 }
  0x6c   : > { %v6122_v0 = vmov 0.0   ;;  %v350_v1 = vld [vmem:[#allocation6] sm:$0xff]  ;;  %v351_v2 = vld [vmem:[#allocation6 + $0x8] sm:$0xff]  ;;  %v352_v3 = vld [vmem:[#allocation6 + $0x10] sm:$0xff]  ;;  %v8429_v40 = vmov 0.0|0.0   ;;  %s8242_s30 = scalar_lea.vmem [#allocation9], %s4364_s6 }
  0x6d   : > { %6096 = vsyncadd (%p8596_p8), [#allocation7], 4294946816  ;;  %272 = vst [vmem:[#allocation2] sm:$0xff] %v6122_v0  ;;  %v6395_v4 = vpack.c.bf16 %v351_v2, %v350_v1  ;;  %v353_v5 = vld [vmem:[#allocation6 + $0x18] sm:$0xff]  ;;  %v354_v7 = vld [vmem:[#allocation6 + $0x20] sm:$0xff]  ;;  %s4376_s11 = sshll.u32 %s6178_s22, 12 }
  0x6e   : > { %273 = vst [vmem:[#allocation2 + $0x8] sm:$0xff] %v6122_v0  ;;  %274 = vst [vmem:[#allocation2 + $0x10] sm:$0xff] %v6122_v0  ;;  %v6397_v6 = vpack.c.bf16 %v353_v5, %v352_v3  ;;  %v355_v8 = vld [vmem:[#allocation6 + $0x28] sm:$0xff]  ;;  %v512_v10 = vld [vmem:[%s6344_s12] sm:$0xff]  ;;  %s4263_s17 = sshll.u32 %s8242_s30, 4  ;;  %s8369_s8 = scalar_lea.hbm %s8422_s5, %s4376_s11  ;;  %s8371_s17 = int_to_ptr.vmem [resolvable:$true] %s4263_s17 }
  0x6f   : > { %275 = vst [vmem:[#allocation2 + $0x18] sm:$0xff] %v6122_v0  ;;  %276 = vst [vmem:[#allocation2 + $0x20] sm:$0xff] %v6122_v0  ;;  %4890 = vmatprep.subr.bf16.mxu1 %v6395_v4  ;;  %v6402_v9 = vpack.c.bf16 %v355_v8, %v354_v7  ;;  %v356_v11 = vld [vmem:[#allocation6 + $0x30] sm:$0xff]  ;;  %v357_v12 = vld [vmem:[#allocation6 + $0x38] sm:$0xff]  ;;  %4601 = vmatprep.mubr.f32.mxu1 %v512_v10  ;;  %s6045_s24 = scalar_lea.vmem %s8371_s17, 4096  ;;  %p8894_p0 = scmp.ne.s32.totalorder %s8592_s23, 0 }
  0x70   : > { %280 = vst [vmem:[#allocation2 + $0x338] sm:$0xff] %v6122_v0  ;;  %281 = vst [vmem:[#allocation2 + $0x340] sm:$0xff] %v6122_v0  ;;  %4892 = vmatpush3.bf16.msra.mxu1 %v6395_v4  ;;  %v6407_v13 = vpack.c.bf16 %v357_v12, %v356_v11  ;;  %v358_v14 = vld [vmem:[#allocation6 + $0x40] sm:$0xff]  ;;  %v359_v15 = vld [vmem:[#allocation6 + $0x48] sm:$0xff]  ;;  %p6046_p11 = scmp.ne.s32.totalorder %s8371_s17, %s6045_s24  ;;  %s6124_s22 = smov [#allocation9]  }
  0x71   : > { %282 = vst [vmem:[#allocation2 + $0x348] sm:$0xff] %v6122_v0  ;;  %283 = vst [vmem:[#allocation2 + $0x350] sm:$0xff] %v6122_v0  ;;  %4894 = vmatprep.subr.bf16.mxu1 %v6397_v6  ;;  %v6411_v16 = vpack.c.bf16 %v359_v15, %v358_v14  ;;  %v360_v17 = vld [vmem:[#allocation6 + $0x50] sm:$0xff]  ;;  %v361_v18 = vld [vmem:[#allocation6 + $0x58] sm:$0xff]  ;;  %s6049_s26 = sshll.u32 %s6124_s22, 4  ;;  %s6050_s26 = int_to_ptr.vmem [resolvable:$false] %s6049_s26 }
  0x72   : > { %287 = vst [vmem:[#allocation2 + $0x38] sm:$0xff] %v6122_v0  ;;  %289 = vst [vmem:[#allocation2 + $0x68] sm:$0xff] %v6122_v0  ;;  %v6415_v19 = vpack.c.bf16 %v361_v18, %v360_v17  ;;  %v362_v20 = vld [vmem:[#allocation6 + $0x60] sm:$0xff]  ;;  %v363_v21 = vld [vmem:[#allocation6 + $0x68] sm:$0xff]  ;;  %p6047_p2 = pnand %p6046_p11, %p8894_p0  ;;  %s6051_s15 = scalar_lea.vmem %s6050_s26, 8192 }
  0x73   : > { %291 = vst [vmem:[#allocation2 + $0x98] sm:$0xff] %v6122_v0  ;;  %293 = vst [vmem:[#allocation2 + $0xc8] sm:$0xff] %v6122_v0  ;;  %v6419_v22 = vpack.c.bf16 %v363_v21, %v362_v20  ;;  %v364_v23 = vld [vmem:[#allocation6 + $0x70] sm:$0xff]  ;;  %v365_v24 = vld [vmem:[#allocation6 + $0x78] sm:$0xff]  ;;  %p6052_p7 = scmp.lt.s32.totalorder %s8371_s17, %s6050_s26  ;;  %p6053_p9 = scmp.lt.s32.totalorder %s6051_s15, %s6045_s24 }
  0x74   : > { %295 = vst [vmem:[#allocation2 + $0xf8] sm:$0xff] %v6122_v0  ;;  %297 = vst [vmem:[#allocation2 + $0x128] sm:$0xff] %v6122_v0  ;;  %4896 = vmatpush3.bf16.msra.mxu1 %v6397_v6  ;;  %v494_v25 = vld [vmem:[#allocation8 + $0x400] sm:$0xff]  ;;  %v495_v26 = vld [vmem:[#allocation8 + $0x408] sm:$0xff]  ;;  %v6425_v29 = vpack.c.bf16 %v365_v24, %v364_v23  ;;  %p6048_p3 = pneg %p6047_p2 }
  0x75   : > { %299 = vst [vmem:[#allocation2 + $0x158] sm:$0xff] %v6122_v0  ;;  %301 = vst [vmem:[#allocation2 + $0x188] sm:$0xff] %v6122_v0  ;;  %4898 = vmatprep.subr.bf16.mxu1 %v6402_v9  ;;  %v6422_v27 = vpack.c.bf16 %v495_v26, %v494_v25  ;;  %v496_v28 = vld [vmem:[#allocation8 + $0x410] sm:$0xff]  ;;  %v497_v30 = vld [vmem:[#allocation8 + $0x418] sm:$0xff]  ;;  %p6054_p12 = por %p6053_p9, %p6052_p7 }
  0x76   : > { %303 = vst [vmem:[#allocation2 + $0x1b8] sm:$0xff] %v6122_v0  ;;  %305 = vst [vmem:[#allocation2 + $0x1e8] sm:$0xff] %v6122_v0  ;;  %v6428_v31 = vpack.c.bf16 %v497_v30, %v496_v28  ;;  %v498_v32 = vld [vmem:[#allocation8 + $0x420] sm:$0xff]  ;;  %v499_v33 = vld [vmem:[#allocation8 + $0x428] sm:$0xff] }
  0x77   : > { %307 = vst [vmem:[#allocation2 + $0x218] sm:$0xff] %v6122_v0  ;;  %309 = vst [vmem:[#allocation2 + $0x248] sm:$0xff] %v6122_v0  ;;  %5114 = vmatprep.subr.bf16.mxu0 %v6422_v27  ;;  %v6433_v34 = vpack.c.bf16 %v499_v33, %v498_v32  ;;  %v366_v35 = vld [vmem:[#allocation8] sm:$0xff]  ;;  %v367_v36 = vld [vmem:[#allocation8 + $0x8] sm:$0xff]  ;;  %p6055_p1 = pnand %p6054_p12, %p6048_p3 }
  0x78   : > { %311 = vst [vmem:[#allocation2 + $0x278] sm:$0xff] %v6122_v0  ;;  %313 = vst [vmem:[#allocation2 + $0x2a8] sm:$0xff] %v6122_v0  ;;  %4900 = vmatpush3.bf16.msra.mxu1 %v6402_v9  ;;  %5116 = vmatpush3.bf16.msra.mxu0 %v6422_v27  ;;  %v513_v37 = vld [vmem:[%s6344_s12 + $0x8] sm:$0xff]  ;;  %v6439_v38 = vpack.c.bf16 %v367_v36, %v366_v35  ;;  %v514_v39 = vld [vmem:[%s6344_s12 + $0x10] sm:$0xff] }
  0x79   : > { %315 = vst [vmem:[#allocation2 + $0x2d8] sm:$0xff] %v6122_v0  ;;  %317 = vst [vmem:[#allocation2 + $0x308] sm:$0xff] %v6122_v0  ;;  %4902 = vmatprep.subr.bf16.mxu1 %v6407_v13  ;;  %5118 = vmatprep.subr.bf16.mxu0 %v6428_v31  ;;  %v368_v41 = vld [vmem:[#allocation8 + $0x10] sm:$0xff]  ;;  %v369_v42 = vld [vmem:[#allocation8 + $0x18] sm:$0xff] }
  0x7a   : > { %318 = vst [vmem:[#allocation2 + $0x50] sm:$0xff] %v6122_v0  ;;  %320 = vst [vmem:[#allocation2 + $0x80] sm:$0xff] %v6122_v0  ;;  %v515_v43 = vld [vmem:[%s6344_s12 + $0x18] sm:$0xff]  ;;  %v6447_v44 = vpack.c.bf16 %v369_v42, %v368_v41  ;;  %v516_v45 = vld [vmem:[%s6344_s12 + $0x20] sm:$0xff] }
  0x7b   : > { %322 = vst [vmem:[#allocation2 + $0xb0] sm:$0xff] %v6122_v0  ;;  %324 = vst [vmem:[#allocation2 + $0xe0] sm:$0xff] %v6122_v0  ;;  %v370_v46 = vld [vmem:[#allocation8 + $0x20] sm:$0xff]  ;;  %v371_v47 = vld [vmem:[#allocation8 + $0x28] sm:$0xff] }
  0x7c   : > { %326 = vst [vmem:[#allocation2 + $0x110] sm:$0xff] %v6122_v0  ;;  %328 = vst [vmem:[#allocation2 + $0x140] sm:$0xff] %v6122_v0  ;;  %4904 = vmatpush3.bf16.msra.mxu1 %v6407_v13  ;;  %5120 = vmatpush3.bf16.msra.mxu0 %v6428_v31  ;;  %v517_v48 = vld [vmem:[%s6344_s12 + $0x28] sm:$0xff]  ;;  %v6453_v49 = vpack.c.bf16 %v371_v47, %v370_v46  ;;  %v518_v50 = vld [vmem:[%s6344_s12 + $0x30] sm:$0xff] }
  0x7d   : > { %330 = vst [vmem:[#allocation2 + $0x170] sm:$0xff] %v6122_v0  ;;  %332 = vst [vmem:[#allocation2 + $0x1a0] sm:$0xff] %v6122_v0  ;;  %4906 = vmatprep.subr.bf16.mxu1 %v6411_v16  ;;  %5122 = vmatprep.subr.bf16.mxu0 %v6433_v34  ;;  %v372_v51 = vld [vmem:[#allocation8 + $0x30] sm:$0xff]  ;;  %v373_v52 = vld [vmem:[#allocation8 + $0x38] sm:$0xff] }
  0x7e   : > { %334 = vst [vmem:[#allocation2 + $0x1d0] sm:$0xff] %v6122_v0  ;;  %336 = vst [vmem:[#allocation2 + $0x200] sm:$0xff] %v6122_v0  ;;  %v519_v53 = vld [vmem:[%s6344_s12 + $0x38] sm:$0xff]  ;;  %v6459_v54 = vpack.c.bf16 %v373_v52, %v372_v51  ;;  %v520_v55 = vld [vmem:[%s6344_s12 + $0x40] sm:$0xff] }
  0x7f   : > { %338 = vst [vmem:[#allocation2 + $0x230] sm:$0xff] %v6122_v0  ;;  %340 = vst [vmem:[#allocation2 + $0x260] sm:$0xff] %v6122_v0  ;;  %v374_v56 = vld [vmem:[#allocation8 + $0x40] sm:$0xff]  ;;  %v375_v57 = vld [vmem:[#allocation8 + $0x48] sm:$0xff] }
  0x80   : > { %342 = vst [vmem:[#allocation2 + $0x290] sm:$0xff] %v6122_v0  ;;  %344 = vst [vmem:[#allocation2 + $0x2c0] sm:$0xff] %v6122_v0  ;;  %4908 = vmatpush3.bf16.msra.mxu1 %v6411_v16  ;;  %5124 = vmatpush3.bf16.msra.mxu0 %v6433_v34  ;;  %v521_v58 = vld [vmem:[%s6344_s12 + $0x48] sm:$0xff]  ;;  %v6465_v59 = vpack.c.bf16 %v375_v57, %v374_v56  ;;  %v522_v60 = vld [vmem:[%s6344_s12 + $0x50] sm:$0xff] }
  0x81   : > { %346 = vst [vmem:[#allocation2 + $0x2f0] sm:$0xff] %v6122_v0  ;;  %348 = vst [vmem:[#allocation2 + $0x320] sm:$0xff] %v6122_v0  ;;  %4910 = vmatprep.subr.bf16.mxu1 %v6415_v19  ;;  %v376_v61 = vld [vmem:[#allocation8 + $0x50] sm:$0xff]  ;;  %v377_v62 = vld [vmem:[#allocation8 + $0x58] sm:$0xff] }
  0x82   : > { %8597 = vst [vmem:[#allocation13_spill] sm:$0xff] %v6422_v27  ;;  %8598 = vst [vmem:[#allocation14_spill] sm:$0xff] %v6428_v31  ;;  %v523_v63 = vld [vmem:[%s6344_s12 + $0x58] sm:$0xff]  ;;  %v6471_v1 = vpack.c.bf16 %v377_v62, %v376_v61  ;;  %v524_v2 = vld [vmem:[%s6344_s12 + $0x60] sm:$0xff] }
  0x83   : > { %8599 = vst [vmem:[#allocation15_spill] sm:$0xff] %v6433_v34  ;;  %8600 = vst [vmem:[#allocation16_spill] sm:$0xff] %v6439_v38  ;;  %v378_v3 = vld [vmem:[#allocation8 + $0x60] sm:$0xff]  ;;  %v379_v5 = vld [vmem:[#allocation8 + $0x68] sm:$0xff] }
  0x84   : > { %4912 = vmatpush3.bf16.msra.mxu1 %v6415_v19  ;;  %8601 = vst [vmem:[#allocation17_spill] sm:$0xff] %v6447_v44  ;;  %8602 = vst [vmem:[#allocation18_spill] sm:$0xff] %v6453_v49  ;;  %v525_v7 = vld [vmem:[%s6344_s12 + $0x68] sm:$0xff]  ;;  %v6477_v8 = vpack.c.bf16 %v379_v5, %v378_v3  ;;  %v526_v10 = vld [vmem:[%s6344_s12 + $0x70] sm:$0xff] }
  0x85   : > { %4914 = vmatprep.subr.bf16.mxu1 %v6419_v22  ;;  %8603 = vst [vmem:[#allocation19_spill] sm:$0xff] %v6459_v54  ;;  %8604 = vst [vmem:[#allocation20_spill] sm:$0xff] %v6465_v59  ;;  %v380_v11 = vld [vmem:[#allocation8 + $0x70] sm:$0xff]  ;;  %v381_v12 = vld [vmem:[#allocation8 + $0x78] sm:$0xff] }
  0x86   : > { %8605 = vst [vmem:[#allocation21_spill] sm:$0xff] %v6471_v1  ;;  %8606 = vst [vmem:[#allocation22_spill] sm:$0xff] %v6477_v8  ;;  %v527_v14 = vld [vmem:[%s6344_s12 + $0x78] sm:$0xff]  ;;  %v6483_v15 = vpack.c.bf16 %v381_v12, %v380_v11  ;;  %v528_v17 = vld [vmem:[%s6344_s12 + $0x80] sm:$0xff] }
  0x87   : > { %v382_v18 = vld [vmem:[#allocation8 + $0x80] sm:$0xff]  ;;  %v383_v20 = vld [vmem:[#allocation8 + $0x88] sm:$0xff]  ;;  %v530_v24 = vld [vmem:[%s6344_s12 + $0x90] sm:$0xff] }
  0x88   : > { %4916 = vmatpush3.bf16.msra.mxu1 %v6419_v22  ;;  %8607 = vst [vmem:[#allocation23_spill] sm:$0xff] %v6483_v15  ;;  %v529_v21 = vld [vmem:[%s6344_s12 + $0x88] sm:$0xff]  ;;  %v6489_v23 = vpack.c.bf16 %v383_v20, %v382_v18  ;;  %v384_v25 = vld [vmem:[#allocation8 + $0x90] sm:$0xff]  ;;  %v385_v26 = vld [vmem:[#allocation8 + $0x98] sm:$0xff] }
  0x89   : > { %4918 = vmatprep.subr.bf16.mxu1 %v6425_v29  ;;  %v531_v28 = vld [vmem:[%s6344_s12 + $0x98] sm:$0xff]  ;;  %v6495_v30 = vpack.c.bf16 %v385_v26, %v384_v25  ;;  %v532_v32 = vld [vmem:[%s6344_s12 + $0xa0] sm:$0xff]  ;;  %v387_v35 = vld [vmem:[#allocation8 + $0xa8] sm:$0xff] }
  0x8a   : > { %8608 = vst [vmem:[#allocation24_spill] sm:$0xff] %v6489_v23  ;;  %v386_v33 = vld [vmem:[#allocation8 + $0xa0] sm:$0xff]  ;;  %v533_v36 = vld [vmem:[%s6344_s12 + $0xa8] sm:$0xff]  ;;  %v388_v41 = vld [vmem:[#allocation8 + $0xb0] sm:$0xff] }
  0x8b   : > { %8609 = vst [vmem:[#allocation25_spill] sm:$0xff] %v6495_v30  ;;  %v389_v42 = vld [vmem:[#allocation8 + $0xb8] sm:$0xff]  ;;  %v536_v46 = vld [vmem:[%s6344_s12 + $0xc0] sm:$0xff]  ;;  %v538_v52 = vld [vmem:[%s6344_s12 + $0xd0] sm:$0xff] }
  0x8c   : > { %4920 = vmatpush3.bf16.msra.mxu1 %v6425_v29  ;;  %v390_v47 = vld [vmem:[#allocation8 + $0xc0] sm:$0xff]  ;;  %v539_v56 = vld [vmem:[%s6344_s12 + $0xd8] sm:$0xff]  ;;  %v542_v61 = vld [vmem:[%s6344_s12 + $0xf0] sm:$0xff] }
  0x8d   : > { %4921 = vmatprep.subr.bf16.mxu1 %v8429_v40  ;;  %v394_v62 = vld [vmem:[#allocation8 + $0xe0] sm:$0xff]  ;;  %v396_v3 = vld [vmem:[#allocation8 + $0xf0] sm:$0xff]  ;;  %v397_v5 = vld [vmem:[#allocation8 + $0xf8] sm:$0xff] }
  0x8e   : > { %v501_v11 = vld [vmem:[#allocation8 + $0x438] sm:$0xff]  ;;  %v6532_v12 = vpack.c.bf16 %v397_v5, %v396_v3  ;;  %v503_v18 = vld [vmem:[#allocation8 + $0x448] sm:$0xff] }
  0x8f   : > { %4602 = vmatmul.mubr.f32.vlgmr.msra.gmra.mrb[0].mxu1 %v513_v37  ;;  %v6501_v37 = vpack.c.bf16 %v387_v35, %v386_v33  ;;  %v871_v20 = vld [vmem:[#allocation2 + $0xf] sm:$0xff]  ;;  %v505_v25 = vld [vmem:[#allocation8 + $0x458] sm:$0xff] }
  0x90   : > { %4604 = vmatprep.mubr.f32.mxu1 %v514_v39  ;;  %4923 = vmatpush1.bf16.msra.mxu1 %v6439_v38  ;;  %v534_v39 = vld [vmem:[%s6344_s12 + $0xb0] sm:$0xff]  ;;  %8615 = vst [vmem:[#allocation31_spill] sm:$0xff] %v6532_v12  ;;  %v507_v33 = vld [vmem:[#allocation8 + $0x468] sm:$0xff]  ;;  %v409_v3 = vld [vmem:[#allocation8 + $0x158] sm:$0xff] }
  0x91   : > { %4924 = vmatprep.subr.bf16.mxu1 %v8429_v40  ;;  %8610 = vst [vmem:[#allocation26_spill] sm:$0xff] %v6501_v37  ;;  %v872_v26 = vld [vmem:[#allocation2 + $0x17] sm:$0xff] }
  0x93   : > { %4605 = vmatmul.mubr.f32.gmra.mrb[2].mxu1 %v515_v43  ;;  %v535_v43 = vld [vmem:[%s6344_s12 + $0xb8] sm:$0xff] }
  0x94   : > { %4607 = vmatprep.mubr.f32.mxu1 %v516_v45  ;;  %4926 = vmatpush1.bf16.msra.mxu1 %v6447_v44  ;;  %v6507_v45 = vpack.c.bf16 %v389_v42, %v388_v41  ;;  %v508_v41 = vld [vmem:[#allocation8 + $0x470] sm:$0xff]  ;;  %v509_v42 = vld [vmem:[#allocation8 + $0x478] sm:$0xff] }
  0x95   : > { %4927 = vmatprep.subr.bf16.mxu1 %v8429_v40 }
  0x96   : > { %8611 = vst [vmem:[#allocation27_spill] sm:$0xff] %v6507_v45 }
  0x97   : > { %4608 = vmatmul.mubr.f32.gmra.mrb[4].mxu1 %v517_v48  ;;  %v391_v48 = vld [vmem:[#allocation8 + $0xc8] sm:$0xff] }
  0x98   : > { %4610 = vmatprep.mubr.f32.mxu1 %v518_v50  ;;  %4929 = vmatpush1.bf16.msra.mxu1 %v6453_v49  ;;  %v537_v50 = vld [vmem:[%s6344_s12 + $0xc8] sm:$0xff]  ;;  %v6513_v51 = vpack.c.bf16 %v391_v48, %v390_v47  ;;  %v401_v47 = vld [vmem:[#allocation8 + $0x118] sm:$0xff] }
  0x99   : > { %4930 = vmatprep.subr.bf16.mxu1 %v8429_v40 }
  0x9a   : > { %8612 = vst [vmem:[#allocation28_spill] sm:$0xff] %v6513_v51 }
  0x9b   : > { %4611 = vmatmul.mubr.f32.gmra.mrb[6].mxu1 %v519_v53  ;;  %v392_v53 = vld [vmem:[#allocation8 + $0xd0] sm:$0xff] }
  0x9c   : > { %4613 = vmatprep.mubr.f32.mxu1 %v520_v55  ;;  %4932 = vmatpush1.bf16.msra.mxu1 %v6459_v54  ;;  %v393_v55 = vld [vmem:[#allocation8 + $0xd8] sm:$0xff] }
  0x9d   : > { %4933 = vmatprep.subr.bf16.mxu1 %v8429_v40  ;;  %v6519_v57 = vpack.c.bf16 %v393_v55, %v392_v53  ;;  %v404_v55 = vld [vmem:[#allocation8 + $0x130] sm:$0xff] }
  0x9f   : > { %4614 = vmatmul.mubr.f32.gmra.mrb[8].mxu1 %v521_v58  ;;  %8613 = vst [vmem:[#allocation29_spill] sm:$0xff] %v6519_v57  ;;  %v540_v58 = vld [vmem:[%s6344_s12 + $0xe0] sm:$0xff] }
  0xa0   : > { %4616 = vmatprep.mubr.f32.mxu1 %v522_v60  ;;  %4935 = vmatpush1.bf16.msra.mxu1 %v6465_v59  ;;  %v541_v60 = vld [vmem:[%s6344_s12 + $0xe8] sm:$0xff] }
  0xa1   : > { %4936 = vmatprep.subr.bf16.mxu1 %v8429_v40 }
  0xa3   : > { %4617 = vmatmul.mubr.f32.gmra.mrb[10].mxu1 %v523_v63  ;;  %v395_v63 = vld [vmem:[#allocation8 + $0xe8] sm:$0xff] }
  0xa4   : > { %4619 = vmatprep.mubr.f32.mxu1 %v524_v2  ;;  %4938 = vmatpush1.bf16.msra.mxu1 %v6471_v1  ;;  %v6527_v2 = vpack.c.bf16 %v395_v63, %v394_v62  ;;  %v408_v63 = vld [vmem:[#allocation8 + $0x150] sm:$0xff] }
  0xa5   : > { %4939 = vmatprep.subr.bf16.mxu1 %v8429_v40  ;;  %v6579_v5 = vpack.c.bf16 %v409_v3, %v408_v63  ;;  %v426_v3 = vld [vmem:[#allocation8 + $0x1e0] sm:$0xff] }
  0xa6   : > { %8614 = vst [vmem:[#allocation30_spill] sm:$0xff] %v6527_v2 }
  0xa7   : > { %4620 = vmatmul.mubr.f32.gmra.mrb[12].mxu1 %v525_v7  ;;  %v543_v7 = vld [vmem:[%s6344_s12 + $0xf8] sm:$0xff]  ;;  %8626 = vst [vmem:[#allocation42_spill] sm:$0xff] %v6579_v5 }
  0xa8   : > { %4622 = vmatprep.mubr.f32.mxu1 %v526_v10  ;;  %4941 = vmatpush1.bf16.msra.mxu1 %v6477_v8  ;;  %v500_v10 = vld [vmem:[#allocation8 + $0x430] sm:$0xff] }
  0xa9   : > { %4942 = vmatprep.subr.bf16.mxu1 %v8429_v40 }
  0xab   : > { %4623 = vmatmul.mubr.f32.gmra.mrb[14].mxu1 %v527_v14  ;;  %v6534_v14 = vpack.c.bf16 %v501_v11, %v500_v10  ;;  %v411_v10 = vld [vmem:[#allocation8 + $0x168] sm:$0xff] }
  0xac   : > { %4625 = vmatprep.mubr.f32.mxu1 %v528_v17  ;;  %4944 = vmatpush1.bf16.msra.mxu1 %v6483_v15  ;;  %v502_v17 = vld [vmem:[#allocation8 + $0x440] sm:$0xff] }
  0xad   : > { %4945 = vmatprep.subr.bf16.mxu1 %v8429_v40  ;;  %8616 = vst [vmem:[#allocation32_spill] sm:$0xff] %v6534_v14  ;;  %5126 = vmatprep.subr.bf16.mxu0 %v6534_v14 }
  0xae   : > { %5128 = vmatpush3.bf16.msra.mxu0 %v6534_v14 }
  0xaf   : > { %4626 = vmatmul.mubr.f32.gmra.mrb[16].mxu1 %v529_v21  ;;  %v6541_v21 = vpack.c.bf16 %v503_v18, %v502_v17  ;;  %v412_v17 = vld [vmem:[#allocation8 + $0x170] sm:$0xff]  ;;  %v413_v18 = vld [vmem:[#allocation8 + $0x178] sm:$0xff] }
  0xb0   : > { %4628 = vmatprep.mubr.f32.mxu1 %v530_v24  ;;  %4947 = vmatpush1.bf16.msra.mxu1 %v6489_v23  ;;  %v504_v24 = vld [vmem:[#allocation8 + $0x450] sm:$0xff] }
  0xb1   : > { %4948 = vmatprep.subr.bf16.mxu1 %v8429_v40  ;;  %8617 = vst [vmem:[#allocation33_spill] sm:$0xff] %v6541_v21  ;;  %5130 = vmatprep.subr.bf16.mxu0 %v6541_v21 }
  0xb2   : > { %5132 = vmatpush3.bf16.msra.mxu0 %v6541_v21 }
  0xb3   : > { %4629 = vmatmul.mubr.f32.gmra.mrb[18].mxu1 %v531_v28  ;;  %v6546_v28 = vpack.c.bf16 %v505_v25, %v504_v24  ;;  %v414_v24 = vld [vmem:[#allocation8 + $0x180] sm:$0xff]  ;;  %v415_v25 = vld [vmem:[#allocation8 + $0x188] sm:$0xff] }
  0xb4   : > { %4631 = vmatprep.mubr.f32.mxu1 %v532_v32  ;;  %4950 = vmatpush1.bf16.msra.mxu1 %v6495_v30  ;;  %v506_v32 = vld [vmem:[#allocation8 + $0x460] sm:$0xff] }
  0xb5   : > { %4951 = vmatprep.subr.bf16.mxu1 %v8429_v40  ;;  %8618 = vst [vmem:[#allocation34_spill] sm:$0xff] %v6546_v28  ;;  %5134 = vmatprep.subr.bf16.mxu0 %v6546_v28  ;;  %v6550_v35 = vpack.c.bf16 %v507_v33, %v506_v32  ;;  %v416_v32 = vld [vmem:[#allocation8 + $0x190] sm:$0xff]  ;;  %v417_v33 = vld [vmem:[#allocation8 + $0x198] sm:$0xff] }
  0xb6   : > { %5136 = vmatpush3.bf16.msra.mxu0 %v6546_v28 }
  0xb7   : > { %4632 = vmatmul.mubr.f32.gmra.mrb[20].mxu1 %v533_v36  ;;  %8619 = vst [vmem:[#allocation35_spill] sm:$0xff] %v6550_v35  ;;  %v398_v36 = vld [vmem:[#allocation8 + $0x100] sm:$0xff]  ;;  %5138 = vmatprep.subr.bf16.mxu0 %v6550_v35 }
  0xb8   : > { %4634 = vmatprep.mubr.f32.mxu1 %v534_v39  ;;  %4953 = vmatpush1.bf16.msra.mxu1 %v6501_v37 }
  0xb9   : > { %4954 = vmatprep.subr.bf16.mxu1 %v8429_v40 }
  0xba   : > { %5140 = vmatpush3.bf16.msra.mxu0 %v6550_v35 }
  0xbb   : > { %4635 = vmatmul.mubr.f32.gmra.mrb[22].mxu1 %v535_v43  ;;  %v6557_v43 = vpack.c.bf16 %v509_v42, %v508_v41  ;;  %v419_v41 = vld [vmem:[#allocation8 + $0x1a8] sm:$0xff] }
  0xbc   : > { %4637 = vmatprep.mubr.f32.mxu1 %v536_v46  ;;  %4956 = vmatpush1.bf16.msra.mxu1 %v6507_v45  ;;  %v400_v46 = vld [vmem:[#allocation8 + $0x110] sm:$0xff] }
  0xbd   : > { %4957 = vmatprep.subr.bf16.mxu1 %v8429_v40  ;;  %8621 = vst [vmem:[#allocation37_spill] sm:$0xff] %v6557_v43  ;;  %v6560_v48 = vpack.c.bf16 %v401_v47, %v400_v46  ;;  %5142 = vmatprep.subr.bf16.mxu0 %v6557_v43  ;;  %v420_v46 = vld [vmem:[#allocation8 + $0x1b0] sm:$0xff]  ;;  %v421_v47 = vld [vmem:[#allocation8 + $0x1b8] sm:$0xff] }
  0xbe   : > { %5144 = vmatpush3.bf16.msra.mxu0 %v6557_v43 }
  0xbf   : > { %4638 = vmatmul.mubr.f32.gmra.mrb[24].mxu1 %v537_v50  ;;  %8622 = vst [vmem:[#allocation38_spill] sm:$0xff] %v6560_v48  ;;  %5146 = vmatprep.subr.bf16.mxu0 %v6395_v4  ;;  %v402_v50 = vld [vmem:[#allocation8 + $0x120] sm:$0xff] }
  0xc0   : > { %4640 = vmatprep.mubr.f32.mxu1 %v538_v52  ;;  %4959 = vmatpush1.bf16.msra.mxu1 %v6513_v51  ;;  %v403_v52 = vld [vmem:[#allocation8 + $0x128] sm:$0xff] }
  0xc1   : > { %4960 = vmatprep.subr.bf16.mxu1 %v8429_v40  ;;  %v6567_v53 = vpack.c.bf16 %v403_v52, %v402_v50  ;;  %v6603_v50 = vpack.c.bf16 %v421_v47, %v420_v46  ;;  %v422_v52 = vld [vmem:[#allocation8 + $0x1c0] sm:$0xff] }
  0xc3   : > { %4641 = vmatmul.mubr.f32.gmra.mrb[26].mxu1 %v539_v56  ;;  %8623 = vst [vmem:[#allocation39_spill] sm:$0xff] %v6567_v53  ;;  %v405_v56 = vld [vmem:[#allocation8 + $0x138] sm:$0xff]  ;;  %8632 = vst [vmem:[#allocation48_spill] sm:$0xff] %v6603_v50 }
  0xc4   : > { %4643 = vmatprep.mubr.f32.mxu1 %v540_v58  ;;  %4962 = vmatpush1.bf16.msra.mxu1 %v6519_v57  ;;  %v6571_v58 = vpack.c.bf16 %v405_v56, %v404_v55  ;;  %v423_v55 = vld [vmem:[#allocation8 + $0x1c8] sm:$0xff] }
  0xc5   : > { %4963 = vmatprep.subr.bf16.mxu1 %v8429_v40  ;;  %v6607_v56 = vpack.c.bf16 %v423_v55, %v422_v52 }
  0xc6   : > { %8624 = vst [vmem:[#allocation40_spill] sm:$0xff] %v6571_v58 }
  0xc7   : > { %4644 = vmatmul.mubr.f32.gmra.mrb[28].mxu1 %v541_v60  ;;  %v406_v60 = vld [vmem:[#allocation8 + $0x140] sm:$0xff]  ;;  %8633 = vst [vmem:[#allocation49_spill] sm:$0xff] %v6607_v56 }
  0xc8   : > { %4646 = vmatprep.mubr.f32.mxu1 %v542_v61  ;;  %4965 = vmatpush1.bf16.msra.mxu1 %v6527_v2  ;;  %v407_v61 = vld [vmem:[#allocation8 + $0x148] sm:$0xff] }
  0xc9   : > { %4966 = vmatprep.subr.bf16.mxu1 %v8429_v40  ;;  %v6575_v62 = vpack.c.bf16 %v407_v61, %v406_v60  ;;  %v424_v60 = vld [vmem:[#allocation8 + $0x1d0] sm:$0xff]  ;;  %v425_v61 = vld [vmem:[#allocation8 + $0x1d8] sm:$0xff] }
  0xca   : > { %v6611_v63 = vpack.c.bf16 %v425_v61, %v424_v60 }
  0xcb   : > { %4647 = vmatmul.mubr.f32.gmra.mrb[30].mxu1 %v543_v7  ;;  %8625 = vst [vmem:[#allocation41_spill] sm:$0xff] %v6575_v62  ;;  %v410_v7 = vld [vmem:[#allocation8 + $0x160] sm:$0xff] }
  0xcc   : > { %4968 = vmatpush1.bf16.msra.mxu1 %v6532_v12  ;;  %1230 = vmatprep.mubr.f32.mxu1 %v6122_v0  ;;  %v6583_v11 = vpack.c.bf16 %v411_v10, %v410_v7  ;;  %8634 = vst [vmem:[#allocation50_spill] sm:$0xff] %v6611_v63  ;;  %v427_v7 = vld [vmem:[#allocation8 + $0x1e8] sm:$0xff] }
  0xcd   : > { %4969 = vmatprep.subr.bf16.mxu1 %v8429_v40  ;;  %v6615_v10 = vpack.c.bf16 %v427_v7, %v426_v3 }
  0xce   : > { %8627 = vst [vmem:[#allocation43_spill] sm:$0xff] %v6583_v11 }
  0xcf   : > { %1231 = vmatmul.mubr.f32.vlgmr.msra.gmra.mrb[32].mxu1 %v871_v20  ;;  %v6587_v20 = vpack.c.bf16 %v413_v18, %v412_v17  ;;  %8635 = vst [vmem:[#allocation51_spill] sm:$0xff] %v6615_v10  ;;  %v6622_v17 = vld [vmem:[%s8419_s2] ss:$0 sm:$0xff] }
  0xd0   : > { %1235 = vmatprep.mubr.f32.mxu1 %v6122_v0  ;;  %v399_v0 = vld [vmem:[#allocation8 + $0x108] sm:$0xff] }
  0xd1   : > { %v6552_v39 = vpack.c.bf16 %v399_v0, %v398_v36  ;;  %8628 = vst [vmem:[#allocation44_spill] sm:$0xff] %v6587_v20  ;;  %v6595_v36 = vpack.c.bf16 %v417_v33, %v416_v32  ;;  %v418_v0 = vld [vmem:[#allocation8 + $0x1a0] sm:$0xff] }
  0xd2   : > { %v6599_v42 = vpack.c.bf16 %v419_v41, %v418_v0 }
  0xd3   : > { %1236 = vmatmul.mubr.f32.gmra.mrb[34].mxu1 %v872_v26  ;;  %8620 = vst [vmem:[#allocation36_spill] sm:$0xff] %v6552_v39  ;;  %v6591_v26 = vpack.c.bf16 %v415_v25, %v414_v24  ;;  %8630 = vst [vmem:[#allocation46_spill] sm:$0xff] %v6595_v36  ;;  %v428_v24 = vld [vmem:[#allocation8 + $0x1f0] sm:$0xff]  ;;  %v429_v25 = vld [vmem:[#allocation8 + $0x1f8] sm:$0xff] }
  0xd4   : > { %4971 = vmatpush1.bf16.msra.mxu1 %v6552_v39  ;;  %8631 = vst [vmem:[#allocation47_spill] sm:$0xff] %v6599_v42  ;;  %v6625_v0 = vpack.c.bf16 %v429_v25, %v428_v24 }
  0xd5   : > { %4972 = vmatprep.subr.bf16.mxu1 %v8429_v40  ;;  %8629 = vst [vmem:[#allocation45_spill] sm:$0xff] %v6591_v26 }
  0xd6   : > { %8636 = vst [vmem:[#allocation52_spill] sm:$0xff] %v6625_v0 }
  0xd8   : > { %4974 = vmatpush1.bf16.msra.mxu1 %v6560_v48 }
  0xd9   : > { %4975 = vmatprep.subr.bf16.mxu1 %v8429_v40 }
  0xdc   : > { %4977 = vmatpush1.bf16.msra.mxu1 %v6567_v53 }
  0xdd   : > { %4978 = vmatprep.subr.bf16.mxu1 %v8429_v40 }
  0xe0   : > { %4980 = vmatpush1.bf16.msra.mxu1 %v6571_v58 }
  0xe1   : > { %4981 = vmatprep.subr.bf16.mxu1 %v8429_v40 }
  0xe4   : > { %4983 = vmatpush1.bf16.msra.mxu1 %v6575_v62 }
  0xe5   : > { %4984 = vmatprep.subr.bf16.mxu1 %v8429_v40 }
  0xe8   : > { %4986 = vmatpush1.bf16.msra.mxu1 %v6579_v5 }
  0xe9   : > { %4987 = vmatprep.subr.bf16.mxu1 %v8429_v40 }
  0xec   : > { %4989 = vmatpush1.bf16.msra.mxu1 %v6583_v11 }
  0xed   : > { %4990 = vmatprep.subr.bf16.mxu1 %v8429_v40 }
  0xf0   : > { %4992 = vmatpush1.bf16.msra.mxu1 %v6587_v20 }
  0xf1   : > { %4993 = vmatprep.subr.bf16.mxu1 %v8429_v40 }
  0xf4   : > { %4995 = vmatpush1.bf16.msra.mxu1 %v6591_v26 }
  0xf5   : > { %4996 = vmatprep.subr.bf16.mxu1 %v8429_v40 }
  0xf8   : > { %4998 = vmatpush1.bf16.msra.mxu1 %v6595_v36 }
  0xf9   : > { %4999 = vmatprep.subr.bf16.mxu1 %v8429_v40 }
  0xfc   : > { %5001 = vmatpush1.bf16.msra.mxu1 %v6599_v42 }
  0xfd   : > { %5002 = vmatprep.subr.bf16.mxu1 %v8429_v40 }
 0x100   : > { %5004 = vmatpush1.bf16.msra.mxu1 %v6603_v50 }
 0x101   : > { %5005 = vmatprep.subr.bf16.mxu1 %v8429_v40 }
 0x104   : > { %5007 = vmatpush1.bf16.msra.mxu1 %v6607_v56 }
 0x105   : > { %5008 = vmatprep.subr.bf16.mxu1 %v8429_v40 }
 0x108   : > { %5010 = vmatpush1.bf16.msra.mxu1 %v6611_v63 }
 0x109   : > { %5011 = vmatprep.subr.bf16.mxu1 %v8429_v40 }
 0x10c   : > { %5013 = vmatpush1.bf16.msra.mxu1 %v6615_v10 }
 0x10d   : > { %5014 = vmatprep.subr.bf16.mxu1 %v8429_v40 }
 0x110   : > { %5016 = vmatpush1.bf16.msra.mxu1 %v6625_v0 }
 0x111   : > { %5017 = vmatprep.subr.bf16.mxu1 %v8429_v40 }
 0x162   : > { %v4603_v18 = vpop.f32.mrb[0].mxu1 }
 0x163   : > { %v622_v32 = vadd.f32 %v4603_v18, %v6622_v17  ;;  %v616_v33 = vpop.f32.mrb[1].mxu1 }
 0x164   : > { %v617_v41 = vadd.f32 %v6622_v17, %v616_v33 }
 0x165   : > { %v776_v46 = vmul.f32 0.1, %v622_v32 }
 0x166   : > { %v775_v47 = vmul.f32 0.1, %v617_v41  ;;  %v4606_v52 = vpop.f32.mrb[2].mxu1 }
 0x167   : > { %v808_v55 = vmax.f32 %v622_v32, %v776_v46  ;;  %v632_v60 = vadd.f32 %v4606_v52, %v6622_v17  ;;  %v626_v61 = vpop.f32.mrb[3].mxu1 }
 0x168   : > { %v807_v3 = vmax.f32 %v617_v41, %v775_v47  ;;  %v627_v7 = vadd.f32 %v6622_v17, %v626_v61 }
 0x169   : > { %840 = vst [vmem:[#allocation2 + $0x48] sm:$0xff] %v808_v55  ;;  %v778_v18 = vmul.f32 0.1, %v632_v60 }
 0x16a   : > { %839 = vst [vmem:[#allocation2 + $0x40] sm:$0xff] %v807_v3  ;;  %v777_v24 = vmul.f32 0.1, %v627_v7  ;;  %v4609_v25 = vpop.f32.mrb[4].mxu1  ;;  %1240 = vmatprep.mubr.f32.mxu1 %v807_v3 }
 0x16b   : > { %v810_v33 = vmax.f32 %v632_v60, %v778_v18  ;;  %v642_v0 = vadd.f32 %v4609_v25, %v6622_v17  ;;  %v636_v10 = vpop.f32.mrb[5].mxu1 }
 0x16c   : > { %v809_v63 = vmax.f32 %v627_v7, %v777_v24  ;;  %v637_v40 = vadd.f32 %v6622_v17, %v636_v10 }
 0x16d   : > { %842 = vst [vmem:[#allocation2 + $0x78] sm:$0xff] %v810_v33  ;;  %v780_v32 = vmul.f32 0.1, %v642_v0 }
 0x16e   : > { %841 = vst [vmem:[#allocation2 + $0x70] sm:$0xff] %v809_v63  ;;  %v779_v46 = vmul.f32 0.1, %v637_v40  ;;  %v4612_v41 = vpop.f32.mrb[6].mxu1 }
 0x16f   : > { %v6634_v47 = vmax.f32 %v642_v0, %v780_v32  ;;  %v652_v52 = vadd.f32 %v4612_v41, %v6622_v17  ;;  %v646_v61 = vpop.f32.mrb[7].mxu1 }
 0x170   : > { %v811_v56 = vmax.f32 %v637_v40, %v779_v46  ;;  %v647_v3 = vadd.f32 %v6622_v17, %v646_v61 }
 0x171   : > { %844 = vst [vmem:[#allocation2 + $0xa8] sm:$0xff] %v6634_v47  ;;  %v6639_v60 = vld [vmem:[#allocation2 + $0x3f] sm:$0xff]  ;;  %v782_v7 = vmul.f32 0.1, %v652_v52  ;;  %v6653_v61 = vld [vmem:[#allocation2 + $0x47] sm:$0xff] }
 0x172   : > { %843 = vst [vmem:[#allocation2 + $0xa0] sm:$0xff] %v811_v56  ;;  %1241 = vmatmul.mubr.f32.gmra.mrb[36].mxu1 %v6639_v60  ;;  %v781_v10 = vmul.f32 0.1, %v647_v3  ;;  %v4615_v18 = vpop.f32.mrb[8].mxu1 }
 0x173   : > { %1245 = vmatprep.mubr.f32.mxu1 %v808_v55  ;;  %v6642_v24 = vmax.f32 %v652_v52, %v782_v7  ;;  %v662_v0 = vadd.f32 %v4615_v18, %v6622_v17  ;;  %v656_v25 = vpop.f32.mrb[9].mxu1 }
 0x174   : > { %v6645_v32 = vmax.f32 %v647_v3, %v781_v10  ;;  %v6647_v40 = vld [vmem:[#allocation2 + $0x79] sm:$0xff]  ;;  %v657_v46 = vadd.f32 %v6622_v17, %v656_v25 }
 0x175   : > { %846 = vst [vmem:[#allocation2 + $0xd8] sm:$0xff] %v6642_v24  ;;  %v6651_v41 = vld [vmem:[#allocation2 + $0x71] sm:$0xff]  ;;  %v784_v50 = vmul.f32 0.1, %v662_v0 }
 0x176   : > { %845 = vst [vmem:[#allocation2 + $0xd0] sm:$0xff] %v6645_v32  ;;  %4681 = vmatprep.mubr.f32.mxu0 %v6651_v41  ;;  %1246 = vmatmul.mubr.f32.gmra.mrb[38].mxu1 %v6653_v61  ;;  %v783_v55 = vmul.f32 0.1, %v657_v46  ;;  %v4618_v52 = vpop.f32.mrb[10].mxu1  ;;  %v6668_v36 = vld [vmem:[#allocation2 + $0x6f] sm:$0xff]  ;;  %v6687_v11 = vld [vmem:[#allocation2 + $0x77] sm:$0xff] }
 0x177   : > { %4682 = vmatmul.mubr.f32.vlgmr.msra.gmra.mrb[0].mxu0 %v6647_v40  ;;  %1250 = vmatprep.mubr.f32.mxu1 %v809_v63  ;;  %v6659_v3 = vmax.f32 %v662_v0, %v784_v50  ;;  %v672_v7 = vadd.f32 %v4618_v52, %v6622_v17  ;;  %v666_v10 = vpop.f32.mrb[11].mxu1 }
 0x178   : > { %v6662_v18 = vmax.f32 %v657_v46, %v783_v55  ;;  %v6664_v25 = vld [vmem:[#allocation2 + $0xa9] sm:$0xff]  ;;  %v667_v42 = vadd.f32 %v6622_v17, %v666_v10  ;;  %5148 = vmatpush3.bf16.msra.mxu0 %v6395_v4 }
 0x179   : > { %848 = vst [vmem:[#allocation2 + $0x108] sm:$0xff] %v6659_v3  ;;  %v6671_v26 = vld [vmem:[#allocation2 + $0xa1] sm:$0xff]  ;;  %v786_v63 = vmul.f32 0.1, %v672_v7  ;;  %5150 = vmatprep.subr.bf16.mxu0 %v6397_v6 }
 0x17a   : > { %1251 = vmatmul.mubr.f32.gmra.mrb[40].mxu1 %v6668_v36  ;;  %4684 = vmatprep.mubr.f32.mxu0 %v6671_v26  ;;  %847 = vst [vmem:[#allocation2 + $0x100] sm:$0xff] %v6662_v18  ;;  %v785_v50 = vmul.f32 0.1, %v667_v42  ;;  %v4621_v0 = vpop.f32.mrb[12].mxu1  ;;  %v6706_v58 = vld [vmem:[#allocation2 + $0x9f] sm:$0xff]  ;;  %v6726_v39 = vld [vmem:[#allocation2 + $0xa7] sm:$0xff] }
 0x17b   : > { %1255 = vmatprep.mubr.f32.mxu1 %v810_v33  ;;  %4685 = vmatmul.mubr.f32.gmra.mrb[2].mxu0 %v6664_v25  ;;  %v6678_v4 = vmax.f32 %v672_v7, %v786_v63  ;;  %v682_v46 = vadd.f32 %v4621_v0, %v6622_v17  ;;  %v676_v55 = vpop.f32.mrb[13].mxu1 }
 0x17c   : > { %v6681_v52 = vmax.f32 %v667_v42, %v785_v50  ;;  %v6683_v10 = vld [vmem:[#allocation2 + $0xd9] sm:$0xff]  ;;  %v677_v20 = vadd.f32 %v6622_v17, %v676_v55  ;;  %5152 = vmatpush3.bf16.msra.mxu0 %v6397_v6 }
 0x17d   : > { %850 = vst [vmem:[#allocation2 + $0x138] sm:$0xff] %v6678_v4  ;;  %v6690_v33 = vld [vmem:[#allocation2 + $0xd1] sm:$0xff]  ;;  %v788_v5 = vmul.f32 0.1, %v682_v46  ;;  %5154 = vmatprep.subr.bf16.mxu0 %v6402_v9 }
 0x17e   : > { %1256 = vmatmul.mubr.f32.gmra.mrb[42].mxu1 %v6687_v11  ;;  %4687 = vmatprep.mubr.f32.mxu0 %v6690_v33  ;;  %849 = vst [vmem:[#allocation2 + $0x130] sm:$0xff] %v6681_v52  ;;  %v787_v42 = vmul.f32 0.1, %v677_v20  ;;  %v4624_v7 = vpop.f32.mrb[14].mxu1  ;;  %v6746_v57 = vld [vmem:[#allocation2 + $0xcf] sm:$0xff]  ;;  %v6766_v37 = vld [vmem:[#allocation2 + $0xd7] sm:$0xff] }
 0x17f   : > { %1260 = vmatprep.mubr.f32.mxu1 %v811_v56  ;;  %4688 = vmatmul.mubr.f32.gmra.mrb[4].mxu0 %v6683_v10  ;;  %v6697_v6 = vmax.f32 %v682_v46, %v788_v5  ;;  %v692_v63 = vadd.f32 %v4624_v7, %v6622_v17  ;;  %v686_v50 = vpop.f32.mrb[15].mxu1 }
 0x180   : > { %v6700_v0 = vmax.f32 %v677_v20, %v787_v42  ;;  %v6702_v55 = vld [vmem:[#allocation2 + $0x109] sm:$0xff]  ;;  %v687_v62 = vadd.f32 %v6622_v17, %v686_v50  ;;  %5156 = vmatpush3.bf16.msra.mxu0 %v6402_v9 }
 0x181   : > { %852 = vst [vmem:[#allocation2 + $0x168] sm:$0xff] %v6697_v6  ;;  %v6709_v56 = vld [vmem:[#allocation2 + $0x101] sm:$0xff]  ;;  %v790_v53 = vmul.f32 0.1, %v692_v63  ;;  %5158 = vmatprep.subr.bf16.mxu0 %v6407_v13 }
 0x182   : > { %1261 = vmatmul.mubr.f32.gmra.mrb[44].mxu1 %v6706_v58  ;;  %4690 = vmatprep.mubr.f32.mxu0 %v6709_v56  ;;  %851 = vst [vmem:[#allocation2 + $0x160] sm:$0xff] %v6700_v0  ;;  %v789_v5 = vmul.f32 0.1, %v687_v62  ;;  %v4627_v20 = vpop.f32.mrb[16].mxu1  ;;  %v6786_v15 = vld [vmem:[#allocation2 + $0xff] sm:$0xff]  ;;  %v6806_v59 = vld [vmem:[#allocation2 + $0x107] sm:$0xff] }
 0x183   : > { %1265 = vmatprep.mubr.f32.mxu1 %v6634_v47  ;;  %4691 = vmatmul.mubr.f32.gmra.mrb[6].mxu0 %v6702_v55  ;;  %v6717_v9 = vmax.f32 %v692_v63, %v790_v53  ;;  %v702_v46 = vadd.f32 %v4627_v20, %v6622_v17  ;;  %v696_v42 = vpop.f32.mrb[17].mxu1 }
 0x184   : > { %v6720_v7 = vmax.f32 %v687_v62, %v789_v5  ;;  %v6722_v50 = vld [vmem:[#allocation2 + $0x139] sm:$0xff]  ;;  %v697_v48 = vadd.f32 %v6622_v17, %v696_v42  ;;  %5160 = vmatpush3.bf16.msra.mxu0 %v6407_v13 }
 0x185   : > { %854 = vst [vmem:[#allocation2 + $0x198] sm:$0xff] %v6717_v9  ;;  %v6729_v47 = vld [vmem:[#allocation2 + $0x131] sm:$0xff]  ;;  %v792_v12 = vmul.f32 0.1, %v702_v46  ;;  %5162 = vmatprep.subr.bf16.mxu0 %v6411_v16 }
 0x186   : > { %1266 = vmatmul.mubr.f32.gmra.mrb[46].mxu1 %v6726_v39  ;;  %4693 = vmatprep.mubr.f32.mxu0 %v6729_v47  ;;  %853 = vst [vmem:[#allocation2 + $0x190] sm:$0xff] %v6720_v7  ;;  %v791_v53 = vmul.f32 0.1, %v697_v48  ;;  %v4630_v62 = vpop.f32.mrb[18].mxu1  ;;  %v6825_v38 = vld [vmem:[#allocation2 + $0x12f] sm:$0xff]  ;;  %v6843_v21 = vld [vmem:[#allocation2 + $0x137] sm:$0xff] }
 0x187   : > { %1270 = vmatprep.mubr.f32.mxu1 %v6645_v32  ;;  %4694 = vmatmul.mubr.f32.gmra.mrb[8].mxu0 %v6722_v50  ;;  %v6737_v13 = vmax.f32 %v702_v46, %v792_v12  ;;  %v712_v63 = vadd.f32 %v4630_v62, %v6622_v17  ;;  %v706_v5 = vpop.f32.mrb[19].mxu1 }
 0x188   : > { %v6740_v20 = vmax.f32 %v697_v48, %v791_v53  ;;  %v6742_v42 = vld [vmem:[#allocation2 + $0x169] sm:$0xff]  ;;  %v707_v2 = vadd.f32 %v6622_v17, %v706_v5  ;;  %5164 = vmatpush3.bf16.msra.mxu0 %v6411_v16 }
 0x189   : > { %856 = vst [vmem:[#allocation2 + $0x1c8] sm:$0xff] %v6737_v13  ;;  %v6749_v32 = vld [vmem:[#allocation2 + $0x161] sm:$0xff]  ;;  %v794_v51 = vmul.f32 0.1, %v712_v63  ;;  %5166 = vmatprep.subr.bf16.mxu0 %v6415_v19 }
 0x18a   : > { %1271 = vmatmul.mubr.f32.gmra.mrb[48].mxu1 %v6746_v57  ;;  %4696 = vmatprep.mubr.f32.mxu0 %v6749_v32  ;;  %855 = vst [vmem:[#allocation2 + $0x1c0] sm:$0xff] %v6740_v20  ;;  %v793_v12 = vmul.f32 0.1, %v707_v2  ;;  %v4633_v48 = vpop.f32.mrb[20].mxu1 }
 0x18b   : > { %1275 = vmatprep.mubr.f32.mxu1 %v6642_v24  ;;  %4697 = vmatmul.mubr.f32.gmra.mrb[10].mxu0 %v6742_v42  ;;  %v6757_v16 = vmax.f32 %v712_v63, %v794_v51  ;;  %v722_v46 = vadd.f32 %v4633_v48, %v6622_v17  ;;  %v716_v53 = vpop.f32.mrb[21].mxu1 }
 0x18c   : > { %v6760_v62 = vmax.f32 %v707_v2, %v793_v12  ;;  %v6762_v5 = vld [vmem:[#allocation2 + $0x199] sm:$0xff]  ;;  %v717_v45 = vadd.f32 %v6622_v17, %v716_v53  ;;  %5168 = vmatpush3.bf16.msra.mxu0 %v6415_v19 }
 0x18d   : > { %858 = vst [vmem:[#allocation2 + $0x1f8] sm:$0xff] %v6757_v16  ;;  %v6769_v24 = vld [vmem:[#allocation2 + $0x191] sm:$0xff]  ;;  %v796_v30 = vmul.f32 0.1, %v722_v46  ;;  %5170 = vmatprep.subr.bf16.mxu0 %v6419_v22 }
 0x18e   : > { %1276 = vmatmul.mubr.f32.gmra.mrb[50].mxu1 %v6766_v37  ;;  %4699 = vmatprep.mubr.f32.mxu0 %v6769_v24  ;;  %857 = vst [vmem:[#allocation2 + $0x1f0] sm:$0xff] %v6760_v62  ;;  %v795_v51 = vmul.f32 0.1, %v717_v45  ;;  %v4636_v2 = vpop.f32.mrb[22].mxu1  ;;  %v6889_v34 = vld [vmem:[#allocation2 + $0x197] sm:$0xff] }
 0x18f   : > { %1280 = vmatprep.mubr.f32.mxu1 %v6662_v18  ;;  %4700 = vmatmul.mubr.f32.gmra.mrb[12].mxu0 %v6762_v5  ;;  %v6777_v19 = vmax.f32 %v722_v46, %v796_v30  ;;  %v732_v63 = vadd.f32 %v4636_v2, %v6622_v17  ;;  %v726_v12 = vpop.f32.mrb[23].mxu1 }
 0x190   : > { %v6780_v48 = vmax.f32 %v717_v45, %v795_v51  ;;  %v6782_v53 = vld [vmem:[#allocation2 + $0x1c9] sm:$0xff]  ;;  %v727_v23 = vadd.f32 %v6622_v17, %v726_v12  ;;  %5172 = vmatpush3.bf16.msra.mxu0 %v6419_v22 }
 0x191   : > { %860 = vst [vmem:[#allocation2 + $0x228] sm:$0xff] %v6777_v19  ;;  %v6789_v18 = vld [vmem:[#allocation2 + $0x1c1] sm:$0xff]  ;;  %v798_v8 = vmul.f32 0.1, %v732_v63  ;;  %5174 = vmatprep.subr.bf16.mxu0 %v6425_v29 }
 0x192   : > { %1281 = vmatmul.mubr.f32.gmra.mrb[52].mxu1 %v6786_v15  ;;  %4702 = vmatprep.mubr.f32.mxu0 %v6789_v18  ;;  %859 = vst [vmem:[#allocation2 + $0x220] sm:$0xff] %v6780_v48  ;;  %v797_v30 = vmul.f32 0.1, %v727_v23  ;;  %v4639_v45 = vpop.f32.mrb[24].mxu1  ;;  %v6897_v27 = vld [vmem:[#allocation2 + $0x1c7] sm:$0xff] }
 0x193   : > { %1285 = vmatprep.mubr.f32.mxu1 %v6659_v3  ;;  %4703 = vmatmul.mubr.f32.gmra.mrb[14].mxu0 %v6782_v53  ;;  %v6797_v22 = vmax.f32 %v732_v63, %v798_v8  ;;  %v742_v46 = vadd.f32 %v4639_v45, %v6622_v17  ;;  %v736_v51 = vpop.f32.mrb[25].mxu1  ;;  %v8637_v8 = vmov 0.0|0.0  }
 0x194   : > { %v6800_v2 = vmax.f32 %v727_v23, %v797_v30  ;;  %v6802_v12 = vld [vmem:[#allocation2 + $0x1f9] sm:$0xff]  ;;  %v737_v1 = vadd.f32 %v6622_v17, %v736_v51  ;;  %5176 = vmatpush3.bf16.msra.mxu0 %v6425_v29 }
 0x195   : > { %862 = vst [vmem:[#allocation2 + $0x258] sm:$0xff] %v6797_v22  ;;  %v6809_v3 = vld [vmem:[#allocation2 + $0x1f1] sm:$0xff]  ;;  %v800_v54 = vmul.f32 0.1, %v742_v46  ;;  %5177 = vmatprep.subr.bf16.mxu0 %v8637_v8 }
 0x196   : > { %1286 = vmatmul.mubr.f32.gmra.mrb[54].mxu1 %v6806_v59  ;;  %4705 = vmatprep.mubr.f32.mxu0 %v6809_v3  ;;  %861 = vst [vmem:[#allocation2 + $0x250] sm:$0xff] %v6800_v2  ;;  %v799_v23 = vmul.f32 0.1, %v737_v1  ;;  %v4642_v63 = vpop.f32.mrb[26].mxu1 }
 0x197   : > { %1290 = vmatprep.mubr.f32.mxu1 %v6681_v52  ;;  %4706 = vmatmul.mubr.f32.gmra.mrb[16].mxu0 %v6802_v12  ;;  %v6817_v29 = vmax.f32 %v742_v46, %v800_v54  ;;  %v752_v30 = vadd.f32 %v4642_v63, %v6622_v17  ;;  %v746_v45 = vpop.f32.mrb[27].mxu1 }
 0x198   : > { %v6820_v51 = vmax.f32 %v737_v1, %v799_v23  ;;  %v6822_v49 = vld [vmem:[#allocation2 + $0x229] sm:$0xff]  ;;  %v747_v44 = vadd.f32 %v6622_v17, %v746_v45 }
 0x199   : > { %864 = vst [vmem:[#allocation2 + $0x288] sm:$0xff] %v6817_v29  ;;  %v6828_v43 = vld [vmem:[#allocation2 + $0x221] sm:$0xff]  ;;  %v802_v52 = vmul.f32 0.1, %v752_v30 }
 0x19a   : > { %1291 = vmatmul.mubr.f32.gmra.mrb[56].mxu1 %v6825_v38  ;;  %4708 = vmatprep.mubr.f32.mxu0 %v6828_v43  ;;  %863 = vst [vmem:[#allocation2 + $0x280] sm:$0xff] %v6820_v51  ;;  %v801_v54 = vmul.f32 0.1, %v747_v44  ;;  %v4645_v1 = vpop.f32.mrb[28].mxu1 }
 0x19b   : > { %1295 = vmatprep.mubr.f32.mxu1 %v6678_v4  ;;  %4709 = vmatmul.mubr.f32.gmra.mrb[18].mxu0 %v6822_v49  ;;  %v6835_v46 = vmax.f32 %v752_v30, %v802_v52  ;;  %v762_v23 = vadd.f32 %v4645_v1, %v6622_v17  ;;  %v756_v63 = vpop.f32.mrb[29].mxu1  ;;  %v6859_v1 = vld [vmem:[#allocation2 + $0x15f] sm:$0xff] }
 0x19c   : > { %v6838_v45 = vmax.f32 %v747_v44, %v801_v54  ;;  %v6840_v35 = vld [vmem:[#allocation2 + $0x259] sm:$0xff]  ;;  %v757_v28 = vadd.f32 %v6622_v17, %v756_v63 }
 0x19d   : > { %866 = vst [vmem:[#allocation2 + $0x2b8] sm:$0xff] %v6835_v46  ;;  %v6846_v14 = vld [vmem:[#allocation2 + $0x251] sm:$0xff]  ;;  %v804_v4 = vmul.f32 0.1, %v762_v23 }
 0x19e   : > { %8638 = vst [vmem:[#allocation53_spill] sm:$0xff] %v6838_v45  ;;  %1296 = vmatmul.mubr.f32.gmra.mrb[58].mxu1 %v6843_v21  ;;  %4711 = vmatprep.mubr.f32.mxu0 %v6846_v14  ;;  %865 = vst [vmem:[#allocation2 + $0x2b0] sm:$0xff] %v6838_v45  ;;  %v803_v30 = vmul.f32 0.1, %v757_v28  ;;  %v4648_v31 = vpop.f32.mrb[30].mxu1 }
 0x19f   : > { %1300 = vmatprep.mubr.f32.mxu1 %v6700_v0  ;;  %4712 = vmatmul.mubr.f32.gmra.mrb[20].mxu0 %v6840_v35  ;;  %v6853_v44 = vmax.f32 %v762_v23, %v804_v4  ;;  %v6871_v0 = vld [vmem:[#allocation2 + $0x167] sm:$0xff] }
 0x1a0   : > { %v6855_v52 = vmax.f32 %v757_v28, %v803_v30  ;;  %v6857_v54 = vld [vmem:[#allocation2 + $0x289] sm:$0xff] }
 0x1a1   : > { %8639 = vst [vmem:[#allocation54_spill] sm:$0xff] %v6853_v44  ;;  %8641 = vst [vmem:[#allocation56_spill] sm:$0xff] %v6857_v54  ;;  %v6862_v63 = vld [vmem:[#allocation2 + $0x281] sm:$0xff]  ;;  %v6881_v30 = vld [vmem:[#allocation2 + $0x18f] sm:$0xff] }
 0x1a2   : > { %8640 = vst [vmem:[#allocation55_spill] sm:$0xff] %v6855_v52  ;;  %868 = vst [vmem:[#allocation2 + $0x2e8] sm:$0xff] %v6853_v44  ;;  %1301 = vmatmul.mubr.f32.gmra.mrb[60].mxu1 %v6859_v1  ;;  %4714 = vmatprep.mubr.f32.mxu0 %v6862_v63 }
 0x1a3   : > { %867 = vst [vmem:[#allocation2 + $0x2e0] sm:$0xff] %v6855_v52  ;;  %1305 = vmatprep.mubr.f32.mxu1 %v6697_v6  ;;  %4715 = vmatmul.mubr.f32.gmra.mrb[22].mxu0 %v6857_v54 }
 0x1a4   : > { %v6869_v28 = vld [vmem:[#allocation2 + $0x2b9] sm:$0xff] }
 0x1a5   : > { %8642 = vst [vmem:[#allocation57_spill] sm:$0xff] %v6869_v28  ;;  %v6873_v23 = vld [vmem:[#allocation2 + $0x2b1] sm:$0xff] }
 0x1a6   : > { %8643 = vst [vmem:[#allocation58_spill] sm:$0xff] %v6873_v23  ;;  %1306 = vmatmul.mubr.f32.gmra.mrb[62].mxu1 %v6871_v0  ;;  %4717 = vmatprep.mubr.f32.mxu0 %v6873_v23  ;;  %v6903_v23 = vld [vmem:[#allocation2 + $0x1ef] sm:$0xff] }
 0x1a7   : > { %1310 = vmatprep.mubr.f32.mxu1 %v6720_v7  ;;  %4718 = vmatmul.mubr.f32.gmra.mrb[24].mxu0 %v6869_v28  ;;  %v6893_v7 = vld [vmem:[#allocation2 + $0x1bf] sm:$0xff] }
 0x1a9   : > { %v6879_v4 = vld [vmem:[#allocation2 + $0x2e9] sm:$0xff] }
 0x1aa   : > { %8644 = vst [vmem:[#allocation59_spill] sm:$0xff] %v6879_v4  ;;  %v6883_v6 = vld [vmem:[#allocation2 + $0x2e1] sm:$0xff]  ;;  %1311 = vmatmul.mubr.f32.gmra.mrb[64].mxu1 %v6881_v30 }
 0x1ab   : > { %8645 = vst [vmem:[#allocation60_spill] sm:$0xff] %v6883_v6  ;;  %4720 = vmatprep.mubr.f32.mxu0 %v6883_v6  ;;  %1315 = vmatprep.mubr.f32.mxu1 %v6717_v9  ;;  %v772_v6 = vadd.f32 %v4648_v31, %v6622_v17  ;;  %v766_v9 = vpop.f32.mrb[31].mxu1  ;;  %v6913_v31 = vld [vmem:[#allocation2 + $0x1f7] sm:$0xff] }
 0x1ac   : > { %4721 = vmatmul.mubr.f32.gmra.mrb[26].mxu0 %v6879_v4  ;;  %v767_v4 = vadd.f32 %v6622_v17, %v766_v9  ;;  %v6917_v17 = vld [vmem:[#allocation2 + $0x21f] sm:$0xff]  ;;  %v431_v9 = vld [vmem:[#allocation8 + $0x208] sm:$0xff] }
 0x1ad   : > { %v806_v28 = vmul.f32 0.1, %v772_v6 }
 0x1ae   : > { %1316 = vmatmul.mubr.f32.gmra.mrb[66].mxu1 %v6889_v34 }
 0x1af   : > { %1320 = vmatprep.mubr.f32.mxu1 %v6740_v20  ;;  %v805_v20 = vmul.f32 0.1, %v767_v4  ;;  %v6905_v54 = vmax.f32 %v772_v6, %v806_v28  ;;  %v6943_v6 = vld [vmem:[#allocation2 + $0x287] sm:$0xff] }
 0x1b1   : > { %8646 = vst [vmem:[#allocation61_spill] sm:$0xff] %v6905_v54  ;;  %870 = vst [vmem:[#allocation2 + $0x318] sm:$0xff] %v6905_v54 }
 0x1b2   : > { %1321 = vmatmul.mubr.f32.gmra.mrb[68].mxu1 %v6893_v7 }
 0x1b3   : > { %1325 = vmatprep.mubr.f32.mxu1 %v6737_v13  ;;  %v6908_v13 = vmax.f32 %v767_v4, %v805_v20  ;;  %v6939_v4 = vld [vmem:[#allocation2 + $0x27f] sm:$0xff]  ;;  %v6959_v20 = vld [vmem:[#allocation2 + $0x2e7] sm:$0xff] }
 0x1b5   : > { %8647 = vst [vmem:[#allocation62_spill] sm:$0xff] %v6908_v13  ;;  %869 = vst [vmem:[#allocation2 + $0x310] sm:$0xff] %v6908_v13  ;;  %v433_v13 = vld [vmem:[#allocation8 + $0x218] sm:$0xff] }
 0x1b6   : > { %1326 = vmatmul.mubr.f32.gmra.mrb[70].mxu1 %v6897_v27 }
 0x1b7   : > { %1330 = vmatprep.mubr.f32.mxu1 %v6760_v62 }
 0x1b8   : > { %v6923_v28 = vld [vmem:[#allocation2 + $0x319] sm:$0xff] }
 0x1b9   : > { %8649 = vst [vmem:[#allocation64_spill] sm:$0xff] %v6923_v28 }
 0x1ba   : > { %1331 = vmatmul.mubr.f32.gmra.mrb[72].mxu1 %v6903_v23 }
 0x1bb   : > { %1335 = vmatprep.mubr.f32.mxu1 %v6757_v16  ;;  %v6926_v16 = vld [vmem:[#allocation2 + $0x227] sm:$0xff] }
 0x1bc   : > { %v6921_v62 = vld [vmem:[#allocation2 + $0x311] sm:$0xff] }
 0x1bd   : > { %8648 = vst [vmem:[#allocation63_spill] sm:$0xff] %v6921_v62  ;;  %4723 = vmatprep.mubr.f32.mxu0 %v6921_v62  ;;  %v936_v62 = vld [vmem:[#allocation2 + $0x19] sm:$0xff] }
 0x1be   : > { %1336 = vmatmul.mubr.f32.gmra.mrb[74].mxu1 %v6913_v31  ;;  %4724 = vmatmul.mubr.f32.gmra.mrb[28].mxu0 %v6923_v28  ;;  %v432_v28 = vld [vmem:[#allocation8 + $0x210] sm:$0xff] }
 0x1bf   : > { %1340 = vmatprep.mubr.f32.mxu1 %v6780_v48  ;;  %v6931_v48 = vld [vmem:[#allocation2 + $0x24f] sm:$0xff] }
 0x1c2   : > { %1341 = vmatmul.mubr.f32.gmra.mrb[76].mxu1 %v6917_v17 }
 0x1c3   : > { %1345 = vmatprep.mubr.f32.mxu1 %v6777_v19  ;;  %v6935_v19 = vld [vmem:[#allocation2 + $0x257] sm:$0xff] }
 0x1c6   : > { %1346 = vmatmul.mubr.f32.gmra.mrb[78].mxu1 %v6926_v16 }
 0x1c7   : > { %1350 = vmatprep.mubr.f32.mxu1 %v6800_v2  ;;  %v6947_v2 = vld [vmem:[#allocation2 + $0x2af] sm:$0xff] }
 0x1ca   : > { %1351 = vmatmul.mubr.f32.gmra.mrb[80].mxu1 %v6931_v48 }
 0x1cb   : > { %1355 = vmatprep.mubr.f32.mxu1 %v6797_v22  ;;  %v6951_v22 = vld [vmem:[#allocation2 + $0x2b7] sm:$0xff] }
 0x1ce   : > { %1356 = vmatmul.mubr.f32.gmra.mrb[82].mxu1 %v6935_v19 }
 0x1cf   : > { %1360 = vmatprep.mubr.f32.mxu1 %v6820_v51  ;;  %v6955_v51 = vld [vmem:[#allocation2 + $0x2df] sm:$0xff] }
 0x1d2   : > { %1361 = vmatmul.mubr.f32.gmra.mrb[84].mxu1 %v6939_v4 }
 0x1d3   : > { %1365 = vmatprep.mubr.f32.mxu1 %v6817_v29  ;;  %v430_v29 = vld [vmem:[#allocation8 + $0x200] sm:$0xff] }
 0x1d4   : > { %v6963_v54 = vpack.c.bf16 %v431_v9, %v430_v29  ;;  %v436_v29 = vld [vmem:[#allocation8 + $0x230] sm:$0xff]  ;;  %v437_v9 = vld [vmem:[#allocation8 + $0x238] sm:$0xff] }
 0x1d6   : > { %1366 = vmatmul.mubr.f32.gmra.mrb[86].mxu1 %v6943_v6  ;;  %8650 = vst [vmem:[#allocation65_spill] sm:$0xff] %v6963_v54 }
 0x1d7   : > { %1370 = vmatprep.mubr.f32.mxu1 %v6838_v45  ;;  %v435_v45 = vld [vmem:[#allocation8 + $0x228] sm:$0xff] }
 0x1da   : > { %1371 = vmatmul.mubr.f32.gmra.mrb[88].mxu1 %v6947_v2 }
 0x1db   : > { %1375 = vmatprep.mubr.f32.mxu1 %v6835_v46  ;;  %v935_v46 = vld [vmem:[#allocation2 + $0x11] sm:$0xff] }
 0x1de   : > { %1376 = vmatmul.mubr.f32.gmra.mrb[90].mxu1 %v6951_v22 }
 0x1df   : > { %1380 = vmatprep.mubr.f32.mxu1 %v6855_v52  ;;  %v434_v52 = vld [vmem:[#allocation8 + $0x220] sm:$0xff] }
 0x1e2   : > { %1381 = vmatmul.mubr.f32.gmra.mrb[92].mxu1 %v6955_v51 }
 0x1e3   : > { %1385 = vmatprep.mubr.f32.mxu1 %v6853_v44  ;;  %v6967_v44 = vpack.c.bf16 %v433_v13, %v432_v28  ;;  %v439_v13 = vld [vmem:[#allocation8 + $0x248] sm:$0xff] }
 0x1e5   : > { %8651 = vst [vmem:[#allocation66_spill] sm:$0xff] %v6967_v44 }
 0x1e6   : > { %1386 = vmatmul.mubr.f32.gmra.mrb[94].mxu1 %v6959_v20 }
 0x1e7   : > { %1455 = vmatprep.mubr.f32.mxu1 %v6639_v60  ;;  %v6972_v60 = vpack.c.bf16 %v435_v45, %v434_v52  ;;  %v6983_v45 = vld [vmem:[#allocation2 + $0x49] sm:$0xff] }
 0x1e9   : > { %8652 = vst [vmem:[#allocation67_spill] sm:$0xff] %v6972_v60 }
 0x1ea   : > { %1456 = vmatmul.mubr.f32.vlgmr.msra.gmra.mrb[32].mxu1 %v935_v46  ;;  %v6975_v46 = vld [vmem:[#allocation2 + $0x41] sm:$0xff] }
 0x1eb   : > { %5019 = vmatpush1.bf16.msra.mxu1 %v6963_v54  ;;  %1460 = vmatprep.mubr.f32.mxu1 %v6653_v61  ;;  %v6980_v61 = vpack.c.bf16 %v437_v9, %v436_v29  ;;  %v442_v29 = vld [vmem:[#allocation8 + $0x260] sm:$0xff]  ;;  %v1044_v54 = vld [vmem:[#allocation2 + $0x169] sm:$0xff] }
 0x1ec   : > { %5020 = vmatprep.subr.bf16.mxu1 %v8637_v8 }
 0x1ed   : > { %8653 = vst [vmem:[#allocation68_spill] sm:$0xff] %v6980_v61 }
 0x1ee   : > { %1461 = vmatmul.mubr.f32.gmra.mrb[34].mxu1 %v936_v62  ;;  %v441_v62 = vld [vmem:[#allocation8 + $0x258] sm:$0xff] }
 0x1ef   : > { %1465 = vmatprep.mubr.f32.mxu1 %v6668_v36  ;;  %5022 = vmatpush1.bf16.msra.mxu1 %v6967_v44  ;;  %v438_v36 = vld [vmem:[#allocation8 + $0x240] sm:$0xff] }
 0x1f0   : > { %5023 = vmatprep.subr.bf16.mxu1 %v8637_v8  ;;  %v6988_v52 = vpack.c.bf16 %v439_v13, %v438_v36 }
 0x1f2   : > { %1466 = vmatmul.mubr.f32.gmra.mrb[36].mxu1 %v6975_v46  ;;  %8654 = vst [vmem:[#allocation69_spill] sm:$0xff] %v6988_v52 }
 0x1f3   : > { %1470 = vmatprep.mubr.f32.mxu1 %v6687_v11  ;;  %5025 = vmatpush1.bf16.msra.mxu1 %v6972_v60  ;;  %v440_v11 = vld [vmem:[#allocation8 + $0x250] sm:$0xff] }
 0x1f4   : > { %5026 = vmatprep.subr.bf16.mxu1 %v8637_v8  ;;  %v6994_v28 = vpack.c.bf16 %v441_v62, %v440_v11 }
 0x1f6   : > { %1471 = vmatmul.mubr.f32.gmra.mrb[38].mxu1 %v6983_v45  ;;  %8655 = vst [vmem:[#allocation70_spill] sm:$0xff] %v6994_v28 }
 0x1f7   : > { %1475 = vmatprep.mubr.f32.mxu1 %v6706_v58  ;;  %5028 = vmatpush1.bf16.msra.mxu1 %v6980_v61  ;;  %v443_v58 = vld [vmem:[#allocation8 + $0x268] sm:$0xff] }
 0x1f8   : > { %5029 = vmatprep.subr.bf16.mxu1 %v8637_v8  ;;  %v7000_v9 = vpack.c.bf16 %v443_v58, %v442_v29 }
 0x1fa   : > { %1476 = vmatmul.mubr.f32.gmra.mrb[40].mxu1 %v6651_v41  ;;  %8656 = vst [vmem:[#allocation71_spill] sm:$0xff] %v7000_v9  ;;  %v444_v41 = vld [vmem:[#allocation8 + $0x270] sm:$0xff] }
 0x1fb   : > { %1480 = vmatprep.mubr.f32.mxu1 %v6726_v39  ;;  %5031 = vmatpush1.bf16.msra.mxu1 %v6988_v52  ;;  %v445_v39 = vld [vmem:[#allocation8 + $0x278] sm:$0xff] }
 0x1fc   : > { %5032 = vmatprep.subr.bf16.mxu1 %v8637_v8  ;;  %v7006_v36 = vpack.c.bf16 %v445_v39, %v444_v41 }
 0x1fe   : > { %1481 = vmatmul.mubr.f32.gmra.mrb[42].mxu1 %v6647_v40  ;;  %8657 = vst [vmem:[#allocation72_spill] sm:$0xff] %v7006_v36  ;;  %v446_v40 = vld [vmem:[#allocation8 + $0x280] sm:$0xff] }
 0x1ff   : > { %1485 = vmatprep.mubr.f32.mxu1 %v6746_v57  ;;  %5034 = vmatpush1.bf16.msra.mxu1 %v6994_v28  ;;  %v447_v57 = vld [vmem:[#allocation8 + $0x288] sm:$0xff] }
 0x200   : > { %5035 = vmatprep.subr.bf16.mxu1 %v8637_v8  ;;  %v7012_v13 = vpack.c.bf16 %v447_v57, %v446_v40 }
 0x202   : > { %1486 = vmatmul.mubr.f32.gmra.mrb[44].mxu1 %v6671_v26  ;;  %8658 = vst [vmem:[#allocation73_spill] sm:$0xff] %v7012_v13  ;;  %v448_v26 = vld [vmem:[#allocation8 + $0x290] sm:$0xff] }
 0x203   : > { %1490 = vmatprep.mubr.f32.mxu1 %v6766_v37  ;;  %5037 = vmatpush1.bf16.msra.mxu1 %v7000_v9  ;;  %v449_v37 = vld [vmem:[#allocation8 + $0x298] sm:$0xff] }
 0x204   : > { %5038 = vmatprep.subr.bf16.mxu1 %v8637_v8  ;;  %v7018_v11 = vpack.c.bf16 %v449_v37, %v448_v26 }
 0x206   : > { %1491 = vmatmul.mubr.f32.gmra.mrb[46].mxu1 %v6664_v25  ;;  %8659 = vst [vmem:[#allocation74_spill] sm:$0xff] %v7018_v11  ;;  %v450_v25 = vld [vmem:[#allocation8 + $0x2a0] sm:$0xff] }
 0x207   : > { %1495 = vmatprep.mubr.f32.mxu1 %v6786_v15  ;;  %5040 = vmatpush1.bf16.msra.mxu1 %v7006_v36  ;;  %v451_v15 = vld [vmem:[#allocation8 + $0x2a8] sm:$0xff] }
 0x208   : > { %5041 = vmatprep.subr.bf16.mxu1 %v8637_v8  ;;  %v7024_v62 = vpack.c.bf16 %v451_v15, %v450_v25  ;;  %v464_v25 = vld [vmem:[#allocation8 + $0x310] sm:$0xff]  ;;  %v465_v15 = vld [vmem:[#allocation8 + $0x318] sm:$0xff] }
 0x20a   : > { %1496 = vmatmul.mubr.f32.gmra.mrb[48].mxu1 %v6690_v33  ;;  %8660 = vst [vmem:[#allocation75_spill] sm:$0xff] %v7024_v62  ;;  %v452_v33 = vld [vmem:[#allocation8 + $0x2b0] sm:$0xff] }
 0x20b   : > { %1500 = vmatprep.mubr.f32.mxu1 %v6806_v59  ;;  %5043 = vmatpush1.bf16.msra.mxu1 %v7012_v13  ;;  %v453_v59 = vld [vmem:[#allocation8 + $0x2b8] sm:$0xff] }
 0x20c   : > { %5044 = vmatprep.subr.bf16.mxu1 %v8637_v8  ;;  %v7030_v29 = vpack.c.bf16 %v453_v59, %v452_v33  ;;  %v999_v33 = vld [vmem:[#allocation2 + $0x40] sm:$0xff] }
 0x20d   : > { %v1038_v13 = vld [vmem:[#allocation2 + $0xd9] sm:$0xff] }
 0x20e   : > { %1501 = vmatmul.mubr.f32.gmra.mrb[50].mxu1 %v6683_v10  ;;  %8661 = vst [vmem:[#allocation76_spill] sm:$0xff] %v7030_v29  ;;  %v454_v10 = vld [vmem:[#allocation8 + $0x2c0] sm:$0xff] }
 0x20f   : > { %1505 = vmatprep.mubr.f32.mxu1 %v6825_v38  ;;  %5046 = vmatpush1.bf16.msra.mxu1 %v7018_v11  ;;  %v455_v38 = vld [vmem:[#allocation8 + $0x2c8] sm:$0xff]  ;;  %v7192_v11 = vld [vmem:[#allocation2 + $0xd0] sm:$0xff] }
 0x210   : > { %5047 = vmatprep.subr.bf16.mxu1 %v8637_v8  ;;  %v7036_v58 = vpack.c.bf16 %v455_v38, %v454_v10  ;;  %v7135_v10 = vpack.c.bf16 %v465_v15, %v464_v25  ;;  %v1034_v25 = vld [vmem:[#allocation2 + $0x79] sm:$0xff] }
 0x212   : > { %1506 = vmatmul.mubr.f32.gmra.mrb[52].mxu1 %v6709_v56  ;;  %8662 = vst [vmem:[#allocation77_spill] sm:$0xff] %v7036_v58  ;;  %v456_v56 = vld [vmem:[#allocation8 + $0x2d0] sm:$0xff] }
 0x213   : > { %1510 = vmatprep.mubr.f32.mxu1 %v6843_v21  ;;  %5049 = vmatpush1.bf16.msra.mxu1 %v7024_v62  ;;  %v457_v21 = vld [vmem:[#allocation8 + $0x2d8] sm:$0xff] }
 0x214   : > { %5050 = vmatprep.subr.bf16.mxu1 %v8637_v8  ;;  %v7042_v41 = vpack.c.bf16 %v457_v21, %v456_v56  ;;  %v467_v56 = vld [vmem:[#allocation8 + $0x328] sm:$0xff] }
 0x215   : > { %v1000_v21 = vld [vmem:[#allocation2 + $0x48] sm:$0xff] }
 0x216   : > { %1511 = vmatmul.mubr.f32.gmra.mrb[54].mxu1 %v6702_v55  ;;  %8663 = vst [vmem:[#allocation78_spill] sm:$0xff] %v7042_v41  ;;  %v458_v55 = vld [vmem:[#allocation8 + $0x2e0] sm:$0xff] }
 0x217   : > { %1515 = vmatprep.mubr.f32.mxu1 %v6859_v1  ;;  %5052 = vmatpush1.bf16.msra.mxu1 %v7030_v29  ;;  %v459_v1 = vld [vmem:[#allocation8 + $0x2e8] sm:$0xff]  ;;  %v1037_v29 = vld [vmem:[#allocation2 + $0xd1] sm:$0xff] }
 0x218   : > { %5053 = vmatprep.subr.bf16.mxu1 %v8637_v8  ;;  %v7048_v39 = vpack.c.bf16 %v459_v1, %v458_v55  ;;  %v1033_v55 = vld [vmem:[#allocation2 + $0x71] sm:$0xff] }
 0x21a   : > { %1516 = vmatmul.mubr.f32.gmra.mrb[56].mxu1 %v6729_v47  ;;  %8664 = vst [vmem:[#allocation79_spill] sm:$0xff] %v7048_v39  ;;  %v460_v47 = vld [vmem:[#allocation8 + $0x2f0] sm:$0xff] }
 0x21b   : > { %1520 = vmatprep.mubr.f32.mxu1 %v6871_v0  ;;  %5055 = vmatpush1.bf16.msra.mxu1 %v7036_v58  ;;  %v461_v0 = vld [vmem:[#allocation8 + $0x2f8] sm:$0xff]  ;;  %v7181_v58 = vld [vmem:[#allocation2 + $0xa8] sm:$0xff] }
 0x21c   : > { %5056 = vmatprep.subr.bf16.mxu1 %v8637_v8  ;;  %v7054_v40 = vpack.c.bf16 %v461_v0, %v460_v47 }
 0x21e   : > { %1521 = vmatmul.mubr.f32.gmra.mrb[58].mxu1 %v6722_v50  ;;  %8665 = vst [vmem:[#allocation80_spill] sm:$0xff] %v7054_v40 }
 0x21f   : > { %1525 = vmatprep.mubr.f32.mxu1 %v6881_v30  ;;  %5058 = vmatpush1.bf16.msra.mxu1 %v7042_v41 }
 0x220   : > { %5059 = vmatprep.subr.bf16.mxu1 %v8637_v8 }
 0x222   : > { %1526 = vmatmul.mubr.f32.gmra.mrb[60].mxu1 %v6749_v32 }
 0x223   : > { %1530 = vmatprep.mubr.f32.mxu1 %v6889_v34  ;;  %5061 = vmatpush1.bf16.msra.mxu1 %v7048_v39  ;;  %v1036_v39 = vld [vmem:[#allocation2 + $0xa9] sm:$0xff] }
 0x224   : > { %5062 = vmatprep.subr.bf16.mxu1 %v8637_v8 }
 0x226   : > { %1531 = vmatmul.mubr.f32.gmra.mrb[62].mxu1 %v6742_v42 }
 0x227   : > { %1535 = vmatprep.mubr.f32.mxu1 %v6893_v7  ;;  %5064 = vmatpush1.bf16.msra.mxu1 %v7054_v40  ;;  %v7170_v40 = vld [vmem:[#allocation2 + $0xa0] sm:$0xff] }
 0x228   : > { %5065 = vmatprep.subr.bf16.mxu1 %v8637_v8 }
 0x22a   : > { %1536 = vmatmul.mubr.f32.gmra.mrb[64].mxu1 %v6769_v24  ;;  %v8666_v24 = vld [vmem:[#allocation56_spill] sm:$0xff] }
 0x22b   : > { %1540 = vmatprep.mubr.f32.mxu1 %v6897_v27 }
 0x22e   : > { %1541 = vmatmul.mubr.f32.gmra.mrb[66].mxu1 %v6762_v5 }
 0x22f   : > { %1545 = vmatprep.mubr.f32.mxu1 %v6903_v23  ;;  %v8667_v23 = vld [vmem:[#allocation58_spill] sm:$0xff] }
 0x230   : > { %8672 = vst [vmem:[#allocation58_spill] sm:$0xff] %v7135_v10 }
 0x232   : > { %1546 = vmatmul.mubr.f32.gmra.mrb[68].mxu1 %v6789_v18 }
 0x233   : > { %1550 = vmatprep.mubr.f32.mxu1 %v6913_v31  ;;  %v8668_v31 = vld [vmem:[#allocation57_spill] sm:$0xff] }
 0x236   : > { %1551 = vmatmul.mubr.f32.gmra.mrb[70].mxu1 %v6782_v53 }
 0x237   : > { %1555 = vmatprep.mubr.f32.mxu1 %v6917_v17  ;;  %v7108_v17 = vld [vmem:[#allocation2 + $0x30f] sm:$0xff] }
 0x23a   : > { %1556 = vmatmul.mubr.f32.gmra.mrb[72].mxu1 %v6809_v3 }
 0x23b   : > { %1560 = vmatprep.mubr.f32.mxu1 %v6926_v16 }
 0x23e   : > { %1561 = vmatmul.mubr.f32.gmra.mrb[74].mxu1 %v6802_v12 }
 0x23f   : > { %1565 = vmatprep.mubr.f32.mxu1 %v6931_v48 }
 0x242   : > { %1566 = vmatmul.mubr.f32.gmra.mrb[76].mxu1 %v6828_v43 }
 0x243   : > { %1570 = vmatprep.mubr.f32.mxu1 %v6935_v19  ;;  %v8669_v19 = vld [vmem:[#allocation60_spill] sm:$0xff] }
 0x246   : > { %1571 = vmatmul.mubr.f32.gmra.mrb[78].mxu1 %v6822_v49 }
 0x247   : > { %1575 = vmatprep.mubr.f32.mxu1 %v6939_v4  ;;  %v7116_v4 = vld [vmem:[#allocation2 + $0x317] sm:$0xff] }
 0x24a   : > { %v7077_v27 = vpop.f32.mrb[0].mxu0  ;;  %1576 = vmatmul.mubr.f32.gmra.mrb[80].mxu1 %v6846_v14 }
 0x24b   : > { %v7080_v34 = vpop.f32.mrb[1].mxu0  ;;  %1580 = vmatprep.mubr.f32.mxu1 %v6943_v6 }
 0x24e   : > { %1581 = vmatmul.mubr.f32.gmra.mrb[82].mxu1 %v6840_v35  ;;  %v7084_v50 = vpop.f32.mrb[2].mxu0 }
 0x24f   : > { %1585 = vmatprep.mubr.f32.mxu1 %v6947_v2  ;;  %v7087_v42 = vpop.f32.mrb[3].mxu0 }
 0x252   : > { %1586 = vmatmul.mubr.f32.gmra.mrb[84].mxu1 %v6862_v63  ;;  %v7090_v32 = vpop.f32.mrb[4].mxu0 }
 0x253   : > { %1590 = vmatprep.mubr.f32.mxu1 %v6951_v22  ;;  %v7093_v5 = vpop.f32.mrb[5].mxu0  ;;  %v462_v22 = vld [vmem:[#allocation8 + $0x300] sm:$0xff] }
 0x256   : > { %1591 = vmatmul.mubr.f32.gmra.mrb[86].mxu1 %v8666_v24  ;;  %v7096_v53 = vpop.f32.mrb[6].mxu0 }
 0x257   : > { %1595 = vmatprep.mubr.f32.mxu1 %v6955_v51  ;;  %v7099_v18 = vpop.f32.mrb[7].mxu0  ;;  %v463_v51 = vld [vmem:[#allocation8 + $0x308] sm:$0xff] }
 0x258   : > { %v7127_v26 = vpack.c.bf16 %v463_v51, %v462_v22  ;;  %v469_v22 = vld [vmem:[#allocation8 + $0x338] sm:$0xff]  ;;  %v7148_v51 = vld [vmem:[#allocation2 + $0x70] sm:$0xff] }
 0x25a   : > { %1596 = vmatmul.mubr.f32.gmra.mrb[88].mxu1 %v8667_v23  ;;  %v7102_v30 = vpop.f32.mrb[8].mxu0  ;;  %8671 = vst [vmem:[#allocation56_spill] sm:$0xff] %v7127_v26 }
 0x25b   : > { %1600 = vmatprep.mubr.f32.mxu1 %v6959_v20  ;;  %v7105_v7 = vpop.f32.mrb[9].mxu0  ;;  %v8670_v20 = vld [vmem:[#allocation59_spill] sm:$0xff] }
 0x25e   : > { %1601 = vmatmul.mubr.f32.gmra.mrb[90].mxu1 %v8668_v31  ;;  %v7110_v16 = vpop.f32.mrb[10].mxu0 }
 0x25f   : > { %1605 = vmatprep.mubr.f32.mxu1 %v7108_v17  ;;  %v7113_v48 = vpop.f32.mrb[11].mxu0 }
 0x262   : > { %1606 = vmatmul.mubr.f32.gmra.mrb[92].mxu1 %v8669_v19  ;;  %v7118_v6 = vpop.f32.mrb[12].mxu0 }
 0x263   : > { %1610 = vmatprep.mubr.f32.mxu1 %v7116_v4  ;;  %v7121_v2 = vpop.f32.mrb[13].mxu0 }
 0x266   : > { %1611 = vmatmul.mubr.f32.gmra.mrb[94].mxu1 %v8670_v20  ;;  %v7124_v57 = vpop.f32.mrb[14].mxu0 }
 0x267   : > { %1680 = vmatprep.mubr.f32.mxu1 %v6975_v46  ;;  %v7129_v37 = vpop.f32.mrb[15].mxu0  ;;  %v466_v46 = vld [vmem:[#allocation8 + $0x320] sm:$0xff] }
 0x268   : > { %v7143_v47 = vpack.c.bf16 %v467_v56, %v466_v46  ;;  %v470_v56 = vld [vmem:[#allocation8 + $0x340] sm:$0xff] }
 0x26a   : > { %1681 = vmatmul.mubr.f32.vlgmr.msra.gmra.mrb[32].mxu1 %v999_v33  ;;  %v7131_v59 = vpop.f32.mrb[16].mxu0  ;;  %8673 = vst [vmem:[#allocation57_spill] sm:$0xff] %v7143_v47 }
 0x26b   : > { %5067 = vmatpush1.bf16.msra.mxu1 %v7127_v26  ;;  %1685 = vmatprep.mubr.f32.mxu1 %v6983_v45  ;;  %v7137_v38 = vpop.f32.mrb[17].mxu0  ;;  %v468_v45 = vld [vmem:[#allocation8 + $0x330] sm:$0xff] }
 0x26c   : > { %5068 = vmatprep.subr.bf16.mxu1 %v8637_v8  ;;  %v7154_v33 = vpack.c.bf16 %v469_v22, %v468_v45  ;;  %v472_v22 = vld [vmem:[#allocation8 + $0x350] sm:$0xff] }
 0x26e   : > { %1686 = vmatmul.mubr.f32.gmra.mrb[34].mxu1 %v1000_v21  ;;  %v7140_v1 = vpop.f32.mrb[18].mxu0  ;;  %8674 = vst [vmem:[#allocation60_spill] sm:$0xff] %v7154_v33  ;;  %v471_v21 = vld [vmem:[#allocation8 + $0x348] sm:$0xff] }
 0x26f   : > { %1690 = vmatprep.mubr.f32.mxu1 %v1033_v55  ;;  %5070 = vmatpush1.bf16.msra.mxu1 %v7135_v10  ;;  %v7145_v0 = vpop.f32.mrb[19].mxu0  ;;  %v7159_v55 = vld [vmem:[#allocation2 + $0x78] sm:$0xff]  ;;  %v1035_v10 = vld [vmem:[#allocation2 + $0xa1] sm:$0xff] }
 0x270   : > { %5071 = vmatprep.subr.bf16.mxu1 %v8637_v8 }
 0x272   : > { %1691 = vmatmul.mubr.f32.gmra.mrb[36].mxu1 %v7148_v51  ;;  %v7151_v15 = vpop.f32.mrb[20].mxu0 }
 0x273   : > { %1695 = vmatprep.mubr.f32.mxu1 %v1034_v25  ;;  %5073 = vmatpush1.bf16.msra.mxu1 %v7143_v47  ;;  %v7156_v46 = vpop.f32.mrb[21].mxu0  ;;  %v7165_v25 = vpack.c.bf16 %v471_v21, %v470_v56  ;;  %v473_v47 = vld [vmem:[#allocation8 + $0x358] sm:$0xff]  ;;  %v474_v21 = vld [vmem:[#allocation8 + $0x360] sm:$0xff] }
 0x274   : > { %5074 = vmatprep.subr.bf16.mxu1 %v8637_v8 }
 0x275   : > { %8675 = vst [vmem:[#allocation59_spill] sm:$0xff] %v7165_v25 }
 0x276   : > { %1696 = vmatmul.mubr.f32.gmra.mrb[38].mxu1 %v7159_v55  ;;  %v7162_v26 = vpop.f32.mrb[22].mxu0 }
 0x277   : > { %1700 = vmatprep.mubr.f32.mxu1 %v1035_v10  ;;  %5076 = vmatpush1.bf16.msra.mxu1 %v7154_v33  ;;  %v7167_v45 = vpop.f32.mrb[23].mxu0  ;;  %v7176_v10 = vpack.c.bf16 %v473_v47, %v472_v22  ;;  %v475_v33 = vld [vmem:[#allocation8 + $0x368] sm:$0xff]  ;;  %v476_v22 = vld [vmem:[#allocation8 + $0x370] sm:$0xff] }
 0x278   : > { %5077 = vmatprep.subr.bf16.mxu1 %v8637_v8 }
 0x279   : > { %8677 = vst [vmem:[#allocation82_spill] sm:$0xff] %v7176_v10 }
 0x27a   : > { %1701 = vmatmul.mubr.f32.gmra.mrb[40].mxu1 %v7170_v40  ;;  %v7173_v41 = vpop.f32.mrb[24].mxu0 }
 0x27b   : > { %8676 = vst [vmem:[#allocation81_spill] sm:$0xff] %v7173_v41  ;;  %1705 = vmatprep.mubr.f32.mxu1 %v1036_v39  ;;  %5079 = vmatpush1.bf16.msra.mxu1 %v7165_v25  ;;  %v7178_v56 = vpop.f32.mrb[25].mxu0  ;;  %v7187_v39 = vpack.c.bf16 %v475_v33, %v474_v21  ;;  %v477_v25 = vld [vmem:[#allocation8 + $0x378] sm:$0xff]  ;;  %v479_v33 = vld [vmem:[#allocation8 + $0x388] sm:$0xff] }
 0x27c   : > { %5080 = vmatprep.subr.bf16.mxu1 %v8637_v8  ;;  %v7196_v36 = vpack.c.bf16 %v477_v25, %v476_v22  ;;  %v7199_v21 = vld [vmem:[#allocation2 + $0xd8] sm:$0xff]  ;;  %v7206_v25 = vld [vmem:[#allocation2 + $0x100] sm:$0xff]  ;;  %v1040_v22 = vld [vmem:[#allocation2 + $0x109] sm:$0xff] }
 0x27d   : > { %8679 = vst [vmem:[#allocation84_spill] sm:$0xff] %v7187_v39  ;;  %v8698_v41 = vld [vmem:[#allocation64_spill] sm:$0xff] }
 0x27e   : > { %1706 = vmatmul.mubr.f32.gmra.mrb[42].mxu1 %v7181_v58  ;;  %8681 = vst [vmem:[#allocation86_spill] sm:$0xff] %v7196_v36 }
 0x27f   : > { %v7184_v62 = vpop.f32.mrb[26].mxu0  ;;  %1710 = vmatprep.mubr.f32.mxu1 %v1037_v29  ;;  %5082 = vmatpush1.bf16.msra.mxu1 %v7176_v10  ;;  %v478_v29 = vld [vmem:[#allocation8 + $0x380] sm:$0xff] }
 0x280   : > { %8678 = vst [vmem:[#allocation83_spill] sm:$0xff] %v7184_v62  ;;  %v7189_v47 = vpop.f32.mrb[27].mxu0  ;;  %5083 = vmatprep.subr.bf16.mxu1 %v8637_v8  ;;  %v1039_v10 = vld [vmem:[#allocation2 + $0x101] sm:$0xff]  ;;  %v7203_v9 = vpack.c.bf16 %v479_v33, %v478_v29  ;;  %v1041_v33 = vld [vmem:[#allocation2 + $0x131] sm:$0xff] }
 0x281   : > { %8680 = vst [vmem:[#allocation85_spill] sm:$0xff] %v7189_v47  ;;  %v7213_v29 = vld [vmem:[#allocation2 + $0x108] sm:$0xff] }
 0x282   : > { %1711 = vmatmul.mubr.f32.gmra.mrb[44].mxu1 %v7192_v11  ;;  %8682 = vst [vmem:[#allocation87_spill] sm:$0xff] %v7203_v9  ;;  %v8697_v47 = vld [vmem:[#allocation62_spill] sm:$0xff] }
 0x283   : > { %1715 = vmatprep.mubr.f32.mxu1 %v1038_v13  ;;  %5085 = vmatpush1.bf16.msra.mxu1 %v7187_v39  ;;  %v480_v13 = vld [vmem:[#allocation8 + $0x390] sm:$0xff]  ;;  %v481_v39 = vld [vmem:[#allocation8 + $0x398] sm:$0xff] }
 0x284   : > { %5086 = vmatprep.subr.bf16.mxu1 %v8637_v8  ;;  %v7210_v28 = vpack.c.bf16 %v481_v39, %v480_v13  ;;  %v7220_v39 = vld [vmem:[#allocation2 + $0x130] sm:$0xff]  ;;  %v1042_v13 = vld [vmem:[#allocation2 + $0x139] sm:$0xff] }
 0x286   : > { %1716 = vmatmul.mubr.f32.gmra.mrb[46].mxu1 %v7199_v21  ;;  %8683 = vst [vmem:[#allocation88_spill] sm:$0xff] %v7210_v28 }
 0x287   : > { %1720 = vmatprep.mubr.f32.mxu1 %v1039_v10  ;;  %5088 = vmatpush1.bf16.msra.mxu1 %v7196_v36  ;;  %v482_v10 = vld [vmem:[#allocation8 + $0x3a0] sm:$0xff]  ;;  %v483_v36 = vld [vmem:[#allocation8 + $0x3a8] sm:$0xff] }
 0x288   : > { %5089 = vmatprep.subr.bf16.mxu1 %v8637_v8  ;;  %v7217_v52 = vpack.c.bf16 %v483_v36, %v482_v10  ;;  %v7227_v36 = vld [vmem:[#allocation2 + $0x138] sm:$0xff]  ;;  %v1043_v10 = vld [vmem:[#allocation2 + $0x161] sm:$0xff] }
 0x28a   : > { %1721 = vmatmul.mubr.f32.gmra.mrb[48].mxu1 %v7206_v25  ;;  %8684 = vst [vmem:[#allocation89_spill] sm:$0xff] %v7217_v52 }
 0x28b   : > { %1725 = vmatprep.mubr.f32.mxu1 %v1040_v22  ;;  %5091 = vmatpush1.bf16.msra.mxu1 %v7203_v9  ;;  %v484_v22 = vld [vmem:[#allocation8 + $0x3b0] sm:$0xff]  ;;  %v485_v9 = vld [vmem:[#allocation8 + $0x3b8] sm:$0xff] }
 0x28c   : > { %5092 = vmatprep.subr.bf16.mxu1 %v8637_v8  ;;  %v7224_v61 = vpack.c.bf16 %v485_v9, %v484_v22  ;;  %v7236_v22 = vld [vmem:[#allocation2 + $0x160] sm:$0xff] }
 0x28e   : > { %1726 = vmatmul.mubr.f32.gmra.mrb[50].mxu1 %v7213_v29  ;;  %8685 = vst [vmem:[#allocation90_spill] sm:$0xff] %v7224_v61 }
 0x28f   : > { %1730 = vmatprep.mubr.f32.mxu1 %v1041_v33  ;;  %5094 = vmatpush1.bf16.msra.mxu1 %v7210_v28  ;;  %v486_v33 = vld [vmem:[#allocation8 + $0x3c0] sm:$0xff]  ;;  %v487_v28 = vld [vmem:[#allocation8 + $0x3c8] sm:$0xff] }
 0x290   : > { %5095 = vmatprep.subr.bf16.mxu1 %v8637_v8  ;;  %v7231_v60 = vpack.c.bf16 %v487_v28, %v486_v33  ;;  %v490_v28 = vld [vmem:[#allocation8 + $0x3e0] sm:$0xff]  ;;  %v491_v33 = vld [vmem:[#allocation8 + $0x3e8] sm:$0xff] }
 0x291   : > { %v7234_v9 = vpop.f32.mrb[28].mxu0 }
 0x292   : > { %1731 = vmatmul.mubr.f32.gmra.mrb[52].mxu1 %v7220_v39  ;;  %8686 = vst [vmem:[#allocation91_spill] sm:$0xff] %v7231_v60  ;;  %8687 = vst [vmem:[#allocation92_spill] sm:$0xff] %v7234_v9  ;;  %v7238_v44 = vpop.f32.mrb[29].mxu0  ;;  %v1045_v9 = vld [vmem:[#allocation2 + $0x191] sm:$0xff] }
 0x293   : > { %1735 = vmatprep.mubr.f32.mxu1 %v1042_v13  ;;  %5097 = vmatpush1.bf16.msra.mxu1 %v7217_v52  ;;  %v488_v13 = vld [vmem:[#allocation8 + $0x3d0] sm:$0xff]  ;;  %v489_v52 = vld [vmem:[#allocation8 + $0x3d8] sm:$0xff]  ;;  %8688 = vst [vmem:[#allocation93_spill] sm:$0xff] %v7238_v44  ;;  %v7249_v44 = vpack.c.bf16 %v491_v33, %v490_v28  ;;  %v1047_v28 = vld [vmem:[#allocation2 + $0x1c1] sm:$0xff] }
 0x294   : > { %5098 = vmatprep.subr.bf16.mxu1 %v8637_v8  ;;  %v8692_v33 = vld [vmem:[#allocation13_spill] sm:$0xff] }
 0x295   : > { %8690 = vst [vmem:[#allocation95_spill] sm:$0xff] %v7249_v44 }
 0x296   : > { %1736 = vmatmul.mubr.f32.gmra.mrb[54].mxu1 %v7227_v36 }
 0x297   : > { %1740 = vmatprep.mubr.f32.mxu1 %v1043_v10  ;;  %5100 = vmatpush1.bf16.msra.mxu1 %v7224_v61  ;;  %v7242_v10 = vpack.c.bf16 %v489_v52, %v488_v13  ;;  %v7245_v61 = vld [vmem:[#allocation2 + $0x168] sm:$0xff]  ;;  %v7252_v52 = vld [vmem:[#allocation2 + $0x190] sm:$0xff]  ;;  %v1046_v13 = vld [vmem:[#allocation2 + $0x199] sm:$0xff] }
 0x298   : > { %5101 = vmatprep.subr.bf16.mxu1 %v8637_v8 }
 0x299   : > { %8689 = vst [vmem:[#allocation94_spill] sm:$0xff] %v7242_v10 }
 0x29a   : > { %1741 = vmatmul.mubr.f32.gmra.mrb[56].mxu1 %v7236_v22 }
 0x29b   : > { %1745 = vmatprep.mubr.f32.mxu1 %v1044_v54  ;;  %5103 = vmatpush1.bf16.msra.mxu1 %v7231_v60  ;;  %v492_v54 = vld [vmem:[#allocation8 + $0x3f0] sm:$0xff]  ;;  %v493_v60 = vld [vmem:[#allocation8 + $0x3f8] sm:$0xff] }
 0x29c   : > { %5104 = vmatprep.subr.bf16.mxu1 %v8637_v8  ;;  %v7256_v62 = vpack.c.bf16 %v493_v60, %v492_v54  ;;  %v7267_v60 = vld [vmem:[#allocation2 + $0x1c8] sm:$0xff]  ;;  %v7271_v54 = vld [vmem:[#allocation2 + $0x1f0] sm:$0xff] }
 0x29e   : > { %1746 = vmatmul.mubr.f32.gmra.mrb[58].mxu1 %v7245_v61  ;;  %8691 = vst [vmem:[#allocation96_spill] sm:$0xff] %v7256_v62 }
 0x29f   : > { %1750 = vmatprep.mubr.f32.mxu1 %v1045_v9  ;;  %5106 = vmatpush1.bf16.msra.mxu1 %v7242_v10  ;;  %v7259_v9 = vld [vmem:[#allocation2 + $0x198] sm:$0xff]  ;;  %v7264_v10 = vld [vmem:[#allocation2 + $0x1c0] sm:$0xff] }
 0x2a0   : > { %5107 = vmatprep.subr.bf16.mxu1 %v8637_v8 }
 0x2a2   : > { %1751 = vmatmul.mubr.f32.gmra.mrb[60].mxu1 %v7252_v52 }
 0x2a3   : > { %1755 = vmatprep.mubr.f32.mxu1 %v1046_v13  ;;  %5109 = vmatpush1.bf16.msra.mxu1 %v7249_v44  ;;  %v1048_v13 = vld [vmem:[#allocation2 + $0x1c9] sm:$0xff] }
 0x2a4   : > { %5110 = vmatprep.subr.bf16.mxu1 %v8637_v8  ;;  %v8696_v44 = vld [vmem:[#allocation63_spill] sm:$0xff] }
 0x2a6   : > { %1756 = vmatmul.mubr.f32.gmra.mrb[62].mxu1 %v7259_v9 }
 0x2a7   : > { %1760 = vmatprep.mubr.f32.mxu1 %v1047_v28  ;;  %5112 = vmatpush1.bf16.msra.mxu1 %v7256_v62  ;;  %v7275_v28 = vld [vmem:[#allocation2 + $0x1f8] sm:$0xff]  ;;  %v7279_v62 = vld [vmem:[#allocation2 + $0x220] sm:$0xff] }
 0x2a8   : > { %5370 = vmatprep.subr.bf16.mxu1 %v8692_v33 }
 0x2aa   : > { %1761 = vmatmul.mubr.f32.gmra.mrb[64].mxu1 %v7264_v10 }
 0x2ab   : > { %1765 = vmatprep.mubr.f32.mxu1 %v1048_v13  ;;  %v7283_v13 = vld [vmem:[#allocation2 + $0x228] sm:$0xff] }
 0x2ae   : > { %1766 = vmatmul.mubr.f32.gmra.mrb[66].mxu1 %v7267_v60 }
 0x2af   : > { %1770 = vmatprep.mubr.f32.mxu1 %v6809_v3  ;;  %v7287_v3 = vld [vmem:[#allocation2 + $0x250] sm:$0xff] }
 0x2b2   : > { %1771 = vmatmul.mubr.f32.gmra.mrb[68].mxu1 %v7271_v54 }
 0x2b3   : > { %1775 = vmatprep.mubr.f32.mxu1 %v6802_v12  ;;  %v7291_v12 = vld [vmem:[#allocation2 + $0x258] sm:$0xff] }
 0x2b6   : > { %1776 = vmatmul.mubr.f32.gmra.mrb[70].mxu1 %v7275_v28 }
 0x2b7   : > { %1780 = vmatprep.mubr.f32.mxu1 %v6828_v43  ;;  %v7295_v43 = vld [vmem:[#allocation2 + $0x280] sm:$0xff] }
 0x2ba   : > { %1781 = vmatmul.mubr.f32.gmra.mrb[72].mxu1 %v7279_v62 }
 0x2bb   : > { %1785 = vmatprep.mubr.f32.mxu1 %v6822_v49  ;;  %v7299_v49 = vld [vmem:[#allocation2 + $0x288] sm:$0xff] }
 0x2be   : > { %1786 = vmatmul.mubr.f32.gmra.mrb[74].mxu1 %v7283_v13 }
 0x2bf   : > { %1790 = vmatprep.mubr.f32.mxu1 %v6846_v14  ;;  %v8693_v14 = vld [vmem:[#allocation53_spill] sm:$0xff] }
 0x2c2   : > { %1791 = vmatmul.mubr.f32.gmra.mrb[76].mxu1 %v7287_v3 }
 0x2c3   : > { %1795 = vmatprep.mubr.f32.mxu1 %v6840_v35  ;;  %v7305_v35 = vld [vmem:[#allocation2 + $0x2b8] sm:$0xff] }
 0x2c6   : > { %1796 = vmatmul.mubr.f32.gmra.mrb[78].mxu1 %v7291_v12 }
 0x2c7   : > { %1800 = vmatprep.mubr.f32.mxu1 %v6862_v63  ;;  %v8694_v63 = vld [vmem:[#allocation55_spill] sm:$0xff] }
 0x2ca   : > { %1801 = vmatmul.mubr.f32.gmra.mrb[80].mxu1 %v7295_v43 }
 0x2cb   : > { %1805 = vmatprep.mubr.f32.mxu1 %v8666_v24  ;;  %v8695_v24 = vld [vmem:[#allocation54_spill] sm:$0xff] }
 0x2ce   : > { %1806 = vmatmul.mubr.f32.gmra.mrb[82].mxu1 %v7299_v49 }
 0x2cf   : > { %1810 = vmatprep.mubr.f32.mxu1 %v8667_v23  ;;  %v1158_v23 = vld [vmem:[#allocation2 + $0x341] sm:$0xff] }
 0x2d0   : > { %4726 = vmatprep.mubr.f32.mxu0 %v1158_v23  ;;  %v8705_v23 = vld [vmem:[#allocation35_spill] sm:$0xff] }
 0x2d2   : > { %1811 = vmatmul.mubr.f32.gmra.mrb[84].mxu1 %v8693_v14  ;;  %v1159_v14 = vld [vmem:[#allocation2 + $0x349] sm:$0xff] }
 0x2d3   : > { %1815 = vmatprep.mubr.f32.mxu1 %v8668_v31  ;;  %4727 = vmatmul.mubr.f32.gmra.mrb[30].mxu0 %v1159_v14  ;;  %v8699_v31 = vld [vmem:[#allocation61_spill] sm:$0xff] }
 0x2d4   : > { %v8706_v14 = vld [vmem:[#allocation37_spill] sm:$0xff] }
 0x2d6   : > { %1816 = vmatmul.mubr.f32.gmra.mrb[86].mxu1 %v7305_v35 }
 0x2d7   : > { %1820 = vmatprep.mubr.f32.mxu1 %v8669_v19  ;;  %v1064_v19 = vld [vmem:[#allocation2 + $0x6f] sm:$0xff] }
 0x2da   : > { %1821 = vmatmul.mubr.f32.gmra.mrb[88].mxu1 %v8694_v63  ;;  %v1066_v63 = vld [vmem:[#allocation2 + $0x9f] sm:$0xff] }
 0x2db   : > { %1825 = vmatprep.mubr.f32.mxu1 %v8670_v20  ;;  %v8700_v20 = vld [vmem:[#allocation14_spill] sm:$0xff] }
 0x2de   : > { %1826 = vmatmul.mubr.f32.gmra.mrb[90].mxu1 %v8695_v24  ;;  %v8704_v24 = vld [vmem:[#allocation34_spill] sm:$0xff] }
 0x2df   : > { %1830 = vmatprep.mubr.f32.mxu1 %v8696_v44  ;;  %v1065_v44 = vld [vmem:[#allocation2 + $0x77] sm:$0xff] }
 0x2e2   : > { %1831 = vmatmul.mubr.f32.gmra.mrb[92].mxu1 %v8697_v47 }
 0x2e3   : > { %1835 = vmatprep.mubr.f32.mxu1 %v8698_v41  ;;  %v8701_v41 = vld [vmem:[#allocation15_spill] sm:$0xff] }
 0x2e6   : > { %1836 = vmatmul.mubr.f32.gmra.mrb[94].mxu1 %v8699_v31  ;;  %v1072_v31 = vld [vmem:[#allocation2 + $0x12f] sm:$0xff] }
 0x2e7   : > { %1905 = vmatprep.mubr.f32.mxu1 %v7148_v51  ;;  %v8702_v51 = vld [vmem:[#allocation32_spill] sm:$0xff] }
 0x2ea   : > { %1906 = vmatmul.mubr.f32.vlgmr.msra.gmra.mrb[32].mxu1 %v1064_v19  ;;  %v1074_v19 = vld [vmem:[#allocation2 + $0x15f] sm:$0xff] }
 0x2eb   : > { %1910 = vmatprep.mubr.f32.mxu1 %v7159_v55  ;;  %5372 = vmatpush3.bf16.msra.mxu1 %v8692_v33  ;;  %v1067_v55 = vld [vmem:[#allocation2 + $0xa7] sm:$0xff] }
 0x2ec   : > { %5374 = vmatprep.subr.bf16.mxu1 %v8700_v20  ;;  %v8703_v33 = vld [vmem:[#allocation33_spill] sm:$0xff] }
 0x2ee   : > { %1911 = vmatmul.mubr.f32.gmra.mrb[34].mxu1 %v1065_v44  ;;  %v1120_v44 = vld [vmem:[#allocation2 + $0x2b0] sm:$0xff] }
 0x2ef   : > { %1915 = vmatprep.mubr.f32.mxu1 %v7170_v40  ;;  %5376 = vmatpush3.bf16.msra.mxu1 %v8700_v20  ;;  %v1068_v40 = vld [vmem:[#allocation2 + $0xcf] sm:$0xff] }
 0x2f0   : > { %5378 = vmatprep.subr.bf16.mxu1 %v8701_v41  ;;  %v1076_v20 = vld [vmem:[#allocation2 + $0x18f] sm:$0xff] }
 0x2f2   : > { %1916 = vmatmul.mubr.f32.gmra.mrb[36].mxu1 %v1066_v63  ;;  %v1123_v63 = vld [vmem:[#allocation2 + $0x2e8] sm:$0xff] }
 0x2f3   : > { %1920 = vmatprep.mubr.f32.mxu1 %v7181_v58  ;;  %5380 = vmatpush3.bf16.msra.mxu1 %v8701_v41  ;;  %v1069_v58 = vld [vmem:[#allocation2 + $0xd7] sm:$0xff]  ;;  %v1122_v41 = vld [vmem:[#allocation2 + $0x2e0] sm:$0xff] }
 0x2f4   : > { %5382 = vmatprep.subr.bf16.mxu1 %v8702_v51 }
 0x2f6   : > { %1921 = vmatmul.mubr.f32.gmra.mrb[38].mxu1 %v1067_v55  ;;  %v1095_v55 = vld [vmem:[#allocation2 + $0x347] sm:$0xff] }
 0x2f7   : > { %1925 = vmatprep.mubr.f32.mxu1 %v7192_v11  ;;  %5384 = vmatpush3.bf16.msra.mxu1 %v8702_v51  ;;  %v1070_v11 = vld [vmem:[#allocation2 + $0xff] sm:$0xff] }
 0x2f8   : > { %5386 = vmatprep.subr.bf16.mxu1 %v8703_v33  ;;  %v7359_v51 = vld [vmem:[#allocation2] sm:$0xff] }
 0x2fa   : > { %1926 = vmatmul.mubr.f32.gmra.mrb[40].mxu1 %v1068_v40 }
 0x2fb   : > { %1930 = vmatprep.mubr.f32.mxu1 %v7199_v21  ;;  %5388 = vmatpush3.bf16.msra.mxu1 %v8703_v33  ;;  %v1071_v21 = vld [vmem:[#allocation2 + $0x107] sm:$0xff] }
 0x2fc   : > { %5390 = vmatprep.subr.bf16.mxu1 %v8704_v24 }
 0x2fe   : > { %1931 = vmatmul.mubr.f32.gmra.mrb[42].mxu1 %v1069_v58 }
 0x2ff   : > { %1935 = vmatprep.mubr.f32.mxu1 %v7206_v25  ;;  %5392 = vmatpush3.bf16.msra.mxu1 %v8704_v24  ;;  %v1073_v25 = vld [vmem:[#allocation2 + $0x137] sm:$0xff] }
 0x300   : > { %5394 = vmatprep.subr.bf16.mxu1 %v8705_v23 }
 0x302   : > { %1936 = vmatmul.mubr.f32.gmra.mrb[44].mxu1 %v1070_v11 }
 0x303   : > { %1940 = vmatprep.mubr.f32.mxu1 %v7213_v29  ;;  %5396 = vmatpush3.bf16.msra.mxu1 %v8705_v23  ;;  %v1075_v29 = vld [vmem:[#allocation2 + $0x167] sm:$0xff] }
 0x304   : > { %5398 = vmatprep.subr.bf16.mxu1 %v8706_v14 }
 0x306   : > { %1941 = vmatmul.mubr.f32.gmra.mrb[46].mxu1 %v1071_v21 }
 0x307   : > { %1945 = vmatprep.mubr.f32.mxu1 %v7220_v39  ;;  %5400 = vmatpush3.bf16.msra.mxu1 %v8706_v14  ;;  %v1077_v39 = vld [vmem:[#allocation2 + $0x197] sm:$0xff] }
 0x30a   : > { %1946 = vmatmul.mubr.f32.gmra.mrb[48].mxu1 %v1072_v31 }
 0x30b   : > { %1950 = vmatprep.mubr.f32.mxu1 %v7227_v36  ;;  %v1078_v36 = vld [vmem:[#allocation2 + $0x1bf] sm:$0xff] }
 0x30e   : > { %1951 = vmatmul.mubr.f32.gmra.mrb[50].mxu1 %v1073_v25 }
 0x30f   : > { %1955 = vmatprep.mubr.f32.mxu1 %v7236_v22  ;;  %v1079_v22 = vld [vmem:[#allocation2 + $0x1c7] sm:$0xff] }
 0x312   : > { %1956 = vmatmul.mubr.f32.gmra.mrb[52].mxu1 %v1074_v19 }
 0x313   : > { %1960 = vmatprep.mubr.f32.mxu1 %v7245_v61  ;;  %v1080_v61 = vld [vmem:[#allocation2 + $0x1ef] sm:$0xff] }
 0x316   : > { %1961 = vmatmul.mubr.f32.gmra.mrb[54].mxu1 %v1075_v29 }
 0x317   : > { %1965 = vmatprep.mubr.f32.mxu1 %v7252_v52  ;;  %v1081_v52 = vld [vmem:[#allocation2 + $0x1f7] sm:$0xff] }
 0x31a   : > { %1966 = vmatmul.mubr.f32.gmra.mrb[56].mxu1 %v1076_v20 }
 0x31b   : > { %1970 = vmatprep.mubr.f32.mxu1 %v7259_v9  ;;  %v1082_v9 = vld [vmem:[#allocation2 + $0x21f] sm:$0xff] }
 0x31e   : > { %1971 = vmatmul.mubr.f32.gmra.mrb[58].mxu1 %v1077_v39 }
 0x31f   : > { %1975 = vmatprep.mubr.f32.mxu1 %v7264_v10  ;;  %v1083_v10 = vld [vmem:[#allocation2 + $0x227] sm:$0xff] }
 0x322   : > { %1976 = vmatmul.mubr.f32.gmra.mrb[60].mxu1 %v1078_v36  ;;  %v5924_v36 = vld [vmem:[%s6344_s12] sm:$0xff] }
 0x323   : > { %1980 = vmatprep.mubr.f32.mxu1 %v7267_v60  ;;  %v1084_v60 = vld [vmem:[#allocation2 + $0x24f] sm:$0xff] }
 0x326   : > { %1981 = vmatmul.mubr.f32.gmra.mrb[62].mxu1 %v1079_v22 }
 0x327   : > { %1985 = vmatprep.mubr.f32.mxu1 %v7271_v54  ;;  %v1085_v54 = vld [vmem:[#allocation2 + $0x257] sm:$0xff] }
 0x32a   : > { %1986 = vmatmul.mubr.f32.gmra.mrb[64].mxu1 %v1080_v61 }
 0x32b   : > { %1990 = vmatprep.mubr.f32.mxu1 %v7275_v28  ;;  %v1086_v28 = vld [vmem:[#allocation2 + $0x27f] sm:$0xff] }
 0x32e   : > { %1991 = vmatmul.mubr.f32.gmra.mrb[66].mxu1 %v1081_v52 }
 0x32f   : > { %1995 = vmatprep.mubr.f32.mxu1 %v7279_v62  ;;  %v1087_v62 = vld [vmem:[#allocation2 + $0x287] sm:$0xff] }
 0x332   : > { %1996 = vmatmul.mubr.f32.gmra.mrb[68].mxu1 %v1082_v9  ;;  %v5925_v9 = vld [vmem:[%s6344_s12 + $0x8] sm:$0xff] }
 0x333   : > { %2000 = vmatprep.mubr.f32.mxu1 %v7283_v13  ;;  %v1088_v13 = vld [vmem:[#allocation2 + $0x2af] sm:$0xff] }
 0x336   : > { %2001 = vmatmul.mubr.f32.gmra.mrb[70].mxu1 %v1083_v10 }
 0x337   : > { %2005 = vmatprep.mubr.f32.mxu1 %v7287_v3  ;;  %v1089_v3 = vld [vmem:[#allocation2 + $0x2b7] sm:$0xff] }
 0x33a   : > { %2006 = vmatmul.mubr.f32.gmra.mrb[72].mxu1 %v1084_v60 }
 0x33b   : > { %2010 = vmatprep.mubr.f32.mxu1 %v7291_v12  ;;  %v1090_v12 = vld [vmem:[#allocation2 + $0x2df] sm:$0xff] }
 0x33e   : > { %2011 = vmatmul.mubr.f32.gmra.mrb[74].mxu1 %v1085_v54 }
 0x33f   : > { %2015 = vmatprep.mubr.f32.mxu1 %v7295_v43  ;;  %v1091_v43 = vld [vmem:[#allocation2 + $0x2e7] sm:$0xff] }
 0x342   : > { %2016 = vmatmul.mubr.f32.gmra.mrb[76].mxu1 %v1086_v28 }
 0x343   : > { %2020 = vmatprep.mubr.f32.mxu1 %v7299_v49  ;;  %v5922_v49 = vld [vmem:[#allocation2 + $0x318] sm:$0xff] }
 0x346   : > { %2021 = vmatmul.mubr.f32.gmra.mrb[78].mxu1 %v1087_v62 }
 0x347   : > { %2025 = vmatprep.mubr.f32.mxu1 %v1120_v44 }
 0x34a   : > { %2026 = vmatmul.mubr.f32.gmra.mrb[80].mxu1 %v1088_v13  ;;  %v8709_v13 = vld [vmem:[#allocation16_spill] sm:$0xff] }
 0x34b   : > { %2030 = vmatprep.mubr.f32.mxu1 %v7305_v35  ;;  %v1094_v35 = vld [vmem:[#allocation2 + $0x33f] sm:$0xff] }
 0x34e   : > { %2031 = vmatmul.mubr.f32.gmra.mrb[82].mxu1 %v1089_v3 }
 0x34f   : > { %2035 = vmatprep.mubr.f32.mxu1 %v1122_v41 }
 0x352   : > { %2036 = vmatmul.mubr.f32.gmra.mrb[84].mxu1 %v1090_v12  ;;  %v5926_v12 = vld [vmem:[%s6344_s12 + $0x10] sm:$0xff] }
 0x353   : > { %2040 = vmatprep.mubr.f32.mxu1 %v1123_v63 }
 0x356   : > { %2041 = vmatmul.mubr.f32.gmra.mrb[86].mxu1 %v1091_v43 }
 0x357   : > { %2045 = vmatprep.mubr.f32.mxu1 %v8697_v47 }
 0x35a   : > { %2046 = vmatmul.mubr.f32.gmra.mrb[88].mxu1 %v7108_v17  ;;  %v7370_v17 = vld [vmem:[%s8421_s4] ss:$0 sm:$0xff] }
 0x35b   : > { %2050 = vmatprep.mubr.f32.mxu1 %v5922_v49 }
 0x35e   : > { %2051 = vmatmul.mubr.f32.gmra.mrb[90].mxu1 %v7116_v4 }
 0x35f   : > { %2055 = vmatprep.mubr.f32.mxu1 %v7359_v51 }
 0x362   : > { %2056 = vmatmul.mubr.f32.gmra.mrb[92].mxu1 %v1094_v35  ;;  %v8711_v35 = vld [vmem:[#allocation17_spill] sm:$0xff] }
 0x363   : > { %2060 = vmatprep.mubr.f32.mxu1 %v7359_v51 }
 0x366   : > { %2061 = vmatmul.mubr.f32.gmra.mrb[94].mxu1 %v1095_v55 }
 0x3a6   : > { %v7363_v33 = vpop.f32.mrb[30].mxu0 }
 0x3a7   : > { %v7365_v40 = vpop.f32.mrb[31].mxu0 }
 0x3bd   : > { %v1907_v4 = vpop.f32.mrb[32].mxu1 }
 0x3be   : > { %v5401_v47 = vadd.f32 %v7370_v17, %v1907_v4  ;;  %v1909_v24 = vpop.f32.mrb[33].mxu1 }
 0x3bf   : > { %v5927_v24 = vld [vmem:[%s6344_s12 + $0x18] sm:$0xff] }
 0x3c0   : > { %v2133_v58 = vadd.f32 %v5401_v47, %v7080_v34 }
 0x3c1   : > { %v1912_v23 = vpop.f32.mrb[34].mxu1 }
 0x3c2   : > { %v2291_v11 = vmul.f32 0.1, %v2133_v58  ;;  %v5402_v14 = vadd.f32 %v7370_v17, %v1912_v23  ;;  %v1914_v21 = vpop.f32.mrb[35].mxu1 }
 0x3c4   : > { %v2323_v31 = vmax.f32 %v2133_v58, %v2291_v11  ;;  %v2138_v25 = vadd.f32 %v5402_v14, %v7077_v27  ;;  %v8713_v14 = vld [vmem:[#allocation18_spill] sm:$0xff] }
 0x3c5   : > { %v1917_v19 = vpop.f32.mrb[36].mxu1 }
 0x3c6   : > { %v2292_v29 = vmul.f32 0.1, %v2138_v25  ;;  %v5403_v20 = vadd.f32 %v7370_v17, %v1917_v19  ;;  %v1919_v39 = vpop.f32.mrb[37].mxu1  ;;  %v7378_v22 = vadd.f32 %v5924_v36, %v2323_v31  ;;  %v5928_v19 = vld [vmem:[%s6344_s12 + $0x20] sm:$0xff]  ;;  %v8715_v36 = vld [vmem:[#allocation19_spill] sm:$0xff] }
 0x3c8   : > { %8707 = vst [vmem:[#allocation13_spill] sm:$0xff] %v7378_v22  ;;  %v2324_v61 = vmax.f32 %v2138_v25, %v2292_v29  ;;  %v2143_v34 = vadd.f32 %v5403_v20, %v7087_v42  ;;  %4761 = vmatprep.mubr.f32.mxu0 %v7378_v22 }
 0x3c9   : > { %v1922_v52 = vpop.f32.mrb[38].mxu1 }
 0x3ca   : > { %v7383_v10 = vadd.f32 %v5925_v9, %v2324_v61  ;;  %v2293_v60 = vmul.f32 0.1, %v2143_v34  ;;  %v5404_v27 = vadd.f32 %v7370_v17, %v1922_v52  ;;  %v1924_v54 = vpop.f32.mrb[39].mxu1  ;;  %v5929_v9 = vld [vmem:[%s6344_s12 + $0x28] sm:$0xff] }
 0x3cc   : > { %8708 = vst [vmem:[#allocation53_spill] sm:$0xff] %v7383_v10  ;;  %v2325_v28 = vmax.f32 %v2143_v34, %v2293_v60  ;;  %v2148_v62 = vadd.f32 %v5404_v27, %v7084_v50  ;;  %4762 = vmatmul.mubr.f32.vlgmr.msra.gmra.mrb[32].mxu0 %v7383_v10 }
 0x3cd   : > { %v1927_v44 = vpop.f32.mrb[40].mxu1  ;;  %5179 = vmatpush1.bf16.msra.mxu0 %v8709_v13 }
 0x3ce   : > { %v2294_v42 = vmul.f32 0.1, %v2148_v62  ;;  %v5405_v3 = vadd.f32 %v7370_v17, %v1927_v44  ;;  %v1929_v41 = vpop.f32.mrb[41].mxu1  ;;  %v7391_v63 = vadd.f32 %v5926_v12, %v2325_v28  ;;  %5180 = vmatprep.subr.bf16.mxu0 %v8637_v8  ;;  %v8717_v28 = vld [vmem:[#allocation20_spill] sm:$0xff] }
 0x3d0   : > { %8710 = vst [vmem:[#allocation55_spill] sm:$0xff] %v7391_v63  ;;  %v2326_v43 = vmax.f32 %v2148_v62, %v2294_v42  ;;  %v2153_v49 = vadd.f32 %v5405_v3, %v7093_v5  ;;  %4764 = vmatprep.mubr.f32.mxu0 %v7391_v63  ;;  %v5930_v42 = vld [vmem:[%s6344_s12 + $0x30] sm:$0xff] }
 0x3d1   : > { %v1932_v50 = vpop.f32.mrb[42].mxu1  ;;  %5182 = vmatpush1.bf16.msra.mxu0 %v8711_v35 }
 0x3d2   : > { %v2295_v55 = vmul.f32 0.1, %v2153_v49  ;;  %v5406_v4 = vadd.f32 %v7370_v17, %v1932_v50  ;;  %v1934_v47 = vpop.f32.mrb[43].mxu1  ;;  %v7399_v58 = vadd.f32 %v5927_v24, %v2326_v43  ;;  %5183 = vmatprep.subr.bf16.mxu0 %v8637_v8  ;;  %v8719_v43 = vld [vmem:[#allocation21_spill] sm:$0xff] }
 0x3d4   : > { %8712 = vst [vmem:[#allocation54_spill] sm:$0xff] %v7399_v58  ;;  %v2327_v23 = vmax.f32 %v2153_v49, %v2295_v55  ;;  %v2158_v11 = vadd.f32 %v5406_v4, %v7090_v32  ;;  %4765 = vmatmul.mubr.f32.gmra.mrb[34].mxu0 %v7399_v58  ;;  %v5931_v55 = vld [vmem:[%s6344_s12 + $0x38] sm:$0xff] }
 0x3d5   : > { %v1937_v5 = vpop.f32.mrb[44].mxu1  ;;  %5185 = vmatpush1.bf16.msra.mxu0 %v8713_v14 }
 0x3d6   : > { %v2296_v21 = vmul.f32 0.1, %v2158_v11  ;;  %v5407_v31 = vadd.f32 %v7370_v17, %v1937_v5  ;;  %v1939_v25 = vpop.f32.mrb[45].mxu1  ;;  %v7407_v29 = vadd.f32 %v5928_v19, %v2327_v23  ;;  %5186 = vmatprep.subr.bf16.mxu0 %v8637_v8  ;;  %v8721_v23 = vld [vmem:[#allocation22_spill] sm:$0xff] }
 0x3d8   : > { %8714 = vst [vmem:[#allocation63_spill] sm:$0xff] %v7407_v29  ;;  %v2328_v20 = vmax.f32 %v2158_v11, %v2296_v21  ;;  %v2163_v39 = vadd.f32 %v5407_v31, %v7099_v18  ;;  %4767 = vmatprep.mubr.f32.mxu0 %v7407_v29  ;;  %v5932_v21 = vld [vmem:[%s6344_s12 + $0x40] sm:$0xff] }
 0x3d9   : > { %v1942_v32 = vpop.f32.mrb[46].mxu1  ;;  %5188 = vmatpush1.bf16.msra.mxu0 %v8715_v36 }
 0x3da   : > { %v2297_v61 = vmul.f32 0.1, %v2163_v39  ;;  %v5408_v34 = vadd.f32 %v7370_v17, %v1942_v32  ;;  %v1944_v52 = vpop.f32.mrb[47].mxu1  ;;  %v7415_v60 = vadd.f32 %v5929_v9, %v2328_v20  ;;  %5189 = vmatprep.subr.bf16.mxu0 %v8637_v8  ;;  %v8723_v20 = vld [vmem:[#allocation23_spill] sm:$0xff] }
 0x3dc   : > { %8716 = vst [vmem:[#allocation62_spill] sm:$0xff] %v7415_v60  ;;  %v2329_v27 = vmax.f32 %v2163_v39, %v2297_v61  ;;  %v2168_v54 = vadd.f32 %v5408_v34, %v7096_v53  ;;  %4768 = vmatmul.mubr.f32.gmra.mrb[36].mxu0 %v7415_v60  ;;  %v5933_v61 = vld [vmem:[%s6344_s12 + $0x48] sm:$0xff] }
 0x3dd   : > { %v1947_v18 = vpop.f32.mrb[48].mxu1  ;;  %5191 = vmatpush1.bf16.msra.mxu0 %v8717_v28 }
 0x3de   : > { %v2298_v62 = vmul.f32 0.1, %v2168_v54  ;;  %v5409_v44 = vadd.f32 %v7370_v17, %v1947_v18  ;;  %v1949_v13 = vpop.f32.mrb[49].mxu1  ;;  %v7423_v3 = vadd.f32 %v5930_v42, %v2329_v27  ;;  %5192 = vmatprep.subr.bf16.mxu0 %v8637_v8  ;;  %v8725_v27 = vld [vmem:[#allocation24_spill] sm:$0xff] }
 0x3e0   : > { %8718 = vst [vmem:[#allocation64_spill] sm:$0xff] %v7423_v3  ;;  %v2330_v41 = vmax.f32 %v2168_v54, %v2298_v62  ;;  %v2173_v12 = vadd.f32 %v5409_v44, %v7105_v7  ;;  %4770 = vmatprep.mubr.f32.mxu0 %v7423_v3  ;;  %v5934_v62 = vld [vmem:[%s6344_s12 + $0x50] sm:$0xff] }
 0x3e1   : > { %v1952_v53 = vpop.f32.mrb[50].mxu1  ;;  %5194 = vmatpush1.bf16.msra.mxu0 %v8719_v43 }
 0x3e2   : > { %v2299_v49 = vmul.f32 0.1, %v2173_v12  ;;  %v5410_v50 = vadd.f32 %v7370_v17, %v1952_v53  ;;  %v1954_v35 = vpop.f32.mrb[51].mxu1  ;;  %v7431_v4 = vadd.f32 %v5931_v55, %v2330_v41  ;;  %5195 = vmatprep.subr.bf16.mxu0 %v8637_v8  ;;  %v8727_v41 = vld [vmem:[#allocation25_spill] sm:$0xff] }
 0x3e4   : > { %8720 = vst [vmem:[#allocation61_spill] sm:$0xff] %v7431_v4  ;;  %v2331_v47 = vmax.f32 %v2173_v12, %v2299_v49  ;;  %v2178_v24 = vadd.f32 %v5410_v50, %v7102_v30  ;;  %4771 = vmatmul.mubr.f32.gmra.mrb[38].mxu0 %v7431_v4  ;;  %v5935_v49 = vld [vmem:[%s6344_s12 + $0x58] sm:$0xff] }
 0x3e5   : > { %v1957_v7 = vpop.f32.mrb[52].mxu1  ;;  %5197 = vmatpush1.bf16.msra.mxu0 %v8721_v23 }
 0x3e6   : > { %v2300_v11 = vmul.f32 0.1, %v2178_v24  ;;  %v5411_v5 = vadd.f32 %v7370_v17, %v1957_v7  ;;  %v1959_v14 = vpop.f32.mrb[53].mxu1  ;;  %v7439_v31 = vadd.f32 %v5932_v21, %v2331_v47  ;;  %5198 = vmatprep.subr.bf16.mxu0 %v8637_v8  ;;  %v8729_v47 = vld [vmem:[#allocation26_spill] sm:$0xff] }
 0x3e8   : > { %8722 = vst [vmem:[#allocation14_spill] sm:$0xff] %v7439_v31  ;;  %v2332_v25 = vmax.f32 %v2178_v24, %v2300_v11  ;;  %v2183_v19 = vadd.f32 %v5411_v5, %v7113_v48  ;;  %4773 = vmatprep.mubr.f32.mxu0 %v7439_v31  ;;  %v5936_v11 = vld [vmem:[%s6344_s12 + $0x60] sm:$0xff] }
 0x3e9   : > { %v1962_v30 = vpop.f32.mrb[54].mxu1  ;;  %5200 = vmatpush1.bf16.msra.mxu0 %v8723_v20 }
 0x3ea   : > { %v2301_v39 = vmul.f32 0.1, %v2183_v19  ;;  %v5412_v32 = vadd.f32 %v7370_v17, %v1962_v30  ;;  %v1964_v36 = vpop.f32.mrb[55].mxu1  ;;  %v7447_v34 = vadd.f32 %v5933_v61, %v2332_v25  ;;  %5201 = vmatprep.subr.bf16.mxu0 %v8637_v8  ;;  %v8731_v25 = vld [vmem:[#allocation27_spill] sm:$0xff] }
 0x3ec   : > { %8724 = vst [vmem:[#allocation15_spill] sm:$0xff] %v7447_v34  ;;  %v2333_v52 = vmax.f32 %v2183_v19, %v2301_v39  ;;  %v2188_v9 = vadd.f32 %v5412_v32, %v7110_v16  ;;  %4774 = vmatmul.mubr.f32.gmra.mrb[40].mxu0 %v7447_v34  ;;  %v5937_v39 = vld [vmem:[%s6344_s12 + $0x68] sm:$0xff] }
 0x3ed   : > { %v1967_v48 = vpop.f32.mrb[56].mxu1  ;;  %5203 = vmatpush1.bf16.msra.mxu0 %v8725_v27 }
 0x3ee   : > { %v2302_v54 = vmul.f32 0.1, %v2188_v9  ;;  %v5413_v18 = vadd.f32 %v7370_v17, %v1967_v48  ;;  %v1969_v28 = vpop.f32.mrb[57].mxu1  ;;  %v7455_v44 = vadd.f32 %v5934_v62, %v2333_v52  ;;  %5204 = vmatprep.subr.bf16.mxu0 %v8637_v8  ;;  %v8733_v52 = vld [vmem:[#allocation28_spill] sm:$0xff] }
 0x3f0   : > { %8726 = vst [vmem:[#allocation32_spill] sm:$0xff] %v7455_v44  ;;  %v2334_v13 = vmax.f32 %v2188_v9, %v2302_v54  ;;  %v2193_v42 = vadd.f32 %v5413_v18, %v7121_v2  ;;  %4776 = vmatprep.mubr.f32.mxu0 %v7455_v44  ;;  %v5938_v54 = vld [vmem:[%s6344_s12 + $0x70] sm:$0xff] }
 0x3f1   : > { %v1972_v16 = vpop.f32.mrb[58].mxu1  ;;  %5206 = vmatpush1.bf16.msra.mxu0 %v8727_v41 }
 0x3f2   : > { %v2303_v12 = vmul.f32 0.1, %v2193_v42  ;;  %v5414_v53 = vadd.f32 %v7370_v17, %v1972_v16  ;;  %v1974_v43 = vpop.f32.mrb[59].mxu1  ;;  %v7463_v50 = vadd.f32 %v5935_v49, %v2334_v13  ;;  %5207 = vmatprep.subr.bf16.mxu0 %v8637_v8  ;;  %v8735_v13 = vld [vmem:[#allocation29_spill] sm:$0xff] }
 0x3f4   : > { %8728 = vst [vmem:[#allocation33_spill] sm:$0xff] %v7463_v50  ;;  %v2335_v35 = vmax.f32 %v2193_v42, %v2303_v12  ;;  %v2198_v55 = vadd.f32 %v5414_v53, %v7118_v6  ;;  %4777 = vmatmul.mubr.f32.gmra.mrb[42].mxu0 %v7463_v50  ;;  %v5939_v12 = vld [vmem:[%s6344_s12 + $0x78] sm:$0xff] }
 0x3f5   : > { %v1977_v2 = vpop.f32.mrb[60].mxu1  ;;  %5209 = vmatpush1.bf16.msra.mxu0 %v8729_v47 }
 0x3f6   : > { %v2304_v24 = vmul.f32 0.1, %v2198_v55  ;;  %v5415_v7 = vadd.f32 %v7370_v17, %v1977_v2  ;;  %v1979_v23 = vpop.f32.mrb[61].mxu1  ;;  %v7471_v5 = vadd.f32 %v5936_v11, %v2335_v35  ;;  %5210 = vmatprep.subr.bf16.mxu0 %v8637_v8  ;;  %v8737_v35 = vld [vmem:[#allocation30_spill] sm:$0xff] }
 0x3f8   : > { %8730 = vst [vmem:[#allocation34_spill] sm:$0xff] %v7471_v5  ;;  %v2336_v14 = vmax.f32 %v2198_v55, %v2304_v24  ;;  %v2203_v21 = vadd.f32 %v5415_v7, %v7129_v37  ;;  %4779 = vmatprep.mubr.f32.mxu0 %v7471_v5  ;;  %v5940_v24 = vld [vmem:[%s6344_s12 + $0x80] sm:$0xff] }
 0x3f9   : > { %v1982_v6 = vpop.f32.mrb[62].mxu1  ;;  %5212 = vmatpush1.bf16.msra.mxu0 %v8731_v25 }
 0x3fa   : > { %v2305_v19 = vmul.f32 0.1, %v2203_v21  ;;  %v5416_v30 = vadd.f32 %v7370_v17, %v1982_v6  ;;  %v1984_v20 = vpop.f32.mrb[63].mxu1  ;;  %v7479_v32 = vadd.f32 %v5937_v39, %v2336_v14  ;;  %5213 = vmatprep.subr.bf16.mxu0 %v8637_v8  ;;  %v8739_v14 = vld [vmem:[#allocation31_spill] sm:$0xff] }
 0x3fc   : > { %8732 = vst [vmem:[#allocation35_spill] sm:$0xff] %v7479_v32  ;;  %v2337_v36 = vmax.f32 %v2203_v21, %v2305_v19  ;;  %v2208_v61 = vadd.f32 %v5416_v30, %v7124_v57  ;;  %4780 = vmatmul.mubr.f32.gmra.mrb[44].mxu0 %v7479_v32  ;;  %v5941_v19 = vld [vmem:[%s6344_s12 + $0x88] sm:$0xff] }
 0x3fd   : > { %v1987_v37 = vpop.f32.mrb[64].mxu1  ;;  %5215 = vmatpush1.bf16.msra.mxu0 %v8733_v52  ;;  %v5942_v52 = vld [vmem:[%s6344_s12 + $0x90] sm:$0xff] }
 0x3fe   : > { %v2306_v9 = vmul.f32 0.1, %v2208_v61  ;;  %v5417_v48 = vadd.f32 %v7370_v17, %v1987_v37  ;;  %v1989_v27 = vpop.f32.mrb[65].mxu1  ;;  %v7487_v18 = vadd.f32 %v5938_v54, %v2337_v36  ;;  %5216 = vmatprep.subr.bf16.mxu0 %v8637_v8 }
 0x400   : > { %8734 = vst [vmem:[#allocation37_spill] sm:$0xff] %v7487_v18  ;;  %v2338_v28 = vmax.f32 %v2208_v61, %v2306_v9  ;;  %v2213_v62 = vadd.f32 %v5417_v48, %v7137_v38  ;;  %4782 = vmatprep.mubr.f32.mxu0 %v7487_v18 }
 0x401   : > { %v1992_v57 = vpop.f32.mrb[66].mxu1  ;;  %5218 = vmatpush1.bf16.msra.mxu0 %v8735_v13 }
 0x402   : > { %v2307_v42 = vmul.f32 0.1, %v2213_v62  ;;  %v5418_v16 = vadd.f32 %v7370_v17, %v1992_v57  ;;  %v1994_v41 = vpop.f32.mrb[67].mxu1  ;;  %v7495_v53 = vadd.f32 %v5939_v12, %v2338_v28  ;;  %5219 = vmatprep.subr.bf16.mxu0 %v8637_v8  ;;  %v5943_v57 = vld [vmem:[%s6344_s12 + $0x98] sm:$0xff] }
 0x404   : > { %8736 = vst [vmem:[#allocation16_spill] sm:$0xff] %v7495_v53  ;;  %v2339_v43 = vmax.f32 %v2213_v62, %v2307_v42  ;;  %v2218_v49 = vadd.f32 %v5418_v16, %v7131_v59  ;;  %4783 = vmatmul.mubr.f32.gmra.mrb[46].mxu0 %v7495_v53 }
 0x405   : > { %v1997_v38 = vpop.f32.mrb[68].mxu1  ;;  %5221 = vmatpush1.bf16.msra.mxu0 %v8737_v35 }
 0x406   : > { %v2308_v55 = vmul.f32 0.1, %v2218_v49  ;;  %v5419_v2 = vadd.f32 %v7370_v17, %v1997_v38  ;;  %v1999_v47 = vpop.f32.mrb[69].mxu1  ;;  %v7503_v7 = vadd.f32 %v5940_v24, %v2339_v43  ;;  %5222 = vmatprep.subr.bf16.mxu0 %v8637_v8 }
 0x408   : > { %8738 = vst [vmem:[#allocation17_spill] sm:$0xff] %v7503_v7  ;;  %v2340_v23 = vmax.f32 %v2218_v49, %v2308_v55  ;;  %v2223_v11 = vadd.f32 %v5419_v2, %v7145_v0  ;;  %4785 = vmatprep.mubr.f32.mxu0 %v7503_v7  ;;  %v5944_v49 = vld [vmem:[%s6344_s12 + $0xa0] sm:$0xff] }
 0x409   : > { %v2002_v59 = vpop.f32.mrb[70].mxu1  ;;  %5224 = vmatpush1.bf16.msra.mxu0 %v8739_v14 }
 0x40a   : > { %v2309_v21 = vmul.f32 0.1, %v2223_v11  ;;  %v5420_v6 = vadd.f32 %v7370_v17, %v2002_v59  ;;  %v2004_v25 = vpop.f32.mrb[71].mxu1  ;;  %v7511_v30 = vadd.f32 %v5941_v19, %v2340_v23  ;;  %5225 = vmatprep.subr.bf16.mxu0 %v8637_v8  ;;  %v5945_v23 = vld [vmem:[%s6344_s12 + $0xa8] sm:$0xff]  ;;  %v5946_v19 = vld [vmem:[%s6344_s12 + $0xb0] sm:$0xff] }
 0x40c   : > { %8740 = vst [vmem:[#allocation18_spill] sm:$0xff] %v7511_v30  ;;  %v2341_v20 = vmax.f32 %v2223_v11, %v2309_v21  ;;  %v2228_v39 = vadd.f32 %v5420_v6, %v7140_v1  ;;  %4786 = vmatmul.mubr.f32.gmra.mrb[48].mxu0 %v7511_v30 }
 0x40d   : > { %v2007_v0 = vpop.f32.mrb[72].mxu1 }
 0x40e   : > { %v2310_v36 = vmul.f32 0.1, %v2228_v39  ;;  %v5421_v61 = vadd.f32 %v7370_v17, %v2007_v0  ;;  %v2009_v37 = vpop.f32.mrb[73].mxu1  ;;  %v7518_v9 = vadd.f32 %v5942_v52, %v2341_v20  ;;  %v5947_v52 = vld [vmem:[%s6344_s12 + $0xb8] sm:$0xff] }
 0x410   : > { %8741 = vst [vmem:[#allocation19_spill] sm:$0xff] %v7518_v9  ;;  %v2342_v48 = vmax.f32 %v2228_v39, %v2310_v36  ;;  %v2233_v27 = vadd.f32 %v5421_v61, %v7156_v46  ;;  %4788 = vmatprep.mubr.f32.mxu0 %v7518_v9 }
 0x411   : > { %v2012_v54 = vpop.f32.mrb[74].mxu1 }
 0x412   : > { %v2311_v28 = vmul.f32 0.1, %v2233_v27  ;;  %v5422_v1 = vadd.f32 %v7370_v17, %v2012_v54  ;;  %v2014_v62 = vpop.f32.mrb[75].mxu1  ;;  %v7524_v13 = vadd.f32 %v5943_v57, %v2342_v48  ;;  %v8747_v54 = vld [vmem:[#allocation81_spill] sm:$0xff] }
 0x414   : > { %8742 = vst [vmem:[#allocation20_spill] sm:$0xff] %v7524_v13  ;;  %v2343_v42 = vmax.f32 %v2233_v27, %v2311_v28  ;;  %v2238_v16 = vadd.f32 %v5422_v1, %v7151_v15  ;;  %4789 = vmatmul.mubr.f32.gmra.mrb[50].mxu0 %v7524_v13 }
 0x415   : > { %v2017_v41 = vpop.f32.mrb[76].mxu1 }
 0x416   : > { %v2312_v12 = vmul.f32 0.1, %v2238_v16  ;;  %v5423_v46 = vadd.f32 %v7370_v17, %v2017_v41  ;;  %v2019_v43 = vpop.f32.mrb[77].mxu1  ;;  %v7530_v38 = vadd.f32 %v5944_v49, %v2343_v42  ;;  %v5948_v42 = vld [vmem:[%s6344_s12 + $0xc0] sm:$0xff] }
 0x418   : > { %8743 = vst [vmem:[#allocation21_spill] sm:$0xff] %v7530_v38  ;;  %v2344_v35 = vmax.f32 %v2238_v16, %v2312_v12  ;;  %v2243_v55 = vadd.f32 %v5423_v46, %v7167_v45  ;;  %4791 = vmatprep.mubr.f32.mxu0 %v7530_v38  ;;  %v8749_v12 = vld [vmem:[#allocation85_spill] sm:$0xff] }
 0x419   : > { %v2022_v2 = vpop.f32.mrb[78].mxu1 }
 0x41a   : > { %v2313_v47 = vmul.f32 0.1, %v2243_v55  ;;  %v5424_v15 = vadd.f32 %v7370_v17, %v2022_v2  ;;  %v2024_v24 = vpop.f32.mrb[79].mxu1  ;;  %v7536_v11 = vadd.f32 %v5945_v23, %v2344_v35  ;;  %v5949_v2 = vld [vmem:[%s6344_s12 + $0xc8] sm:$0xff] }
 0x41b   : > { %v8751_v24 = vld [vmem:[#allocation83_spill] sm:$0xff] }
 0x41c   : > { %8744 = vst [vmem:[#allocation22_spill] sm:$0xff] %v7536_v11  ;;  %v2345_v59 = vmax.f32 %v2243_v55, %v2313_v47  ;;  %v2248_v14 = vadd.f32 %v5424_v15, %v7162_v26  ;;  %4792 = vmatmul.mubr.f32.gmra.mrb[52].mxu0 %v7536_v11 }
 0x41d   : > { %v2027_v21 = vpop.f32.mrb[80].mxu1 }
 0x41e   : > { %v2314_v6 = vmul.f32 0.1, %v2248_v14  ;;  %v5425_v45 = vadd.f32 %v7370_v17, %v2027_v21  ;;  %v2029_v25 = vpop.f32.mrb[81].mxu1  ;;  %v7542_v20 = vadd.f32 %v5946_v19, %v2345_v59 }
 0x420   : > { %8745 = vst [vmem:[#allocation23_spill] sm:$0xff] %v7542_v20  ;;  %v2346_v39 = vmax.f32 %v2248_v14, %v2314_v6  ;;  %v2253_v0 = vadd.f32 %v5425_v45, %v7178_v56  ;;  %4794 = vmatprep.mubr.f32.mxu0 %v7542_v20  ;;  %v5950_v45 = vld [vmem:[%s6344_s12 + $0xd0] sm:$0xff] }
 0x421   : > { %v2032_v36 = vpop.f32.mrb[82].mxu1 }
 0x422   : > { %v2315_v61 = vmul.f32 0.1, %v2253_v0  ;;  %v5426_v26 = vadd.f32 %v7370_v17, %v2032_v36  ;;  %v2034_v37 = vpop.f32.mrb[83].mxu1  ;;  %v7548_v48 = vadd.f32 %v5947_v52, %v2346_v39  ;;  %v8753_v39 = vld [vmem:[#allocation93_spill] sm:$0xff]  ;;  %v5951_v52 = vld [vmem:[%s6344_s12 + $0xd8] sm:$0xff] }
 0x424   : > { %8746 = vst [vmem:[#allocation24_spill] sm:$0xff] %v7548_v48  ;;  %v2347_v27 = vmax.f32 %v2253_v0, %v2315_v61  ;;  %v2258_v28 = vadd.f32 %v5426_v26, %v8747_v54  ;;  %4795 = vmatmul.mubr.f32.gmra.mrb[54].mxu0 %v7548_v48 }
 0x425   : > { %v2037_v1 = vpop.f32.mrb[84].mxu1 }
 0x426   : > { %v2316_v62 = vmul.f32 0.1, %v2258_v28  ;;  %v5427_v56 = vadd.f32 %v7370_v17, %v2037_v1  ;;  %v2039_v57 = vpop.f32.mrb[85].mxu1  ;;  %v7554_v16 = vadd.f32 %v5948_v42, %v2347_v27 }
 0x428   : > { %8748 = vst [vmem:[#allocation25_spill] sm:$0xff] %v7554_v16  ;;  %v2348_v41 = vmax.f32 %v2258_v28, %v2316_v62  ;;  %v2263_v46 = vadd.f32 %v5427_v56, %v8749_v12  ;;  %4797 = vmatprep.mubr.f32.mxu0 %v7554_v16  ;;  %v8755_v28 = vld [vmem:[#allocation92_spill] sm:$0xff] }
 0x429   : > { %v2042_v43 = vpop.f32.mrb[86].mxu1 }
 0x42a   : > { %v2317_v49 = vmul.f32 0.1, %v2263_v46  ;;  %v5428_v35 = vadd.f32 %v7370_v17, %v2042_v43  ;;  %v2044_v55 = vpop.f32.mrb[87].mxu1  ;;  %v7560_v47 = vadd.f32 %v5949_v2, %v2348_v41  ;;  %v5952_v41 = vld [vmem:[%s6344_s12 + $0xe0] sm:$0xff] }
 0x42c   : > { %8750 = vst [vmem:[#allocation26_spill] sm:$0xff] %v7560_v47  ;;  %v2349_v15 = vmax.f32 %v2263_v46, %v2317_v49  ;;  %v2268_v23 = vadd.f32 %v5428_v35, %v8751_v24  ;;  %4798 = vmatmul.mubr.f32.gmra.mrb[56].mxu0 %v7560_v47 }
 0x42d   : > { %v2047_v59 = vpop.f32.mrb[88].mxu1 }
 0x42e   : > { %v2318_v14 = vmul.f32 0.1, %v2268_v23  ;;  %v5429_v21 = vadd.f32 %v7370_v17, %v2047_v59  ;;  %v2049_v6 = vpop.f32.mrb[89].mxu1  ;;  %v7566_v25 = vadd.f32 %v5950_v45, %v2349_v15  ;;  %v5953_v15 = vld [vmem:[%s6344_s12 + $0xe8] sm:$0xff]  ;;  %v5955_v45 = vld [vmem:[%s6344_s12 + $0xf8] sm:$0xff] }
 0x430   : > { %8752 = vst [vmem:[#allocation27_spill] sm:$0xff] %v7566_v25  ;;  %v2350_v19 = vmax.f32 %v2268_v23, %v2318_v14  ;;  %v2273_v0 = vadd.f32 %v5429_v21, %v8753_v39  ;;  %4800 = vmatprep.mubr.f32.mxu0 %v7566_v25  ;;  %v5954_v21 = vld [vmem:[%s6344_s12 + $0xf0] sm:$0xff]  ;;  %v8760_v39 = vld [vmem:[#allocation36_spill] sm:$0xff]  ;;  %s4250_s12 = scalar_lea.sflag [#allocation5], %s6338_s14 }
 0x431   : > { %v2052_v36 = vpop.f32.mrb[90].mxu1 }
 0x432   : > { %v2319_v61 = vmul.f32 0.1, %v2273_v0  ;;  %v5430_v26 = vadd.f32 %v7370_v17, %v2052_v36  ;;  %v2054_v37 = vpop.f32.mrb[91].mxu1  ;;  %v7572_v27 = vadd.f32 %v5951_v52, %v2350_v19  ;;  %v8762_v36 = vld [vmem:[#allocation39_spill] sm:$0xff]  ;;  %v8767_v52 = vld [vmem:[#allocation44_spill] sm:$0xff] }
 0x433   : > { %v8766_v37 = vld [vmem:[#allocation43_spill] sm:$0xff] }
 0x434   : > { %8754 = vst [vmem:[#allocation28_spill] sm:$0xff] %v7572_v27  ;;  %v2351_v54 = vmax.f32 %v2273_v0, %v2319_v61  ;;  %v2278_v1 = vadd.f32 %v5430_v26, %v8755_v28  ;;  %4801 = vmatmul.mubr.f32.gmra.mrb[58].mxu0 %v7572_v27  ;;  %v8761_v0 = vld [vmem:[#allocation38_spill] sm:$0xff]  ;;  %v8763_v61 = vld [vmem:[#allocation40_spill] sm:$0xff]  ;;  %v8764_v26 = vld [vmem:[#allocation41_spill] sm:$0xff] }
 0x435   : > { %v2057_v62 = vpop.f32.mrb[92].mxu1  ;;  %v8769_v28 = vld [vmem:[#allocation46_spill] sm:$0xff] }
 0x436   : > { %v2320_v56 = vmul.f32 0.1, %v2278_v1  ;;  %v5431_v57 = vadd.f32 %v7370_v17, %v2057_v62  ;;  %v2059_v42 = vpop.f32.mrb[93].mxu1  ;;  %v7578_v12 = vadd.f32 %v5952_v41, %v2351_v54  ;;  %v8768_v54 = vld [vmem:[#allocation45_spill] sm:$0xff]  ;;  %v8771_v62 = vld [vmem:[#allocation48_spill] sm:$0xff] }
 0x437   : > { %v8774_v42 = vld [vmem:[#allocation51_spill] sm:$0xff]  ;;  %v8775_v41 = vld [vmem:[#allocation52_spill] sm:$0xff] }
 0x438   : > { %8756 = vst [vmem:[#allocation29_spill] sm:$0xff] %v7578_v12  ;;  %v2352_v46 = vmax.f32 %v2278_v1, %v2320_v56  ;;  %v2283_v43 = vadd.f32 %v5431_v57, %v7365_v40  ;;  %4803 = vmatprep.mubr.f32.mxu0 %v7578_v12  ;;  %v8770_v1 = vld [vmem:[#allocation47_spill] sm:$0xff]  ;;  %v8772_v56 = vld [vmem:[#allocation49_spill] sm:$0xff]  ;;  %v8773_v57 = vld [vmem:[#allocation50_spill] sm:$0xff] }
 0x439   : > { %v2062_v49 = vpop.f32.mrb[94].mxu1 }
 0x43a   : > { %v2321_v35 = vmul.f32 0.1, %v2283_v43  ;;  %v5432_v55 = vadd.f32 %v7370_v17, %v2062_v49  ;;  %v2064_v2 = vpop.f32.mrb[95].mxu1  ;;  %v7584_v24 = vadd.f32 %v5953_v15, %v2352_v46  ;;  %v2708_v17 = vld [vmem:[#allocation2 + $0xf] sm:$0xff] }
 0x43c   : > { %8757 = vst [vmem:[#allocation30_spill] sm:$0xff] %v7584_v24  ;;  %v2353_v23 = vmax.f32 %v2283_v43, %v2321_v35  ;;  %v2288_v59 = vadd.f32 %v5432_v55, %v7363_v33  ;;  %4804 = vmatmul.mubr.f32.gmra.mrb[60].mxu0 %v7584_v24  ;;  %v2709_v33 = vld [vmem:[#allocation2 + $0x17] sm:$0xff]  ;;  %v7633_v43 = vld [vmem:[%s8419_s2] ss:$0 sm:$0xff] }
 0x43e   : > { %v2322_v14 = vmul.f32 0.1, %v2288_v59  ;;  %v7589_v6 = vadd.f32 %v5954_v21, %v2353_v23 }
 0x440   : > { %8758 = vst [vmem:[#allocation31_spill] sm:$0xff] %v7589_v6  ;;  %v2354_v40 = vmax.f32 %v2288_v59, %v2322_v14  ;;  %4806 = vmatprep.mubr.f32.mxu0 %v7589_v6 }
 0x442   : > { %v7593_v19 = vadd.f32 %v5955_v45, %v2354_v40 }
 0x444   : > { %8759 = vst [vmem:[#allocation81_spill] sm:$0xff] %v7593_v19  ;;  %4807 = vmatmul.mubr.f32.gmra.mrb[62].mxu0 %v7593_v19 }
 0x445   : > { %3060 = vmatprep.mubr.f32.mxu0 %v7359_v51 }
 0x448   : > { %3061 = vmatmul.mubr.f32.vlgmr.msra.gmra.mrb[64].mxu0 %v2708_v17 }
 0x449   : > { %5227 = vmatpush1.bf16.msra.mxu0 %v8760_v39  ;;  %3065 = vmatprep.mubr.f32.mxu0 %v7359_v51  ;;  %v8765_v51 = vld [vmem:[#allocation42_spill] sm:$0xff] }
 0x44a   : > { %5228 = vmatprep.subr.bf16.mxu0 %v8637_v8 }
 0x44c   : > { %3066 = vmatmul.mubr.f32.gmra.mrb[66].mxu0 %v2709_v33 }
 0x44d   : > { %5230 = vmatpush1.bf16.msra.mxu0 %v8761_v0 }
 0x44e   : > { %5231 = vmatprep.subr.bf16.mxu0 %v8637_v8 }
 0x451   : > { %5233 = vmatpush1.bf16.msra.mxu0 %v8762_v36 }
 0x452   : > { %5234 = vmatprep.subr.bf16.mxu0 %v8637_v8 }
 0x455   : > { %5236 = vmatpush1.bf16.msra.mxu0 %v8763_v61 }
 0x456   : > { %5237 = vmatprep.subr.bf16.mxu0 %v8637_v8 }
 0x459   : > { %5239 = vmatpush1.bf16.msra.mxu0 %v8764_v26 }
 0x45a   : > { %5240 = vmatprep.subr.bf16.mxu0 %v8637_v8 }
 0x45d   : > { %5242 = vmatpush1.bf16.msra.mxu0 %v8765_v51 }
 0x45e   : > { %5243 = vmatprep.subr.bf16.mxu0 %v8637_v8 }
 0x461   : > { %5245 = vmatpush1.bf16.msra.mxu0 %v8766_v37 }
 0x462   : > { %5246 = vmatprep.subr.bf16.mxu0 %v8637_v8 }
 0x465   : > { %5248 = vmatpush1.bf16.msra.mxu0 %v8767_v52 }
 0x466   : > { %5249 = vmatprep.subr.bf16.mxu0 %v8637_v8 }
 0x469   : > { %5251 = vmatpush1.bf16.msra.mxu0 %v8768_v54 }
 0x46a   : > { %5252 = vmatprep.subr.bf16.mxu0 %v8637_v8 }
 0x46d   : > { %5254 = vmatpush1.bf16.msra.mxu0 %v8769_v28 }
 0x46e   : > { %5255 = vmatprep.subr.bf16.mxu0 %v8637_v8 }
 0x471   : > { %5257 = vmatpush1.bf16.msra.mxu0 %v8770_v1 }
 0x472   : > { %5258 = vmatprep.subr.bf16.mxu0 %v8637_v8 }
 0x475   : > { %5260 = vmatpush1.bf16.msra.mxu0 %v8771_v62 }
 0x476   : > { %5261 = vmatprep.subr.bf16.mxu0 %v8637_v8 }
 0x479   : > { %5263 = vmatpush1.bf16.msra.mxu0 %v8772_v56 }
 0x47a   : > { %5264 = vmatprep.subr.bf16.mxu0 %v8637_v8 }
 0x47d   : > { %5266 = vmatpush1.bf16.msra.mxu0 %v8773_v57 }
 0x47e   : > { %5267 = vmatprep.subr.bf16.mxu0 %v8637_v8 }
 0x481   : > { %5269 = vmatpush1.bf16.msra.mxu0 %v8774_v42 }
 0x482   : > { %5270 = vmatprep.subr.bf16.mxu0 %v8637_v8 }
 0x485   : > { %5272 = vmatpush1.bf16.msra.mxu0 %v8775_v41 }
 0x486   : > { %5273 = vmatprep.subr.bf16.mxu0 %v8637_v8 }
 0x49f   : > { %v4763_v46 = vpop.f32.mrb[32].mxu0 }
 0x4a0   : > { %v2459_v49 = vadd.f32 %v7633_v43, %v4763_v46  ;;  %v2453_v35 = vpop.f32.mrb[33].mxu0 }
 0x4a1   : > { %v2454_v55 = vadd.f32 %v7633_v43, %v2453_v35 }
 0x4a2   : > { %v2613_v2 = vmul.f32 0.1, %v2459_v49 }
 0x4a3   : > { %v2612_v15 = vmul.f32 0.1, %v2454_v55 }
 0x4a4   : > { %v2645_v23 = vmax.f32 %v2459_v49, %v2613_v2 }
 0x4a5   : > { %v2644_v59 = vmax.f32 %v2454_v55, %v2612_v15 }
 0x4a6   : > { %2677 = vst [vmem:[#allocation2 + $0x48] sm:$0xff] %v2645_v23 }
 0x4a7   : > { %2676 = vst [vmem:[#allocation2 + $0x40] sm:$0xff] %v2644_v59  ;;  %v4766_v14 = vpop.f32.mrb[34].mxu0  ;;  %3070 = vmatprep.mubr.f32.mxu0 %v2644_v59 }
 0x4a8   : > { %v2469_v21 = vadd.f32 %v7633_v43, %v4766_v14  ;;  %v2463_v40 = vpop.f32.mrb[35].mxu0 }
 0x4a9   : > { %v2464_v45 = vadd.f32 %v7633_v43, %v2463_v40 }
 0x4aa   : > { %v2615_v17 = vmul.f32 0.1, %v2469_v21 }
 0x4ab   : > { %v2614_v39 = vmul.f32 0.1, %v2464_v45 }
 0x4ac   : > { %v2647_v33 = vmax.f32 %v2469_v21, %v2615_v17 }
 0x4ad   : > { %v2646_v0 = vmax.f32 %v2464_v45, %v2614_v39 }
 0x4ae   : > { %2679 = vst [vmem:[#allocation2 + $0x78] sm:$0xff] %v2647_v33  ;;  %v7639_v36 = vld [vmem:[#allocation2 + $0x3f] sm:$0xff]  ;;  %v7644_v54 = vld [vmem:[#allocation2 + $0x47] sm:$0xff] }
 0x4af   : > { %2678 = vst [vmem:[#allocation2 + $0x70] sm:$0xff] %v2646_v0  ;;  %v4769_v61 = vpop.f32.mrb[36].mxu0  ;;  %3071 = vmatmul.mubr.f32.gmra.mrb[68].mxu0 %v7639_v36 }
 0x4b0   : > { %v2479_v26 = vadd.f32 %v7633_v43, %v4769_v61  ;;  %v2473_v51 = vpop.f32.mrb[37].mxu0  ;;  %3075 = vmatprep.mubr.f32.mxu0 %v2645_v23 }
 0x4b1   : > { %v2474_v37 = vadd.f32 %v7633_v43, %v2473_v51 }
 0x4b2   : > { %v2617_v52 = vmul.f32 0.1, %v2479_v26 }
 0x4b3   : > { %v2616_v28 = vmul.f32 0.1, %v2474_v37  ;;  %3076 = vmatmul.mubr.f32.gmra.mrb[70].mxu0 %v7644_v54 }
 0x4b4   : > { %v2649_v1 = vmax.f32 %v2479_v26, %v2617_v52  ;;  %3080 = vmatprep.mubr.f32.mxu0 %v2646_v0 }
 0x4b5   : > { %v2648_v62 = vmax.f32 %v2474_v37, %v2616_v28  ;;  %v7653_v41 = vld [vmem:[#allocation2 + $0x79] sm:$0xff] }
 0x4b6   : > { %2681 = vst [vmem:[#allocation2 + $0xa8] sm:$0xff] %v2649_v1  ;;  %v7647_v56 = vld [vmem:[#allocation2 + $0x71] sm:$0xff] }
 0x4b7   : > { %v7649_v57 = vld [vmem:[#allocation2 + $0x6f] sm:$0xff]  ;;  %2680 = vst [vmem:[#allocation2 + $0xa0] sm:$0xff] %v2648_v62  ;;  %v4772_v42 = vpop.f32.mrb[38].mxu0  ;;  %4841 = vmatprep.mubr.f32.mxu1 %v7647_v56  ;;  %v7658_v2 = vld [vmem:[#allocation2 + $0x77] sm:$0xff] }
 0x4b8   : > { %3081 = vmatmul.mubr.f32.gmra.mrb[72].mxu0 %v7649_v57  ;;  %v2489_v46 = vadd.f32 %v7633_v43, %v4772_v42  ;;  %v2483_v49 = vpop.f32.mrb[39].mxu0  ;;  %4842 = vmatmul.mubr.f32.vlgmr.msra.gmra.mrb[96].mxu1 %v7653_v41 }
 0x4b9   : > { %3085 = vmatprep.mubr.f32.mxu0 %v2647_v33  ;;  %v2484_v35 = vadd.f32 %v7633_v43, %v2483_v49 }
 0x4ba   : > { %v2619_v55 = vmul.f32 0.1, %v2489_v46 }
 0x4bb   : > { %v2618_v15 = vmul.f32 0.1, %v2484_v35 }
 0x4bc   : > { %3086 = vmatmul.mubr.f32.gmra.mrb[74].mxu0 %v7658_v2  ;;  %v2651_v23 = vmax.f32 %v2489_v46, %v2619_v55 }
 0x4bd   : > { %3090 = vmatprep.mubr.f32.mxu0 %v2648_v62  ;;  %v2650_v59 = vmax.f32 %v2484_v35, %v2618_v15  ;;  %v7667_v45 = vld [vmem:[#allocation2 + $0xa9] sm:$0xff] }
 0x4be   : > { %2683 = vst [vmem:[#allocation2 + $0xd8] sm:$0xff] %v2651_v23  ;;  %v7661_v14 = vld [vmem:[#allocation2 + $0xa1] sm:$0xff] }
 0x4bf   : > { %v7663_v21 = vld [vmem:[#allocation2 + $0x9f] sm:$0xff]  ;;  %2682 = vst [vmem:[#allocation2 + $0xd0] sm:$0xff] %v2650_v59  ;;  %v4775_v40 = vpop.f32.mrb[40].mxu0  ;;  %4844 = vmatprep.mubr.f32.mxu1 %v7661_v14  ;;  %v7672_v61 = vld [vmem:[#allocation2 + $0xa7] sm:$0xff] }
 0x4c0   : > { %3091 = vmatmul.mubr.f32.gmra.mrb[76].mxu0 %v7663_v21  ;;  %v2499_v17 = vadd.f32 %v7633_v43, %v4775_v40  ;;  %v2493_v39 = vpop.f32.mrb[41].mxu0  ;;  %4845 = vmatmul.mubr.f32.gmra.mrb[98].mxu1 %v7667_v45 }
 0x4c1   : > { %3095 = vmatprep.mubr.f32.mxu0 %v2649_v1  ;;  %v2494_v33 = vadd.f32 %v7633_v43, %v2493_v39 }
 0x4c2   : > { %v2621_v0 = vmul.f32 0.1, %v2499_v17 }
 0x4c3   : > { %v2620_v26 = vmul.f32 0.1, %v2494_v33 }
 0x4c4   : > { %3096 = vmatmul.mubr.f32.gmra.mrb[78].mxu0 %v7672_v61  ;;  %v2653_v51 = vmax.f32 %v2499_v17, %v2621_v0 }
 0x4c5   : > { %3100 = vmatprep.mubr.f32.mxu0 %v2650_v59  ;;  %v7675_v37 = vmax.f32 %v2494_v33, %v2620_v26  ;;  %v7684_v62 = vld [vmem:[#allocation2 + $0xd9] sm:$0xff] }
 0x4c6   : > { %2685 = vst [vmem:[#allocation2 + $0x108] sm:$0xff] %v2653_v51  ;;  %v7677_v52 = vld [vmem:[#allocation2 + $0xd1] sm:$0xff] }
 0x4c7   : > { %8776 = vst [vmem:[#allocation85_spill] sm:$0xff] %v7675_v37  ;;  %v7679_v28 = vld [vmem:[#allocation2 + $0xcf] sm:$0xff]  ;;  %2684 = vst [vmem:[#allocation2 + $0x100] sm:$0xff] %v7675_v37  ;;  %v4778_v1 = vpop.f32.mrb[42].mxu0  ;;  %4847 = vmatprep.mubr.f32.mxu1 %v7677_v52  ;;  %v7689_v55 = vld [vmem:[#allocation2 + $0xd7] sm:$0xff] }
 0x4c8   : > { %3101 = vmatmul.mubr.f32.gmra.mrb[80].mxu0 %v7679_v28  ;;  %v2509_v42 = vadd.f32 %v7633_v43, %v4778_v1  ;;  %v2503_v46 = vpop.f32.mrb[43].mxu0  ;;  %4848 = vmatmul.mubr.f32.gmra.mrb[100].mxu1 %v7684_v62 }
 0x4c9   : > { %3105 = vmatprep.mubr.f32.mxu0 %v2651_v23  ;;  %v2504_v49 = vadd.f32 %v7633_v43, %v2503_v46 }
 0x4ca   : > { %v2623_v35 = vmul.f32 0.1, %v2509_v42 }
 0x4cb   : > { %v2622_v15 = vmul.f32 0.1, %v2504_v49 }
 0x4cc   : > { %3106 = vmatmul.mubr.f32.gmra.mrb[82].mxu0 %v7689_v55  ;;  %v2655_v59 = vmax.f32 %v2509_v42, %v2623_v35 }
 0x4cd   : > { %3110 = vmatprep.mubr.f32.mxu0 %v7675_v37  ;;  %v7693_v40 = vmax.f32 %v2504_v49, %v2622_v15  ;;  %v7702_v33 = vld [vmem:[#allocation2 + $0x109] sm:$0xff] }
 0x4ce   : > { %2687 = vst [vmem:[#allocation2 + $0x138] sm:$0xff] %v2655_v59  ;;  %v7695_v17 = vld [vmem:[#allocation2 + $0x101] sm:$0xff] }
 0x4cf   : > { %8777 = vst [vmem:[#allocation83_spill] sm:$0xff] %v7693_v40  ;;  %v7697_v39 = vld [vmem:[#allocation2 + $0xff] sm:$0xff]  ;;  %2686 = vst [vmem:[#allocation2 + $0x130] sm:$0xff] %v7693_v40  ;;  %v4781_v23 = vpop.f32.mrb[44].mxu0  ;;  %4850 = vmatprep.mubr.f32.mxu1 %v7695_v17  ;;  %v7707_v46 = vld [vmem:[#allocation2 + $0x107] sm:$0xff] }
 0x4d0   : > { %3111 = vmatmul.mubr.f32.gmra.mrb[84].mxu0 %v7697_v39  ;;  %v2519_v0 = vadd.f32 %v7633_v43, %v4781_v23  ;;  %v2513_v26 = vpop.f32.mrb[45].mxu0  ;;  %4851 = vmatmul.mubr.f32.gmra.mrb[102].mxu1 %v7702_v33 }
 0x4d1   : > { %3115 = vmatprep.mubr.f32.mxu0 %v2653_v51  ;;  %v2514_v1 = vadd.f32 %v7633_v43, %v2513_v26 }
 0x4d2   : > { %v2625_v42 = vmul.f32 0.1, %v2519_v0 }
 0x4d3   : > { %v2624_v49 = vmul.f32 0.1, %v2514_v1 }
 0x4d4   : > { %3116 = vmatmul.mubr.f32.gmra.mrb[86].mxu0 %v7707_v46  ;;  %v7710_v35 = vmax.f32 %v2519_v0, %v2625_v42 }
 0x4d5   : > { %3120 = vmatprep.mubr.f32.mxu0 %v7693_v40  ;;  %v7713_v15 = vmax.f32 %v2514_v1, %v2624_v49  ;;  %v7723_v26 = vld [vmem:[#allocation2 + $0x139] sm:$0xff] }
 0x4d6   : > { %8778 = vst [vmem:[#allocation93_spill] sm:$0xff] %v7710_v35  ;;  %2689 = vst [vmem:[#allocation2 + $0x168] sm:$0xff] %v7710_v35  ;;  %v7716_v23 = vld [vmem:[#allocation2 + $0x131] sm:$0xff] }
 0x4d7   : > { %8779 = vst [vmem:[#allocation92_spill] sm:$0xff] %v7713_v15  ;;  %v7718_v19 = vld [vmem:[#allocation2 + $0x12f] sm:$0xff]  ;;  %2688 = vst [vmem:[#allocation2 + $0x160] sm:$0xff] %v7713_v15  ;;  %v4784_v51 = vpop.f32.mrb[46].mxu0  ;;  %4853 = vmatprep.mubr.f32.mxu1 %v7716_v23  ;;  %v7728_v6 = vld [vmem:[#allocation2 + $0x137] sm:$0xff] }
 0x4d8   : > { %3121 = vmatmul.mubr.f32.gmra.mrb[88].mxu0 %v7718_v19  ;;  %v2529_v0 = vadd.f32 %v7633_v43, %v4784_v51  ;;  %v2523_v42 = vpop.f32.mrb[47].mxu0  ;;  %4854 = vmatmul.mubr.f32.gmra.mrb[104].mxu1 %v7723_v26 }
 0x4d9   : > { %3125 = vmatprep.mubr.f32.mxu0 %v2655_v59  ;;  %v2524_v1 = vadd.f32 %v7633_v43, %v2523_v42 }
 0x4da   : > { %v2627_v49 = vmul.f32 0.1, %v2529_v0 }
 0x4db   : > { %v2626_v24 = vmul.f32 0.1, %v2524_v1 }
 0x4dc   : > { %3126 = vmatmul.mubr.f32.gmra.mrb[90].mxu0 %v7728_v6  ;;  %v7731_v12 = vmax.f32 %v2529_v0, %v2627_v49 }
 0x4dd   : > { %3130 = vmatprep.mubr.f32.mxu0 %v7713_v15  ;;  %v7734_v27 = vmax.f32 %v2524_v1, %v2626_v24  ;;  %v7744_v42 = vld [vmem:[#allocation2 + $0x169] sm:$0xff] }
 0x4de   : > { %8780 = vst [vmem:[#allocation36_spill] sm:$0xff] %v7731_v12  ;;  %2691 = vst [vmem:[#allocation2 + $0x198] sm:$0xff] %v7731_v12  ;;  %v7737_v51 = vld [vmem:[#allocation2 + $0x161] sm:$0xff] }
 0x4df   : > { %8781 = vst [vmem:[#allocation38_spill] sm:$0xff] %v7734_v27  ;;  %v7739_v25 = vld [vmem:[#allocation2 + $0x15f] sm:$0xff]  ;;  %2690 = vst [vmem:[#allocation2 + $0x190] sm:$0xff] %v7734_v27  ;;  %v4787_v59 = vpop.f32.mrb[48].mxu0  ;;  %4856 = vmatprep.mubr.f32.mxu1 %v7737_v51  ;;  %v7750_v47 = vld [vmem:[#allocation2 + $0x167] sm:$0xff] }
 0x4e0   : > { %3131 = vmatmul.mubr.f32.gmra.mrb[92].mxu0 %v7739_v25  ;;  %v2539_v0 = vadd.f32 %v7633_v43, %v4787_v59  ;;  %v2533_v49 = vpop.f32.mrb[49].mxu0  ;;  %4857 = vmatmul.mubr.f32.gmra.mrb[106].mxu1 %v7744_v42 }
 0x4e1   : > { %3135 = vmatprep.mubr.f32.mxu0 %v7710_v35  ;;  %v2534_v24 = vadd.f32 %v7633_v43, %v2533_v49 }
 0x4e2   : > { %v2629_v1 = vmul.f32 0.1, %v2539_v0 }
 0x4e3   : > { %v2628_v16 = vmul.f32 0.1, %v2534_v24 }
 0x4e4   : > { %3136 = vmatmul.mubr.f32.gmra.mrb[94].mxu0 %v7750_v47  ;;  %v7753_v48 = vmax.f32 %v2539_v0, %v2629_v1 }
 0x4e5   : > { %3140 = vmatprep.mubr.f32.mxu0 %v7734_v27  ;;  %v7756_v20 = vmax.f32 %v2534_v24, %v2628_v16  ;;  %v7766_v38 = vld [vmem:[#allocation2 + $0x199] sm:$0xff] }
 0x4e6   : > { %8782 = vst [vmem:[#allocation39_spill] sm:$0xff] %v7753_v48  ;;  %2693 = vst [vmem:[#allocation2 + $0x1c8] sm:$0xff] %v7753_v48  ;;  %v7759_v59 = vld [vmem:[#allocation2 + $0x191] sm:$0xff] }
 0x4e7   : > { %8783 = vst [vmem:[#allocation40_spill] sm:$0xff] %v7756_v20  ;;  %v7761_v11 = vld [vmem:[#allocation2 + $0x18f] sm:$0xff]  ;;  %2692 = vst [vmem:[#allocation2 + $0x1c0] sm:$0xff] %v7756_v20  ;;  %v4790_v49 = vpop.f32.mrb[50].mxu0  ;;  %4859 = vmatprep.mubr.f32.mxu1 %v7759_v59  ;;  %v7772_v13 = vld [vmem:[#allocation2 + $0x197] sm:$0xff] }
 0x4e8   : > { %3141 = vmatmul.mubr.f32.gmra.mrb[96].mxu0 %v7761_v11  ;;  %v2549_v0 = vadd.f32 %v7633_v43, %v4790_v49  ;;  %v2543_v1 = vpop.f32.mrb[51].mxu0  ;;  %4860 = vmatmul.mubr.f32.gmra.mrb[108].mxu1 %v7766_v38 }
 0x4e9   : > { %3145 = vmatprep.mubr.f32.mxu0 %v7731_v12  ;;  %v2544_v16 = vadd.f32 %v7633_v43, %v2543_v1 }
 0x4ea   : > { %v2631_v24 = vmul.f32 0.1, %v2549_v0 }
 0x4eb   : > { %v2630_v9 = vmul.f32 0.1, %v2544_v16 }
 0x4ec   : > { %3146 = vmatmul.mubr.f32.gmra.mrb[98].mxu0 %v7772_v13  ;;  %v7775_v30 = vmax.f32 %v2549_v0, %v2631_v24 }
 0x4ed   : > { %3150 = vmatprep.mubr.f32.mxu0 %v7756_v20  ;;  %v7778_v7 = vmax.f32 %v2544_v16, %v2630_v9  ;;  %v7788_v18 = vld [vmem:[#allocation2 + $0x1c9] sm:$0xff] }
 0x4ee   : > { %8784 = vst [vmem:[#allocation41_spill] sm:$0xff] %v7775_v30  ;;  %2695 = vst [vmem:[#allocation2 + $0x1f8] sm:$0xff] %v7775_v30  ;;  %v7781_v49 = vld [vmem:[#allocation2 + $0x1c1] sm:$0xff] }
 0x4ef   : > { %8785 = vst [vmem:[#allocation42_spill] sm:$0xff] %v7778_v7  ;;  %v7783_v53 = vld [vmem:[#allocation2 + $0x1bf] sm:$0xff]  ;;  %2694 = vst [vmem:[#allocation2 + $0x1f0] sm:$0xff] %v7778_v7  ;;  %v4793_v1 = vpop.f32.mrb[52].mxu0  ;;  %4862 = vmatprep.mubr.f32.mxu1 %v7781_v49  ;;  %v7794_v32 = vld [vmem:[#allocation2 + $0x1c7] sm:$0xff] }
 0x4f0   : > { %3151 = vmatmul.mubr.f32.gmra.mrb[100].mxu0 %v7783_v53  ;;  %v2559_v0 = vadd.f32 %v7633_v43, %v4793_v1  ;;  %v2553_v24 = vpop.f32.mrb[53].mxu0  ;;  %4863 = vmatmul.mubr.f32.gmra.mrb[110].mxu1 %v7788_v18 }
 0x4f1   : > { %3155 = vmatprep.mubr.f32.mxu0 %v7753_v48  ;;  %v2554_v9 = vadd.f32 %v7633_v43, %v2553_v24 }
 0x4f2   : > { %v2633_v16 = vmul.f32 0.1, %v2559_v0 }
 0x4f3   : > { %v2632_v5 = vmul.f32 0.1, %v2554_v9 }
 0x4f4   : > { %3156 = vmatmul.mubr.f32.gmra.mrb[102].mxu0 %v7794_v32  ;;  %v7797_v50 = vmax.f32 %v2559_v0, %v2633_v16 }
 0x4f5   : > { %3160 = vmatprep.mubr.f32.mxu0 %v7778_v7  ;;  %v7800_v44 = vmax.f32 %v2554_v9, %v2632_v5  ;;  %v7810_v31 = vld [vmem:[#allocation2 + $0x1f9] sm:$0xff] }
 0x4f6   : > { %8786 = vst [vmem:[#allocation43_spill] sm:$0xff] %v7797_v50  ;;  %2697 = vst [vmem:[#allocation2 + $0x228] sm:$0xff] %v7797_v50  ;;  %v7803_v1 = vld [vmem:[#allocation2 + $0x1f1] sm:$0xff] }
 0x4f7   : > { %8787 = vst [vmem:[#allocation44_spill] sm:$0xff] %v7800_v44  ;;  %v7805_v34 = vld [vmem:[#allocation2 + $0x1ef] sm:$0xff]  ;;  %2696 = vst [vmem:[#allocation2 + $0x220] sm:$0xff] %v7800_v44  ;;  %v4796_v24 = vpop.f32.mrb[54].mxu0  ;;  %4865 = vmatprep.mubr.f32.mxu1 %v7803_v1  ;;  %v7816_v4 = vld [vmem:[#allocation2 + $0x1f7] sm:$0xff] }
 0x4f8   : > { %3161 = vmatmul.mubr.f32.gmra.mrb[104].mxu0 %v7805_v34  ;;  %v2569_v0 = vadd.f32 %v7633_v43, %v4796_v24  ;;  %v2563_v16 = vpop.f32.mrb[55].mxu0  ;;  %4866 = vmatmul.mubr.f32.gmra.mrb[112].mxu1 %v7810_v31 }
 0x4f9   : > { %3165 = vmatprep.mubr.f32.mxu0 %v7775_v30  ;;  %v2564_v5 = vadd.f32 %v7633_v43, %v2563_v16 }
 0x4fa   : > { %v2635_v9 = vmul.f32 0.1, %v2569_v0 }
 0x4fb   : > { %v2634_v3 = vmul.f32 0.1, %v2564_v5 }
 0x4fc   : > { %3166 = vmatmul.mubr.f32.gmra.mrb[106].mxu0 %v7816_v4  ;;  %v7819_v60 = vmax.f32 %v2569_v0, %v2635_v9 }
 0x4fd   : > { %3170 = vmatprep.mubr.f32.mxu0 %v7800_v44  ;;  %v7822_v29 = vmax.f32 %v2564_v5, %v2634_v3  ;;  %v7832_v63 = vld [vmem:[#allocation2 + $0x229] sm:$0xff] }
 0x4fe   : > { %8788 = vst [vmem:[#allocation45_spill] sm:$0xff] %v7819_v60  ;;  %2699 = vst [vmem:[#allocation2 + $0x258] sm:$0xff] %v7819_v60  ;;  %v7825_v24 = vld [vmem:[#allocation2 + $0x221] sm:$0xff] }
 0x4ff   : > { %8789 = vst [vmem:[#allocation46_spill] sm:$0xff] %v7822_v29  ;;  %v7827_v58 = vld [vmem:[#allocation2 + $0x21f] sm:$0xff]  ;;  %2698 = vst [vmem:[#allocation2 + $0x250] sm:$0xff] %v7822_v29  ;;  %v4799_v16 = vpop.f32.mrb[56].mxu0  ;;  %4868 = vmatprep.mubr.f32.mxu1 %v7825_v24  ;;  %v7838_v10 = vld [vmem:[#allocation2 + $0x227] sm:$0xff] }
 0x500   : > { %3171 = vmatmul.mubr.f32.gmra.mrb[108].mxu0 %v7827_v58  ;;  %v2579_v0 = vadd.f32 %v7633_v43, %v4799_v16  ;;  %v2573_v9 = vpop.f32.mrb[57].mxu0  ;;  %4869 = vmatmul.mubr.f32.gmra.mrb[114].mxu1 %v7832_v63 }
 0x501   : > { %3175 = vmatprep.mubr.f32.mxu0 %v7797_v50  ;;  %v2574_v3 = vadd.f32 %v7633_v43, %v2573_v9 }
 0x502   : > { %v2637_v5 = vmul.f32 0.1, %v2579_v0 }
 0x503   : > { %v2636_v22 = vmul.f32 0.1, %v2574_v3 }
 0x504   : > { %3176 = vmatmul.mubr.f32.gmra.mrb[110].mxu0 %v7838_v10  ;;  %v7841_v44 = vmax.f32 %v2579_v0, %v2637_v5 }
 0x505   : > { %3180 = vmatprep.mubr.f32.mxu0 %v7822_v29  ;;  %v7844_v30 = vmax.f32 %v2574_v3, %v2636_v22  ;;  %v7854_v50 = vld [vmem:[#allocation2 + $0x259] sm:$0xff] }
 0x506   : > { %8790 = vst [vmem:[#allocation47_spill] sm:$0xff] %v7841_v44  ;;  %2701 = vst [vmem:[#allocation2 + $0x288] sm:$0xff] %v7841_v44  ;;  %v7847_v16 = vld [vmem:[#allocation2 + $0x251] sm:$0xff] }
 0x507   : > { %8791 = vst [vmem:[#allocation48_spill] sm:$0xff] %v7844_v30  ;;  %v7849_v7 = vld [vmem:[#allocation2 + $0x24f] sm:$0xff]  ;;  %2700 = vst [vmem:[#allocation2 + $0x280] sm:$0xff] %v7844_v30  ;;  %v4802_v9 = vpop.f32.mrb[58].mxu0  ;;  %4871 = vmatprep.mubr.f32.mxu1 %v7847_v16  ;;  %v7860_v29 = vld [vmem:[#allocation2 + $0x257] sm:$0xff] }
 0x508   : > { %3181 = vmatmul.mubr.f32.gmra.mrb[112].mxu0 %v7849_v7  ;;  %v2589_v0 = vadd.f32 %v7633_v43, %v4802_v9  ;;  %v2583_v5 = vpop.f32.mrb[59].mxu0  ;;  %4872 = vmatmul.mubr.f32.gmra.mrb[116].mxu1 %v7854_v50 }
 0x509   : > { %3185 = vmatprep.mubr.f32.mxu0 %v7819_v60  ;;  %v2584_v22 = vadd.f32 %v7633_v43, %v2583_v5 }
 0x50a   : > { %v2639_v3 = vmul.f32 0.1, %v2589_v0 }
 0x50b   : > { %v2638_v48 = vmul.f32 0.1, %v2584_v22 }
 0x50c   : > { %3186 = vmatmul.mubr.f32.gmra.mrb[114].mxu0 %v7860_v29  ;;  %v7863_v20 = vmax.f32 %v2589_v0, %v2639_v3 }
 0x50d   : > { %3190 = vmatprep.mubr.f32.mxu0 %v7844_v30  ;;  %v7866_v12 = vmax.f32 %v2584_v22, %v2638_v48  ;;  %v7876_v60 = vld [vmem:[#allocation2 + $0x289] sm:$0xff] }
 0x50e   : > { %2703 = vst [vmem:[#allocation2 + $0x2b8] sm:$0xff] %v7863_v20  ;;  %v7869_v9 = vld [vmem:[#allocation2 + $0x281] sm:$0xff]  ;;  %8794 = vst [vmem:[#allocation51_spill] sm:$0xff] %v7876_v60 }
 0x50f   : > { %8792 = vst [vmem:[#allocation49_spill] sm:$0xff] %v7866_v12  ;;  %8793 = vst [vmem:[#allocation50_spill] sm:$0xff] %v7869_v9  ;;  %v7871_v27 = vld [vmem:[#allocation2 + $0x27f] sm:$0xff]  ;;  %v4805_v5 = vpop.f32.mrb[60].mxu0  ;;  %4874 = vmatprep.mubr.f32.mxu1 %v7869_v9  ;;  %v7882_v30 = vld [vmem:[#allocation2 + $0x287] sm:$0xff] }
 0x510   : > { %2702 = vst [vmem:[#allocation2 + $0x2b0] sm:$0xff] %v7866_v12  ;;  %3191 = vmatmul.mubr.f32.gmra.mrb[116].mxu0 %v7871_v27  ;;  %v2599_v0 = vadd.f32 %v7633_v43, %v4805_v5  ;;  %v2593_v3 = vpop.f32.mrb[61].mxu0  ;;  %4875 = vmatmul.mubr.f32.gmra.mrb[118].mxu1 %v7876_v60 }
 0x511   : > { %3195 = vmatprep.mubr.f32.mxu0 %v7841_v44  ;;  %v2594_v48 = vadd.f32 %v7633_v43, %v2593_v3 }
 0x512   : > { %v2641_v22 = vmul.f32 0.1, %v2599_v0 }
 0x513   : > { %v2640_v35 = vmul.f32 0.1, %v2594_v48 }
 0x514   : > { %3196 = vmatmul.mubr.f32.gmra.mrb[118].mxu0 %v7882_v30  ;;  %v7885_v15 = vmax.f32 %v2599_v0, %v2641_v22 }
 0x515   : > { %3200 = vmatprep.mubr.f32.mxu0 %v7866_v12  ;;  %v7888_v40 = vmax.f32 %v2594_v48, %v2640_v35  ;;  %v7898_v44 = vld [vmem:[#allocation2 + $0x2b9] sm:$0xff] }
 0x516   : > { %2705 = vst [vmem:[#allocation2 + $0x2e8] sm:$0xff] %v7885_v15  ;;  %8796 = vst [vmem:[#allocation97_spill] sm:$0xff] %v7898_v44 }
 0x517   : > { %v7891_v5 = vld [vmem:[#allocation2 + $0x2b1] sm:$0xff]  ;;  %2704 = vst [vmem:[#allocation2 + $0x2e0] sm:$0xff] %v7888_v40  ;;  %v4808_v3 = vpop.f32.mrb[62].mxu0 }
 0x518   : > { %8795 = vst [vmem:[#allocation52_spill] sm:$0xff] %v7891_v5  ;;  %v7893_v37 = vld [vmem:[#allocation2 + $0x2af] sm:$0xff]  ;;  %4877 = vmatprep.mubr.f32.mxu1 %v7891_v5  ;;  %v2609_v0 = vadd.f32 %v7633_v43, %v4808_v3  ;;  %v2603_v22 = vpop.f32.mrb[63].mxu0  ;;  %v7904_v12 = vld [vmem:[#allocation2 + $0x2b7] sm:$0xff] }
 0x519   : > { %3201 = vmatmul.mubr.f32.gmra.mrb[120].mxu0 %v7893_v37  ;;  %4878 = vmatmul.mubr.f32.gmra.mrb[120].mxu1 %v7898_v44  ;;  %v2604_v35 = vadd.f32 %v7633_v43, %v2603_v22 }
 0x51a   : > { %3205 = vmatprep.mubr.f32.mxu0 %v7863_v20  ;;  %v2643_v48 = vmul.f32 0.1, %v2609_v0 }
 0x51b   : > { %v2642_v60 = vmul.f32 0.1, %v2604_v35 }
 0x51c   : > { %v7907_v5 = vmax.f32 %v2609_v0, %v2643_v48  ;;  %v2772_v0 = vld [vmem:[#allocation2 + $0x11] sm:$0xff]  ;;  %v8799_v48 = vld [vmem:[#allocation65_spill] sm:$0xff] }
 0x51d   : > { %3206 = vmatmul.mubr.f32.gmra.mrb[122].mxu0 %v7904_v12  ;;  %v7910_v9 = vmax.f32 %v2604_v35, %v2642_v60  ;;  %v7920_v43 = vld [vmem:[#allocation2 + $0x2e9] sm:$0xff] }
 0x51e   : > { %8797 = vst [vmem:[#allocation98_spill] sm:$0xff] %v7907_v5  ;;  %3210 = vmatprep.mubr.f32.mxu0 %v7888_v40  ;;  %2707 = vst [vmem:[#allocation2 + $0x318] sm:$0xff] %v7907_v5  ;;  %v7913_v3 = vld [vmem:[#allocation2 + $0x2e1] sm:$0xff]  ;;  %v2773_v5 = vld [vmem:[#allocation2 + $0x19] sm:$0xff] }
 0x51f   : > { %8798 = vst [vmem:[#allocation99_spill] sm:$0xff] %v7910_v9  ;;  %v7915_v44 = vld [vmem:[#allocation2 + $0x2df] sm:$0xff]  ;;  %2706 = vst [vmem:[#allocation2 + $0x310] sm:$0xff] %v7910_v9  ;;  %4880 = vmatprep.mubr.f32.mxu1 %v7913_v3  ;;  %v7924_v60 = vld [vmem:[#allocation2 + $0x2e7] sm:$0xff] }
 0x520   : > { %4881 = vmatmul.mubr.f32.gmra.mrb[122].mxu1 %v7920_v43  ;;  %v7940_v9 = vld [vmem:[#allocation2 + $0x41] sm:$0xff] }
 0x521   : > { %3211 = vmatmul.mubr.f32.gmra.mrb[124].mxu0 %v7915_v44 }
 0x522   : > { %3215 = vmatprep.mubr.f32.mxu0 %v7885_v15 }
 0x525   : > { %3216 = vmatmul.mubr.f32.gmra.mrb[126].mxu0 %v7924_v60  ;;  %v7931_v35 = vld [vmem:[#allocation2 + $0x319] sm:$0xff] }
 0x526   : > { %3285 = vmatprep.mubr.f32.mxu0 %v7639_v36  ;;  %v7928_v22 = vld [vmem:[#allocation2 + $0x311] sm:$0xff]  ;;  %v8800_v36 = vld [vmem:[#allocation66_spill] sm:$0xff] }
 0x527   : > { %4883 = vmatprep.mubr.f32.mxu1 %v7928_v22 }
 0x528   : > { %4884 = vmatmul.mubr.f32.gmra.mrb[124].mxu1 %v7931_v35 }
 0x529   : > { %3286 = vmatmul.mubr.f32.vlgmr.msra.gmra.mrb[64].mxu0 %v2772_v0  ;;  %v8801_v0 = vld [vmem:[#allocation67_spill] sm:$0xff] }
 0x52a   : > { %5275 = vmatpush1.bf16.msra.mxu0 %v8799_v48  ;;  %3290 = vmatprep.mubr.f32.mxu0 %v7644_v54  ;;  %v7946_v54 = vld [vmem:[#allocation2 + $0x49] sm:$0xff]  ;;  %v8818_v48 = vld [vmem:[#allocation97_spill] sm:$0xff] }
 0x52b   : > { %5276 = vmatprep.subr.bf16.mxu0 %v8637_v8 }
 0x52d   : > { %3291 = vmatmul.mubr.f32.gmra.mrb[66].mxu0 %v2773_v5  ;;  %v8803_v5 = vld [vmem:[#allocation69_spill] sm:$0xff] }
 0x52e   : > { %3295 = vmatprep.mubr.f32.mxu0 %v7649_v57  ;;  %5278 = vmatpush1.bf16.msra.mxu0 %v8800_v36  ;;  %v8802_v57 = vld [vmem:[#allocation68_spill] sm:$0xff]  ;;  %v8037_v36 = vld [vmem:[#allocation2 + $0x30f] sm:$0xff] }
 0x52f   : > { %5279 = vmatprep.subr.bf16.mxu0 %v8637_v8 }
 0x531   : > { %3296 = vmatmul.mubr.f32.gmra.mrb[68].mxu0 %v7940_v9 }
 0x532   : > { %3300 = vmatprep.mubr.f32.mxu0 %v7658_v2  ;;  %5281 = vmatpush1.bf16.msra.mxu0 %v8801_v0  ;;  %v8804_v2 = vld [vmem:[#allocation70_spill] sm:$0xff] }
 0x533   : > { %5282 = vmatprep.subr.bf16.mxu0 %v8637_v8 }
 0x535   : > { %3301 = vmatmul.mubr.f32.gmra.mrb[70].mxu0 %v7946_v54 }
 0x536   : > { %3305 = vmatprep.mubr.f32.mxu0 %v7663_v21  ;;  %5284 = vmatpush1.bf16.msra.mxu0 %v8802_v57  ;;  %v8805_v21 = vld [vmem:[#allocation71_spill] sm:$0xff] }
 0x537   : > { %5285 = vmatprep.subr.bf16.mxu0 %v8637_v8  ;;  %v8043_v57 = vld [vmem:[#allocation2 + $0x317] sm:$0xff] }
 0x539   : > { %3306 = vmatmul.mubr.f32.gmra.mrb[72].mxu0 %v7647_v56 }
 0x53a   : > { %3310 = vmatprep.mubr.f32.mxu0 %v7672_v61  ;;  %5287 = vmatpush1.bf16.msra.mxu0 %v8803_v5  ;;  %v8806_v61 = vld [vmem:[#allocation72_spill] sm:$0xff] }
 0x53b   : > { %5288 = vmatprep.subr.bf16.mxu0 %v8637_v8 }
 0x53d   : > { %3311 = vmatmul.mubr.f32.gmra.mrb[74].mxu0 %v7653_v41 }
 0x53e   : > { %3315 = vmatprep.mubr.f32.mxu0 %v7679_v28  ;;  %5290 = vmatpush1.bf16.msra.mxu0 %v8804_v2  ;;  %v8807_v28 = vld [vmem:[#allocation73_spill] sm:$0xff] }
 0x53f   : > { %5291 = vmatprep.subr.bf16.mxu0 %v8637_v8 }
 0x541   : > { %3316 = vmatmul.mubr.f32.gmra.mrb[76].mxu0 %v7661_v14 }
 0x542   : > { %3320 = vmatprep.mubr.f32.mxu0 %v7689_v55  ;;  %5293 = vmatpush1.bf16.msra.mxu0 %v8805_v21  ;;  %v8808_v55 = vld [vmem:[#allocation74_spill] sm:$0xff]  ;;  %v2836_v21 = vld [vmem:[#allocation2 + $0x40] sm:$0xff] }
 0x543   : > { %5294 = vmatprep.subr.bf16.mxu0 %v8637_v8 }
 0x545   : > { %3321 = vmatmul.mubr.f32.gmra.mrb[78].mxu0 %v7667_v45 }
 0x546   : > { %3325 = vmatprep.mubr.f32.mxu0 %v7697_v39  ;;  %5296 = vmatpush1.bf16.msra.mxu0 %v8806_v61  ;;  %v8809_v39 = vld [vmem:[#allocation75_spill] sm:$0xff]  ;;  %v8819_v61 = vld [vmem:[#allocation56_spill] sm:$0xff] }
 0x547   : > { %5297 = vmatprep.subr.bf16.mxu0 %v8637_v8 }
 0x549   : > { %3326 = vmatmul.mubr.f32.gmra.mrb[80].mxu0 %v7677_v52 }
 0x54a   : > { %3330 = vmatprep.mubr.f32.mxu0 %v7707_v46  ;;  %5299 = vmatpush1.bf16.msra.mxu0 %v8807_v28  ;;  %v8810_v46 = vld [vmem:[#allocation76_spill] sm:$0xff]  ;;  %v2837_v28 = vld [vmem:[#allocation2 + $0x48] sm:$0xff] }
 0x54b   : > { %5300 = vmatprep.subr.bf16.mxu0 %v8637_v8 }
 0x54d   : > { %3331 = vmatmul.mubr.f32.gmra.mrb[82].mxu0 %v7684_v62 }
 0x54e   : > { %3335 = vmatprep.mubr.f32.mxu0 %v7718_v19  ;;  %5302 = vmatpush1.bf16.msra.mxu0 %v8808_v55  ;;  %v8811_v19 = vld [vmem:[#allocation77_spill] sm:$0xff] }
 0x54f   : > { %5303 = vmatprep.subr.bf16.mxu0 %v8637_v8 }
 0x551   : > { %3336 = vmatmul.mubr.f32.gmra.mrb[84].mxu0 %v7695_v17 }
 0x552   : > { %3340 = vmatprep.mubr.f32.mxu0 %v7728_v6  ;;  %5305 = vmatpush1.bf16.msra.mxu0 %v8809_v39  ;;  %v8812_v6 = vld [vmem:[#allocation78_spill] sm:$0xff] }
 0x553   : > { %5306 = vmatprep.subr.bf16.mxu0 %v8637_v8 }
 0x555   : > { %3341 = vmatmul.mubr.f32.gmra.mrb[86].mxu0 %v7702_v33 }
 0x556   : > { %3345 = vmatprep.mubr.f32.mxu0 %v7739_v25  ;;  %5308 = vmatpush1.bf16.msra.mxu0 %v8810_v46  ;;  %v8813_v25 = vld [vmem:[#allocation79_spill] sm:$0xff]  ;;  %v8820_v46 = vld [vmem:[#allocation58_spill] sm:$0xff] }
 0x557   : > { %5309 = vmatprep.subr.bf16.mxu0 %v8637_v8 }
 0x559   : > { %3346 = vmatmul.mubr.f32.gmra.mrb[88].mxu0 %v7716_v23 }
 0x55a   : > { %3350 = vmatprep.mubr.f32.mxu0 %v7750_v47  ;;  %5311 = vmatpush1.bf16.msra.mxu0 %v8811_v19  ;;  %v8814_v47 = vld [vmem:[#allocation80_spill] sm:$0xff] }
 0x55b   : > { %5312 = vmatprep.subr.bf16.mxu0 %v8637_v8  ;;  %v8068_v19 = vld [vmem:[#allocation2 + $0x78] sm:$0xff] }
 0x55d   : > { %3351 = vmatmul.mubr.f32.gmra.mrb[90].mxu0 %v7723_v26 }
 0x55e   : > { %3355 = vmatprep.mubr.f32.mxu0 %v7761_v11  ;;  %5314 = vmatpush1.bf16.msra.mxu0 %v8812_v6 }
 0x55f   : > { %5315 = vmatprep.subr.bf16.mxu0 %v8637_v8 }
 0x561   : > { %3356 = vmatmul.mubr.f32.gmra.mrb[92].mxu0 %v7737_v51 }
 0x562   : > { %3360 = vmatprep.mubr.f32.mxu0 %v7772_v13  ;;  %5317 = vmatpush1.bf16.msra.mxu0 %v8813_v25  ;;  %v8817_v13 = vld [vmem:[#allocation52_spill] sm:$0xff] }
 0x563   : > { %5318 = vmatprep.subr.bf16.mxu0 %v8637_v8  ;;  %v8822_v25 = vld [vmem:[#allocation60_spill] sm:$0xff] }
 0x565   : > { %3361 = vmatmul.mubr.f32.gmra.mrb[94].mxu0 %v7744_v42 }
 0x566   : > { %3365 = vmatprep.mubr.f32.mxu0 %v7783_v53  ;;  %5320 = vmatpush1.bf16.msra.mxu0 %v8814_v47  ;;  %v8078_v47 = vld [vmem:[#allocation2 + $0xa0] sm:$0xff] }
 0x567   : > { %5321 = vmatprep.subr.bf16.mxu0 %v8637_v8 }
 0x569   : > { %3366 = vmatmul.mubr.f32.gmra.mrb[96].mxu0 %v7759_v59 }
 0x56a   : > { %3370 = vmatprep.mubr.f32.mxu0 %v7794_v32  ;;  %v8816_v32 = vld [vmem:[#allocation51_spill] sm:$0xff] }
 0x56d   : > { %3371 = vmatmul.mubr.f32.gmra.mrb[98].mxu0 %v7766_v38 }
 0x56e   : > { %3375 = vmatprep.mubr.f32.mxu0 %v7805_v34 }
 0x571   : > { %3376 = vmatmul.mubr.f32.gmra.mrb[100].mxu0 %v7781_v49 }
 0x572   : > { %3380 = vmatprep.mubr.f32.mxu0 %v7816_v4  ;;  %v8815_v4 = vld [vmem:[#allocation50_spill] sm:$0xff] }
 0x575   : > { %3381 = vmatmul.mubr.f32.gmra.mrb[102].mxu0 %v7788_v18 }
 0x576   : > { %3385 = vmatprep.mubr.f32.mxu0 %v7827_v58 }
 0x579   : > { %3386 = vmatmul.mubr.f32.gmra.mrb[104].mxu0 %v7803_v1 }
 0x57a   : > { %3390 = vmatprep.mubr.f32.mxu0 %v7838_v10 }
 0x57d   : > { %3391 = vmatmul.mubr.f32.gmra.mrb[106].mxu0 %v7810_v31 }
 0x57e   : > { %3395 = vmatprep.mubr.f32.mxu0 %v7849_v7 }
 0x581   : > { %3396 = vmatmul.mubr.f32.gmra.mrb[108].mxu0 %v7825_v24 }
 0x582   : > { %3400 = vmatprep.mubr.f32.mxu0 %v7860_v29 }
 0x585   : > { %3401 = vmatmul.mubr.f32.gmra.mrb[110].mxu0 %v7832_v63 }
 0x586   : > { %3405 = vmatprep.mubr.f32.mxu0 %v7871_v27 }
 0x589   : > { %3406 = vmatmul.mubr.f32.gmra.mrb[112].mxu0 %v7847_v16 }
 0x58a   : > { %3410 = vmatprep.mubr.f32.mxu0 %v7882_v30 }
 0x58b   : > { %v8018_v58 = vpop.f32.mrb[96].mxu1 }
 0x58c   : > { %v8021_v10 = vpop.f32.mrb[97].mxu1 }
 0x58d   : > { %3411 = vmatmul.mubr.f32.gmra.mrb[114].mxu0 %v7854_v50 }
 0x58e   : > { %3415 = vmatprep.mubr.f32.mxu0 %v7893_v37 }
 0x591   : > { %3416 = vmatmul.mubr.f32.gmra.mrb[116].mxu0 %v8815_v4 }
 0x592   : > { %3420 = vmatprep.mubr.f32.mxu0 %v7904_v12 }
 0x593   : > { %v8026_v34 = vpop.f32.mrb[98].mxu1 }
 0x594   : > { %v8029_v53 = vpop.f32.mrb[99].mxu1 }
 0x595   : > { %3421 = vmatmul.mubr.f32.gmra.mrb[118].mxu0 %v8816_v32 }
 0x596   : > { %3425 = vmatprep.mubr.f32.mxu0 %v7915_v44 }
 0x599   : > { %3426 = vmatmul.mubr.f32.gmra.mrb[120].mxu0 %v8817_v13 }
 0x59a   : > { %3430 = vmatprep.mubr.f32.mxu0 %v7924_v60 }
 0x59b   : > { %v8034_v11 = vpop.f32.mrb[100].mxu1 }
 0x59c   : > { %v8039_v0 = vpop.f32.mrb[101].mxu1 }
 0x59d   : > { %3431 = vmatmul.mubr.f32.gmra.mrb[122].mxu0 %v8818_v48 }
 0x59e   : > { %3435 = vmatprep.mubr.f32.mxu0 %v8037_v36 }
 0x5a1   : > { %3436 = vmatmul.mubr.f32.gmra.mrb[124].mxu0 %v7913_v3 }
 0x5a2   : > { %3440 = vmatprep.mubr.f32.mxu0 %v8043_v57 }
 0x5a3   : > { %v8046_v5 = vpop.f32.mrb[102].mxu1 }
 0x5a4   : > { %v8049_v2 = vpop.f32.mrb[103].mxu1 }
 0x5a5   : > { %3441 = vmatmul.mubr.f32.gmra.mrb[126].mxu0 %v7920_v43 }
 0x5a6   : > { %3510 = vmatprep.mubr.f32.mxu0 %v7940_v9  ;;  %v8062_v9 = vld [vmem:[#allocation2 + $0x70] sm:$0xff] }
 0x5a9   : > { %3511 = vmatmul.mubr.f32.vlgmr.msra.gmra.mrb[64].mxu0 %v2836_v21  ;;  %v8084_v21 = vld [vmem:[#allocation2 + $0xa8] sm:$0xff] }
 0x5aa   : > { %5323 = vmatpush1.bf16.msra.mxu0 %v8819_v61  ;;  %3515 = vmatprep.mubr.f32.mxu0 %v7946_v54  ;;  %v8821_v54 = vld [vmem:[#allocation57_spill] sm:$0xff] }
 0x5ab   : > { %5324 = vmatprep.subr.bf16.mxu0 %v8637_v8  ;;  %v8055_v55 = vpop.f32.mrb[104].mxu1 }
 0x5ac   : > { %v8057_v39 = vpop.f32.mrb[105].mxu1 }
 0x5ad   : > { %3516 = vmatmul.mubr.f32.gmra.mrb[66].mxu0 %v2837_v28  ;;  %v8824_v28 = vld [vmem:[#allocation82_spill] sm:$0xff] }
 0x5ae   : > { %3520 = vmatprep.mubr.f32.mxu0 %v7647_v56  ;;  %5326 = vmatpush1.bf16.msra.mxu0 %v8820_v46  ;;  %v8094_v46 = vld [vmem:[#allocation2 + $0xd0] sm:$0xff] }
 0x5af   : > { %5327 = vmatprep.subr.bf16.mxu0 %v8637_v8 }
 0x5b1   : > { %3521 = vmatmul.mubr.f32.gmra.mrb[68].mxu0 %v8062_v9 }
 0x5b2   : > { %3525 = vmatprep.mubr.f32.mxu0 %v7653_v41  ;;  %5329 = vmatpush1.bf16.msra.mxu0 %v8821_v54  ;;  %v8823_v41 = vld [vmem:[#allocation59_spill] sm:$0xff]  ;;  %v8100_v54 = vld [vmem:[#allocation2 + $0xd8] sm:$0xff] }
 0x5b3   : > { %5330 = vmatprep.subr.bf16.mxu0 %v8637_v8  ;;  %v8070_v6 = vpop.f32.mrb[106].mxu1 }
 0x5b4   : > { %v8073_v56 = vpop.f32.mrb[107].mxu1 }
 0x5b5   : > { %3526 = vmatmul.mubr.f32.gmra.mrb[70].mxu0 %v8068_v19 }
 0x5b6   : > { %3530 = vmatprep.mubr.f32.mxu0 %v7661_v14  ;;  %5332 = vmatpush1.bf16.msra.mxu0 %v8822_v25 }
 0x5b7   : > { %5333 = vmatprep.subr.bf16.mxu0 %v8637_v8 }
 0x5b9   : > { %3531 = vmatmul.mubr.f32.gmra.mrb[72].mxu0 %v8078_v47 }
 0x5ba   : > { %3535 = vmatprep.mubr.f32.mxu0 %v7667_v45  ;;  %5335 = vmatpush1.bf16.msra.mxu0 %v8823_v41  ;;  %v8825_v45 = vld [vmem:[#allocation84_spill] sm:$0xff]  ;;  %v8828_v41 = vld [vmem:[#allocation86_spill] sm:$0xff] }
 0x5bb   : > { %5336 = vmatprep.subr.bf16.mxu0 %v8637_v8  ;;  %v8086_v61 = vpop.f32.mrb[108].mxu1 }
 0x5bc   : > { %v8089_v14 = vpop.f32.mrb[109].mxu1 }
 0x5bd   : > { %3536 = vmatmul.mubr.f32.gmra.mrb[74].mxu0 %v8084_v21 }
 0x5be   : > { %3540 = vmatprep.mubr.f32.mxu0 %v7677_v52  ;;  %5338 = vmatpush1.bf16.msra.mxu0 %v8824_v28  ;;  %v8829_v28 = vld [vmem:[#allocation85_spill] sm:$0xff] }
 0x5bf   : > { %5339 = vmatprep.subr.bf16.mxu0 %v8637_v8 }
 0x5c1   : > { %3541 = vmatmul.mubr.f32.gmra.mrb[76].mxu0 %v8094_v46 }
 0x5c2   : > { %3545 = vmatprep.mubr.f32.mxu0 %v7684_v62  ;;  %5341 = vmatpush1.bf16.msra.mxu0 %v8825_v45  ;;  %v8830_v62 = vld [vmem:[#allocation87_spill] sm:$0xff]  ;;  %v8114_v45 = vld [vmem:[#allocation2 + $0x108] sm:$0xff] }
 0x5c3   : > { %5342 = vmatprep.subr.bf16.mxu0 %v8637_v8  ;;  %v8102_v25 = vpop.f32.mrb[110].mxu1 }
 0x5c4   : > { %8826 = vst [vmem:[#allocation65_spill] sm:$0xff] %v8102_v25  ;;  %v8105_v52 = vpop.f32.mrb[111].mxu1 }
 0x5c5   : > { %3546 = vmatmul.mubr.f32.gmra.mrb[78].mxu0 %v8100_v54  ;;  %8827 = vst [vmem:[#allocation66_spill] sm:$0xff] %v8105_v52 }
 0x5c6   : > { %3550 = vmatprep.mubr.f32.mxu0 %v7695_v17  ;;  %5344 = vmatpush1.bf16.msra.mxu0 %v8828_v41  ;;  %v8832_v17 = vld [vmem:[#allocation88_spill] sm:$0xff]  ;;  %v8833_v41 = vld [vmem:[#allocation83_spill] sm:$0xff] }
 0x5c7   : > { %5345 = vmatprep.subr.bf16.mxu0 %v8637_v8 }
 0x5c9   : > { %3551 = vmatmul.mubr.f32.gmra.mrb[80].mxu0 %v8829_v28  ;;  %v8128_v28 = vld [vmem:[#allocation2 + $0x138] sm:$0xff] }
 0x5ca   : > { %3555 = vmatprep.mubr.f32.mxu0 %v7702_v33  ;;  %5347 = vmatpush1.bf16.msra.mxu0 %v8830_v62  ;;  %v8834_v33 = vld [vmem:[#allocation89_spill] sm:$0xff] }
 0x5cb   : > { %5348 = vmatprep.subr.bf16.mxu0 %v8637_v8  ;;  %v8116_v25 = vpop.f32.mrb[112].mxu1 }
 0x5cc   : > { %8831 = vst [vmem:[#allocation67_spill] sm:$0xff] %v8116_v25  ;;  %v8119_v52 = vpop.f32.mrb[113].mxu1 }
 0x5cd   : > { %3556 = vmatmul.mubr.f32.gmra.mrb[82].mxu0 %v8114_v45 }
 0x5ce   : > { %3560 = vmatprep.mubr.f32.mxu0 %v7716_v23  ;;  %5350 = vmatpush1.bf16.msra.mxu0 %v8832_v17  ;;  %v8836_v23 = vld [vmem:[#allocation90_spill] sm:$0xff]  ;;  %v8837_v17 = vld [vmem:[#allocation92_spill] sm:$0xff] }
 0x5cf   : > { %5351 = vmatprep.subr.bf16.mxu0 %v8637_v8 }
 0x5d1   : > { %3561 = vmatmul.mubr.f32.gmra.mrb[84].mxu0 %v8833_v41 }
 0x5d2   : > { %3565 = vmatprep.mubr.f32.mxu0 %v7723_v26  ;;  %5353 = vmatpush1.bf16.msra.mxu0 %v8834_v33  ;;  %v8838_v26 = vld [vmem:[#allocation91_spill] sm:$0xff]  ;;  %v8839_v33 = vld [vmem:[#allocation93_spill] sm:$0xff] }
 0x5d3   : > { %5354 = vmatprep.subr.bf16.mxu0 %v8637_v8  ;;  %v8130_v62 = vpop.f32.mrb[114].mxu1 }
 0x5d4   : > { %8835 = vst [vmem:[#allocation68_spill] sm:$0xff] %v8130_v62  ;;  %v8133_v25 = vpop.f32.mrb[115].mxu1 }
 0x5d5   : > { %3566 = vmatmul.mubr.f32.gmra.mrb[86].mxu0 %v8128_v28 }
 0x5d6   : > { %3570 = vmatprep.mubr.f32.mxu0 %v7737_v51  ;;  %5356 = vmatpush1.bf16.msra.mxu0 %v8836_v23  ;;  %v8840_v51 = vld [vmem:[#allocation94_spill] sm:$0xff] }
 0x5d7   : > { %5357 = vmatprep.subr.bf16.mxu0 %v8637_v8  ;;  %v8841_v23 = vld [vmem:[#allocation38_spill] sm:$0xff] }
 0x5d9   : > { %3571 = vmatmul.mubr.f32.gmra.mrb[88].mxu0 %v8837_v17 }
 0x5da   : > { %3575 = vmatprep.mubr.f32.mxu0 %v7744_v42  ;;  %5359 = vmatpush1.bf16.msra.mxu0 %v8838_v26  ;;  %v8842_v42 = vld [vmem:[#allocation95_spill] sm:$0xff]  ;;  %v8843_v26 = vld [vmem:[#allocation36_spill] sm:$0xff] }
 0x5db   : > { %5360 = vmatprep.subr.bf16.mxu0 %v8637_v8  ;;  %v8142_v41 = vpop.f32.mrb[116].mxu1 }
 0x5dc   : > { %v8145_v62 = vpop.f32.mrb[117].mxu1 }
 0x5dd   : > { %3576 = vmatmul.mubr.f32.gmra.mrb[90].mxu0 %v8839_v33 }
 0x5de   : > { %3580 = vmatprep.mubr.f32.mxu0 %v7759_v59  ;;  %5362 = vmatpush1.bf16.msra.mxu0 %v8840_v51  ;;  %v8844_v59 = vld [vmem:[#allocation96_spill] sm:$0xff] }
 0x5df   : > { %5363 = vmatprep.subr.bf16.mxu0 %v8637_v8  ;;  %v8845_v51 = vld [vmem:[#allocation40_spill] sm:$0xff] }
 0x5e1   : > { %3581 = vmatmul.mubr.f32.gmra.mrb[92].mxu0 %v8841_v23 }
 0x5e2   : > { %3585 = vmatprep.mubr.f32.mxu0 %v7766_v38  ;;  %5365 = vmatpush1.bf16.msra.mxu0 %v8842_v42  ;;  %v8846_v38 = vld [vmem:[#allocation39_spill] sm:$0xff] }
 0x5e3   : > { %5366 = vmatprep.subr.bf16.mxu0 %v8637_v8  ;;  %v8154_v17 = vpop.f32.mrb[118].mxu1  ;;  %v8847_v8 = vld [vmem:[#allocation42_spill] sm:$0xff] }
 0x5e4   : > { %v8157_v33 = vpop.f32.mrb[119].mxu1 }
 0x5e5   : > { %3586 = vmatmul.mubr.f32.gmra.mrb[94].mxu0 %v8843_v26 }
 0x5e6   : > { %3590 = vmatprep.mubr.f32.mxu0 %v7781_v49  ;;  %5368 = vmatpush1.bf16.msra.mxu0 %v8844_v59  ;;  %v8848_v49 = vld [vmem:[#allocation41_spill] sm:$0xff] }
 0x5e9   : > { %3591 = vmatmul.mubr.f32.gmra.mrb[96].mxu0 %v8845_v51 }
 0x5ea   : > { %3595 = vmatprep.mubr.f32.mxu0 %v7788_v18  ;;  %v8849_v18 = vld [vmem:[#allocation44_spill] sm:$0xff] }
 0x5ec   : > { %v8163_v23 = vpop.f32.mrb[120].mxu1 }
 0x5ed   : > { %3596 = vmatmul.mubr.f32.gmra.mrb[98].mxu0 %v8846_v38  ;;  %v8166_v42 = vpop.f32.mrb[121].mxu1  ;;  %v8850_v38 = vld [vmem:[#allocation43_spill] sm:$0xff] }
 0x5ee   : > { %3600 = vmatprep.mubr.f32.mxu0 %v7803_v1 }
 0x5f1   : > { %3601 = vmatmul.mubr.f32.gmra.mrb[100].mxu0 %v8847_v8  ;;  %v8852_v8 = vld [vmem:[#allocation45_spill] sm:$0xff] }
 0x5f2   : > { %3605 = vmatprep.mubr.f32.mxu0 %v7810_v31  ;;  %v8851_v31 = vld [vmem:[#allocation46_spill] sm:$0xff] }
 0x5f3   : > { %v8171_v26 = vpop.f32.mrb[122].mxu1 }
 0x5f4   : > { %v8174_v59 = vpop.f32.mrb[123].mxu1 }
 0x5f5   : > { %3606 = vmatmul.mubr.f32.gmra.mrb[102].mxu0 %v8848_v49  ;;  %v8855_v49 = vld [vmem:[#allocation49_spill] sm:$0xff] }
 0x5f6   : > { %3610 = vmatprep.mubr.f32.mxu0 %v7825_v24  ;;  %v8853_v24 = vld [vmem:[#allocation48_spill] sm:$0xff] }
 0x5f9   : > { %3611 = vmatmul.mubr.f32.gmra.mrb[104].mxu0 %v8849_v18  ;;  %v2943_v18 = vld [vmem:[#allocation2 + $0x168] sm:$0xff] }
 0x5fa   : > { %3615 = vmatprep.mubr.f32.mxu0 %v7832_v63  ;;  %v8854_v63 = vld [vmem:[#allocation47_spill] sm:$0xff] }
 0x5fb   : > { %v8179_v51 = vpop.f32.mrb[124].mxu1 }
 0x5fc   : > { %v8182_v1 = vpop.f32.mrb[125].mxu1 }
 0x5fd   : > { %3616 = vmatmul.mubr.f32.gmra.mrb[106].mxu0 %v8850_v38  ;;  %v2911_v38 = vld [vmem:[#allocation2 + $0x167] sm:$0xff] }
 0x5fe   : > { %3620 = vmatprep.mubr.f32.mxu0 %v7847_v16  ;;  %v2994_v16 = vld [vmem:[#allocation2 + $0x341] sm:$0xff] }
 0x5ff   : > { %4886 = vmatprep.mubr.f32.mxu1 %v2994_v16  ;;  %v2915_v16 = vld [vmem:[#allocation2 + $0x1c7] sm:$0xff] }
 0x601   : > { %3621 = vmatmul.mubr.f32.gmra.mrb[108].mxu0 %v8851_v31  ;;  %v2944_v31 = vld [vmem:[#allocation2 + $0x190] sm:$0xff] }
 0x602   : > { %3625 = vmatprep.mubr.f32.mxu0 %v7854_v50  ;;  %v8856_v50 = vld [vmem:[#allocation99_spill] sm:$0xff] }
 0x605   : > { %3626 = vmatmul.mubr.f32.gmra.mrb[110].mxu0 %v8852_v8  ;;  %v2945_v8 = vld [vmem:[#allocation2 + $0x198] sm:$0xff] }
 0x606   : > { %3630 = vmatprep.mubr.f32.mxu0 %v8815_v4  ;;  %v2995_v4 = vld [vmem:[#allocation2 + $0x349] sm:$0xff] }
 0x607   : > { %4887 = vmatmul.mubr.f32.gmra.mrb[126].mxu1 %v2995_v4  ;;  %v2948_v4 = vld [vmem:[#allocation2 + $0x1f0] sm:$0xff] }
 0x609   : > { %3631 = vmatmul.mubr.f32.gmra.mrb[112].mxu0 %v8853_v24  ;;  %v2913_v24 = vld [vmem:[#allocation2 + $0x197] sm:$0xff] }
 0x60a   : > { %3635 = vmatprep.mubr.f32.mxu0 %v8816_v32  ;;  %v8857_v32 = vld [vmem:[#allocation98_spill] sm:$0xff] }
 0x60d   : > { %3636 = vmatmul.mubr.f32.gmra.mrb[114].mxu0 %v8854_v63  ;;  %v2946_v63 = vld [vmem:[#allocation2 + $0x1c0] sm:$0xff] }
 0x60e   : > { %3640 = vmatprep.mubr.f32.mxu0 %v8817_v13  ;;  %v2938_v13 = vld [vmem:[#allocation2 + $0x100] sm:$0xff] }
 0x611   : > { %3641 = vmatmul.mubr.f32.gmra.mrb[116].mxu0 %v8855_v49  ;;  %v2947_v49 = vld [vmem:[#allocation2 + $0x1c8] sm:$0xff] }
 0x612   : > { %3645 = vmatprep.mubr.f32.mxu0 %v8818_v48  ;;  %v2906_v48 = vld [vmem:[#allocation2 + $0xff] sm:$0xff] }
 0x615   : > { %3646 = vmatmul.mubr.f32.gmra.mrb[118].mxu0 %v7863_v20  ;;  %v2900_v20 = vld [vmem:[#allocation2 + $0x6f] sm:$0xff] }
 0x616   : > { %3650 = vmatprep.mubr.f32.mxu0 %v7913_v3  ;;  %v2901_v3 = vld [vmem:[#allocation2 + $0x77] sm:$0xff] }
 0x619   : > { %3651 = vmatmul.mubr.f32.gmra.mrb[120].mxu0 %v7888_v40 }
 0x61a   : > { %3655 = vmatprep.mubr.f32.mxu0 %v7920_v43  ;;  %v2903_v43 = vld [vmem:[#allocation2 + $0xa7] sm:$0xff] }
 0x61d   : > { %3656 = vmatmul.mubr.f32.gmra.mrb[122].mxu0 %v7885_v15  ;;  %v2902_v15 = vld [vmem:[#allocation2 + $0x9f] sm:$0xff] }
 0x61e   : > { %3660 = vmatprep.mubr.f32.mxu0 %v7928_v22  ;;  %v2904_v22 = vld [vmem:[#allocation2 + $0xcf] sm:$0xff] }
 0x621   : > { %3661 = vmatmul.mubr.f32.gmra.mrb[124].mxu0 %v8856_v50 }
 0x622   : > { %3665 = vmatprep.mubr.f32.mxu0 %v7931_v35  ;;  %v2905_v35 = vld [vmem:[#allocation2 + $0xd7] sm:$0xff] }
 0x625   : > { %3666 = vmatmul.mubr.f32.gmra.mrb[126].mxu0 %v8857_v32 }
 0x626   : > { %3735 = vmatprep.mubr.f32.mxu0 %v8062_v9  ;;  %v2907_v9 = vld [vmem:[#allocation2 + $0x107] sm:$0xff] }
 0x629   : > { %3736 = vmatmul.mubr.f32.vlgmr.msra.gmra.mrb[64].mxu0 %v2900_v20  ;;  %v2916_v20 = vld [vmem:[#allocation2 + $0x1ef] sm:$0xff] }
 0x62a   : > { %3740 = vmatprep.mubr.f32.mxu0 %v8068_v19  ;;  %v2940_v19 = vld [vmem:[#allocation2 + $0x130] sm:$0xff] }
 0x62d   : > { %3741 = vmatmul.mubr.f32.gmra.mrb[66].mxu0 %v2901_v3  ;;  %v2949_v3 = vld [vmem:[#allocation2 + $0x1f8] sm:$0xff] }
 0x62e   : > { %3745 = vmatprep.mubr.f32.mxu0 %v8078_v47  ;;  %v2908_v47 = vld [vmem:[#allocation2 + $0x12f] sm:$0xff] }
 0x631   : > { %3746 = vmatmul.mubr.f32.gmra.mrb[68].mxu0 %v2902_v15  ;;  %v2917_v15 = vld [vmem:[#allocation2 + $0x1f7] sm:$0xff] }
 0x632   : > { %3750 = vmatprep.mubr.f32.mxu0 %v8084_v21  ;;  %v2909_v21 = vld [vmem:[#allocation2 + $0x137] sm:$0xff] }
 0x635   : > { %3751 = vmatmul.mubr.f32.gmra.mrb[70].mxu0 %v2903_v43  ;;  %v2950_v43 = vld [vmem:[#allocation2 + $0x220] sm:$0xff] }
 0x636   : > { %3755 = vmatprep.mubr.f32.mxu0 %v8094_v46  ;;  %v2942_v46 = vld [vmem:[#allocation2 + $0x160] sm:$0xff] }
 0x639   : > { %3756 = vmatmul.mubr.f32.gmra.mrb[72].mxu0 %v2904_v22  ;;  %v2918_v22 = vld [vmem:[#allocation2 + $0x21f] sm:$0xff] }
 0x63a   : > { %3760 = vmatprep.mubr.f32.mxu0 %v8100_v54  ;;  %v2910_v54 = vld [vmem:[#allocation2 + $0x15f] sm:$0xff] }
 0x63d   : > { %3761 = vmatmul.mubr.f32.gmra.mrb[74].mxu0 %v2905_v35  ;;  %v2951_v35 = vld [vmem:[#allocation2 + $0x228] sm:$0xff] }
 0x63e   : > { %3765 = vmatprep.mubr.f32.mxu0 %v2938_v13  ;;  %v2919_v13 = vld [vmem:[#allocation2 + $0x227] sm:$0xff] }
 0x641   : > { %3766 = vmatmul.mubr.f32.gmra.mrb[76].mxu0 %v2906_v48  ;;  %v2952_v48 = vld [vmem:[#allocation2 + $0x250] sm:$0xff] }
 0x642   : > { %3770 = vmatprep.mubr.f32.mxu0 %v8114_v45  ;;  %v2912_v45 = vld [vmem:[#allocation2 + $0x18f] sm:$0xff] }
 0x645   : > { %3771 = vmatmul.mubr.f32.gmra.mrb[78].mxu0 %v2907_v9  ;;  %v2953_v9 = vld [vmem:[#allocation2 + $0x258] sm:$0xff] }
 0x646   : > { %3775 = vmatprep.mubr.f32.mxu0 %v2940_v19  ;;  %v2954_v19 = vld [vmem:[#allocation2 + $0x280] sm:$0xff] }
 0x649   : > { %3776 = vmatmul.mubr.f32.gmra.mrb[80].mxu0 %v2908_v47  ;;  %v2955_v47 = vld [vmem:[#allocation2 + $0x288] sm:$0xff] }
 0x64a   : > { %3780 = vmatprep.mubr.f32.mxu0 %v8128_v28  ;;  %v2914_v28 = vld [vmem:[#allocation2 + $0x1bf] sm:$0xff] }
 0x64d   : > { %3781 = vmatmul.mubr.f32.gmra.mrb[82].mxu0 %v2909_v21  ;;  %v2956_v21 = vld [vmem:[#allocation2 + $0x2b0] sm:$0xff] }
 0x64e   : > { %3785 = vmatprep.mubr.f32.mxu0 %v2942_v46  ;;  %v2957_v46 = vld [vmem:[#allocation2 + $0x2b8] sm:$0xff] }
 0x651   : > { %3786 = vmatmul.mubr.f32.gmra.mrb[84].mxu0 %v2910_v54 }
 0x652   : > { %3790 = vmatprep.mubr.f32.mxu0 %v2943_v18 }
 0x655   : > { %3791 = vmatmul.mubr.f32.gmra.mrb[86].mxu0 %v2911_v38 }
 0x656   : > { %3795 = vmatprep.mubr.f32.mxu0 %v2944_v31 }
 0x659   : > { %3796 = vmatmul.mubr.f32.gmra.mrb[88].mxu0 %v2912_v45 }
 0x65a   : > { %3800 = vmatprep.mubr.f32.mxu0 %v2945_v8  ;;  %v8858_v8 = vld [vmem:[#allocation13_spill] sm:$0xff] }
 0x65d   : > { %3801 = vmatmul.mubr.f32.gmra.mrb[90].mxu0 %v2913_v24 }
 0x65e   : > { %3805 = vmatprep.mubr.f32.mxu0 %v2946_v63 }
 0x661   : > { %3806 = vmatmul.mubr.f32.gmra.mrb[92].mxu0 %v2914_v28 }
 0x662   : > { %3810 = vmatprep.mubr.f32.mxu0 %v2947_v49 }
 0x665   : > { %3811 = vmatmul.mubr.f32.gmra.mrb[94].mxu0 %v2915_v16 }
 0x666   : > { %3815 = vmatprep.mubr.f32.mxu0 %v2948_v4 }
 0x669   : > { %3816 = vmatmul.mubr.f32.gmra.mrb[96].mxu0 %v2916_v20  ;;  %v8859_v20 = vld [vmem:[#allocation53_spill] sm:$0xff] }
 0x66a   : > { %3820 = vmatprep.mubr.f32.mxu0 %v2949_v3 }
 0x66d   : > { %3821 = vmatmul.mubr.f32.gmra.mrb[98].mxu0 %v2917_v15 }
 0x66e   : > { %3825 = vmatprep.mubr.f32.mxu0 %v2950_v43 }
 0x671   : > { %3826 = vmatmul.mubr.f32.gmra.mrb[100].mxu0 %v2918_v22 }
 0x672   : > { %3830 = vmatprep.mubr.f32.mxu0 %v2951_v35 }
 0x675   : > { %3831 = vmatmul.mubr.f32.gmra.mrb[102].mxu0 %v2919_v13 }
 0x676   : > { %3835 = vmatprep.mubr.f32.mxu0 %v2952_v48  ;;  %v8860_v48 = vld [vmem:[#allocation55_spill] sm:$0xff] }
 0x679   : > { %3836 = vmatmul.mubr.f32.gmra.mrb[104].mxu0 %v7849_v7  ;;  %v5957_v7 = vld [vmem:[#allocation2] sm:$0xff] }
 0x67a   : > { %3840 = vmatprep.mubr.f32.mxu0 %v2953_v9 }
 0x67d   : > { %3841 = vmatmul.mubr.f32.gmra.mrb[106].mxu0 %v7860_v29  ;;  %v2959_v29 = vld [vmem:[#allocation2 + $0x2e8] sm:$0xff] }
 0x67e   : > { %3845 = vmatprep.mubr.f32.mxu0 %v2954_v19 }
 0x681   : > { %3846 = vmatmul.mubr.f32.gmra.mrb[108].mxu0 %v7871_v27  ;;  %v2931_v27 = vld [vmem:[#allocation2 + $0x347] sm:$0xff] }
 0x682   : > { %3850 = vmatprep.mubr.f32.mxu0 %v2955_v47 }
 0x685   : > { %3851 = vmatmul.mubr.f32.gmra.mrb[110].mxu0 %v7882_v30  ;;  %v2930_v30 = vld [vmem:[#allocation2 + $0x33f] sm:$0xff] }
 0x686   : > { %3855 = vmatprep.mubr.f32.mxu0 %v2956_v21 }
 0x689   : > { %3856 = vmatmul.mubr.f32.gmra.mrb[112].mxu0 %v7893_v37 }
 0x68a   : > { %3860 = vmatprep.mubr.f32.mxu0 %v2957_v46 }
 0x68d   : > { %3861 = vmatmul.mubr.f32.gmra.mrb[114].mxu0 %v7904_v12 }
 0x68e   : > { %3865 = vmatprep.mubr.f32.mxu0 %v7888_v40  ;;  %v8232_v40 = vld [vmem:[%s8421_s4] ss:$0 sm:$0xff] }
 0x691   : > { %3866 = vmatmul.mubr.f32.gmra.mrb[116].mxu0 %v7915_v44 }
 0x692   : > { %3870 = vmatprep.mubr.f32.mxu0 %v2959_v29 }
 0x695   : > { %3871 = vmatmul.mubr.f32.gmra.mrb[118].mxu0 %v7924_v60 }
 0x696   : > { %3875 = vmatprep.mubr.f32.mxu0 %v8856_v50 }
 0x699   : > { %3876 = vmatmul.mubr.f32.gmra.mrb[120].mxu0 %v8037_v36 }
 0x69a   : > { %3880 = vmatprep.mubr.f32.mxu0 %v8857_v32 }
 0x69d   : > { %3881 = vmatmul.mubr.f32.gmra.mrb[122].mxu0 %v8043_v57 }
 0x69e   : > { %3885 = vmatprep.mubr.f32.mxu0 %v5957_v7 }
 0x6a1   : > { %3886 = vmatmul.mubr.f32.gmra.mrb[124].mxu0 %v2930_v30 }
 0x6a2   : > { %3890 = vmatprep.mubr.f32.mxu0 %v5957_v7  ;;  %v8861_v7 = vld [vmem:[#allocation54_spill] sm:$0xff] }
 0x6a5   : > { %3891 = vmatmul.mubr.f32.gmra.mrb[126].mxu0 %v2931_v27 }
 0x6da   : > { %v8225_v44 = vpop.f32.mrb[126].mxu1 }
 0x6db   : > { %v8227_v12 = vpop.f32.mrb[127].mxu1 }
 0x6fc   : > { %v3737_v37 = vpop.f32.mrb[64].mxu0 }
 0x6fd   : > { %v5433_v60 = vadd.f32 %v8232_v40, %v3737_v37  ;;  %v3739_v36 = vpop.f32.mrb[65].mxu0 }
 0x6ff   : > { %v3963_v57 = vadd.f32 %v5433_v60, %v8021_v10 }
 0x700   : > { %v3742_v50 = vpop.f32.mrb[66].mxu0 }
 0x701   : > { %v4121_v32 = vmul.f32 0.1, %v3963_v57  ;;  %v5434_v54 = vadd.f32 %v8232_v40, %v3742_v50  ;;  %v3744_v18 = vpop.f32.mrb[67].mxu0  ;;  %v8862_v50 = vld [vmem:[#allocation63_spill] sm:$0xff] }
 0x703   : > { %v4153_v38 = vmax.f32 %v3963_v57, %v4121_v32  ;;  %v3968_v31 = vadd.f32 %v5434_v54, %v8018_v58 }
 0x704   : > { %v3747_v45 = vpop.f32.mrb[68].mxu0 }
 0x705   : > { %v4185_v24 = vadd.f32 %v4153_v38, %v8858_v8  ;;  %v4122_v63 = vmul.f32 0.1, %v3968_v31  ;;  %v5435_v28 = vadd.f32 %v8232_v40, %v3747_v45  ;;  %v3749_v49 = vpop.f32.mrb[69].mxu0  ;;  %v8863_v8 = vld [vmem:[#allocation62_spill] sm:$0xff] }
 0x707   : > { %4217 = vst [vmem:[%s8242_s30] sm:$0xff] %v4185_v24  ;;  %v4154_v10 = vmax.f32 %v3968_v31, %v4122_v63  ;;  %v3973_v16 = vadd.f32 %v5435_v28, %v8029_v53 }
 0x708   : > { %v3752_v4 = vpop.f32.mrb[70].mxu0 }
 0x709   : > { %v4186_v58 = vadd.f32 %v4154_v10, %v8859_v20  ;;  %v4123_v3 = vmul.f32 0.1, %v3973_v16  ;;  %v5436_v15 = vadd.f32 %v8232_v40, %v3752_v4  ;;  %v3754_v43 = vpop.f32.mrb[71].mxu0  ;;  %v8864_v4 = vld [vmem:[#allocation64_spill] sm:$0xff] }
 0x70b   : > { %4218 = vst [vmem:[%s8242_s30 + $0x8] sm:$0xff] %v4186_v58  ;;  %v4155_v22 = vmax.f32 %v3973_v16, %v4123_v3  ;;  %v3978_v35 = vadd.f32 %v5436_v15, %v8026_v34 }
 0x70c   : > { %v3757_v13 = vpop.f32.mrb[72].mxu0 }
 0x70d   : > { %v4187_v9 = vadd.f32 %v4155_v22, %v8860_v48  ;;  %v4124_v19 = vmul.f32 0.1, %v3978_v35  ;;  %v5437_v47 = vadd.f32 %v8232_v40, %v3757_v13  ;;  %v3759_v21 = vpop.f32.mrb[73].mxu0 }
 0x70f   : > { %4219 = vst [vmem:[%s8242_s30 + $0x10] sm:$0xff] %v4187_v9  ;;  %v4156_v53 = vmax.f32 %v3978_v35, %v4124_v19  ;;  %v3983_v46 = vadd.f32 %v5437_v47, %v8039_v0  ;;  %v8865_v35 = vld [vmem:[#allocation61_spill] sm:$0xff] }
 0x710   : > { %v3762_v29 = vpop.f32.mrb[74].mxu0 }
 0x711   : > { %v4188_v30 = vadd.f32 %v4156_v53, %v8861_v7  ;;  %v4125_v27 = vmul.f32 0.1, %v3983_v46  ;;  %v5438_v37 = vadd.f32 %v8232_v40, %v3762_v29  ;;  %v3764_v60 = vpop.f32.mrb[75].mxu0  ;;  %v8866_v53 = vld [vmem:[#allocation14_spill] sm:$0xff] }
 0x712   : > { %v8867_v60 = vld [vmem:[#allocation15_spill] sm:$0xff] }
 0x713   : > { %4220 = vst [vmem:[%s8242_s30 + $0x18] sm:$0xff] %v4188_v30  ;;  %v4157_v34 = vmax.f32 %v3983_v46, %v4125_v27  ;;  %v3988_v36 = vadd.f32 %v5438_v37, %v8034_v11 }
 0x714   : > { %v3767_v57 = vpop.f32.mrb[76].mxu0 }
 0x715   : > { %v4189_v32 = vadd.f32 %v4157_v34, %v8862_v50  ;;  %v4126_v54 = vmul.f32 0.1, %v3988_v36  ;;  %v5439_v18 = vadd.f32 %v8232_v40, %v3767_v57  ;;  %v3769_v38 = vpop.f32.mrb[77].mxu0 }
 0x717   : > { %4221 = vst [vmem:[%s8242_s30 + $0x20] sm:$0xff] %v4189_v32  ;;  %v4158_v0 = vmax.f32 %v3988_v36, %v4126_v54  ;;  %v3993_v31 = vadd.f32 %v5439_v18, %v8049_v2  ;;  %v8868_v18 = vld [vmem:[#allocation32_spill] sm:$0xff] }
 0x718   : > { %v3772_v45 = vpop.f32.mrb[78].mxu0 }
 0x719   : > { %v4190_v24 = vadd.f32 %v4158_v0, %v8863_v8  ;;  %v4127_v63 = vmul.f32 0.1, %v3993_v31  ;;  %v5440_v28 = vadd.f32 %v8232_v40, %v3772_v45  ;;  %v3774_v49 = vpop.f32.mrb[79].mxu0 }
 0x71b   : > { %4222 = vst [vmem:[%s8242_s30 + $0x28] sm:$0xff] %v4190_v24  ;;  %v4159_v11 = vmax.f32 %v3993_v31, %v4127_v63  ;;  %v3998_v10 = vadd.f32 %v5440_v28, %v8046_v5  ;;  %v8869_v63 = vld [vmem:[#allocation33_spill] sm:$0xff] }
 0x71c   : > { %v3777_v16 = vpop.f32.mrb[80].mxu0 }
 0x71d   : > { %v4191_v20 = vadd.f32 %v4159_v11, %v8864_v4  ;;  %v4128_v58 = vmul.f32 0.1, %v3998_v10  ;;  %v5441_v3 = vadd.f32 %v8232_v40, %v3777_v16  ;;  %v3779_v15 = vpop.f32.mrb[81].mxu0 }
 0x71f   : > { %4223 = vst [vmem:[%s8242_s30 + $0x30] sm:$0xff] %v4191_v20  ;;  %v4160_v2 = vmax.f32 %v3998_v10, %v4128_v58  ;;  %v4003_v43 = vadd.f32 %v5441_v3, %v8057_v39  ;;  %v8870_v20 = vld [vmem:[#allocation34_spill] sm:$0xff] }
 0x720   : > { %v3782_v22 = vpop.f32.mrb[82].mxu0 }
 0x721   : > { %v4192_v13 = vadd.f32 %v4160_v2, %v8865_v35  ;;  %v4129_v48 = vmul.f32 0.1, %v4003_v43  ;;  %v5442_v9 = vadd.f32 %v8232_v40, %v3782_v22  ;;  %v3784_v19 = vpop.f32.mrb[83].mxu0 }
 0x723   : > { %4224 = vst [vmem:[%s8242_s30 + $0x38] sm:$0xff] %v4192_v13  ;;  %v4161_v5 = vmax.f32 %v4003_v43, %v4129_v48  ;;  %v4008_v47 = vadd.f32 %v5442_v9, %v8055_v55  ;;  %v8871_v43 = vld [vmem:[#allocation66_spill] sm:$0xff]  ;;  %v8872_v13 = vld [vmem:[#allocation35_spill] sm:$0xff] }
 0x724   : > { %v3787_v21 = vpop.f32.mrb[84].mxu0 }
 0x725   : > { %v4193_v46 = vadd.f32 %v4161_v5, %v8866_v53  ;;  %v4130_v29 = vmul.f32 0.1, %v4008_v47  ;;  %v5443_v7 = vadd.f32 %v8232_v40, %v3787_v21  ;;  %v3789_v30 = vpop.f32.mrb[85].mxu0 }
 0x727   : > { %4225 = vst [vmem:[%s8242_s30 + $0x40] sm:$0xff] %v4193_v46  ;;  %v4162_v39 = vmax.f32 %v4008_v47, %v4130_v29  ;;  %v4013_v27 = vadd.f32 %v5443_v7, %v8073_v56  ;;  %v8873_v47 = vld [vmem:[#allocation65_spill] sm:$0xff] }
 0x728   : > { %v3792_v37 = vpop.f32.mrb[86].mxu0  ;;  %v8874_v46 = vld [vmem:[#allocation37_spill] sm:$0xff] }
 0x729   : > { %v4194_v34 = vadd.f32 %v4162_v39, %v8867_v60  ;;  %v4131_v36 = vmul.f32 0.1, %v4013_v27  ;;  %v5444_v57 = vadd.f32 %v8232_v40, %v3792_v37  ;;  %v3794_v50 = vpop.f32.mrb[87].mxu0 }
 0x72b   : > { %4226 = vst [vmem:[%s8242_s30 + $0x48] sm:$0xff] %v4194_v34  ;;  %v4163_v55 = vmax.f32 %v4013_v27, %v4131_v36  ;;  %v4018_v32 = vadd.f32 %v5444_v57, %v8070_v6  ;;  %v8875_v34 = vld [vmem:[#allocation16_spill] sm:$0xff] }
 0x72c   : > { %v3797_v54 = vpop.f32.mrb[88].mxu0 }
 0x72d   : > { %v4195_v38 = vadd.f32 %v4163_v55, %v8868_v18  ;;  %v4132_v0 = vmul.f32 0.1, %v4018_v32  ;;  %v5445_v31 = vadd.f32 %v8232_v40, %v3797_v54  ;;  %v3799_v45 = vpop.f32.mrb[89].mxu0  ;;  %v8876_v54 = vld [vmem:[#allocation67_spill] sm:$0xff] }
 0x72f   : > { %4227 = vst [vmem:[%s8242_s30 + $0x50] sm:$0xff] %v4195_v38  ;;  %v4164_v56 = vmax.f32 %v4018_v32, %v4132_v0  ;;  %v4023_v8 = vadd.f32 %v5445_v31, %v8089_v14  ;;  %v8877_v0 = vld [vmem:[#allocation17_spill] sm:$0xff] }
 0x730   : > { %v3802_v24 = vpop.f32.mrb[90].mxu0 }
 0x731   : > { %v4196_v28 = vadd.f32 %v4164_v56, %v8869_v63  ;;  %v4133_v49 = vmul.f32 0.1, %v4023_v8  ;;  %v5446_v11 = vadd.f32 %v8232_v40, %v3802_v24  ;;  %v3804_v10 = vpop.f32.mrb[91].mxu0 }
 0x733   : > { %4228 = vst [vmem:[%s8242_s30 + $0x58] sm:$0xff] %v4196_v28  ;;  %v4165_v6 = vmax.f32 %v4023_v8, %v4133_v49  ;;  %v4028_v16 = vadd.f32 %v5446_v11, %v8086_v61  ;;  %v8878_v28 = vld [vmem:[#allocation18_spill] sm:$0xff] }
 0x734   : > { %v3807_v4 = vpop.f32.mrb[92].mxu0 }
 0x735   : > { %v4197_v58 = vadd.f32 %v4165_v6, %v8870_v20  ;;  %v4134_v3 = vmul.f32 0.1, %v4028_v16  ;;  %v5447_v15 = vadd.f32 %v8232_v40, %v3807_v4  ;;  %v3809_v2 = vpop.f32.mrb[93].mxu0  ;;  %v8879_v4 = vld [vmem:[#allocation68_spill] sm:$0xff] }
 0x737   : > { %4229 = vst [vmem:[%s8242_s30 + $0x60] sm:$0xff] %v4197_v58  ;;  %v4166_v14 = vmax.f32 %v4028_v16, %v4134_v3  ;;  %v4033_v22 = vadd.f32 %v5447_v15, %v8871_v43  ;;  %v8880_v3 = vld [vmem:[#allocation19_spill] sm:$0xff] }
 0x738   : > { %v3812_v35 = vpop.f32.mrb[94].mxu0 }
 0x739   : > { %v4198_v48 = vadd.f32 %v4166_v14, %v8872_v13  ;;  %v4135_v9 = vmul.f32 0.1, %v4033_v22  ;;  %v5448_v19 = vadd.f32 %v8232_v40, %v3812_v35  ;;  %v3814_v5 = vpop.f32.mrb[95].mxu0  ;;  %v8881_v13 = vld [vmem:[#allocation20_spill] sm:$0xff] }
 0x73b   : > { %4230 = vst [vmem:[%s8242_s30 + $0x68] sm:$0xff] %v4198_v48  ;;  %v4167_v61 = vmax.f32 %v4033_v22, %v4135_v9  ;;  %v4038_v21 = vadd.f32 %v5448_v19, %v8873_v47 }
 0x73c   : > { %v3817_v53 = vpop.f32.mrb[96].mxu0 }
 0x73d   : > { %v4199_v29 = vadd.f32 %v4167_v61, %v8874_v46  ;;  %v4136_v7 = vmul.f32 0.1, %v4038_v21  ;;  %v5449_v30 = vadd.f32 %v8232_v40, %v3817_v53  ;;  %v3819_v39 = vpop.f32.mrb[97].mxu0  ;;  %v8882_v53 = vld [vmem:[#allocation21_spill] sm:$0xff] }
 0x73f   : > { %4231 = vst [vmem:[%s8242_s30 + $0x70] sm:$0xff] %v4199_v29  ;;  %v4168_v27 = vmax.f32 %v4038_v21, %v4136_v7  ;;  %v4043_v37 = vadd.f32 %v5449_v30, %v8119_v52 }
 0x740   : > { %v3822_v60 = vpop.f32.mrb[98].mxu0 }
 0x741   : > { %v4200_v36 = vadd.f32 %v4168_v27, %v8875_v34  ;;  %v4137_v57 = vmul.f32 0.1, %v4043_v37  ;;  %v5450_v50 = vadd.f32 %v8232_v40, %v3822_v60  ;;  %v3824_v55 = vpop.f32.mrb[99].mxu0 }
 0x743   : > { %4232 = vst [vmem:[%s8242_s30 + $0x78] sm:$0xff] %v4200_v36  ;;  %v4169_v32 = vmax.f32 %v4043_v37, %v4137_v57  ;;  %v4048_v18 = vadd.f32 %v5450_v50, %v8876_v54  ;;  %v8883_v37 = vld [vmem:[#allocation22_spill] sm:$0xff] }
 0x744   : > { %v3827_v38 = vpop.f32.mrb[100].mxu0 }
 0x745   : > { %v4201_v31 = vadd.f32 %v4169_v32, %v8877_v0  ;;  %v4138_v45 = vmul.f32 0.1, %v4048_v18  ;;  %v5451_v56 = vadd.f32 %v8232_v40, %v3827_v38  ;;  %v3829_v8 = vpop.f32.mrb[101].mxu0  ;;  %v8884_v32 = vld [vmem:[#allocation23_spill] sm:$0xff] }
 0x747   : > { %4233 = vst [vmem:[%s8242_s30 + $0x80] sm:$0xff] %v4201_v31  ;;  %v4170_v52 = vmax.f32 %v4048_v18, %v4138_v45  ;;  %v4053_v24 = vadd.f32 %v5451_v56, %v8133_v25  ;;  %v8885_v56 = vld [vmem:[#allocation24_spill] sm:$0xff] }
 0x748   : > { %v3832_v63 = vpop.f32.mrb[102].mxu0 }
 0x749   : > { %v4202_v49 = vadd.f32 %v4170_v52, %v8878_v28  ;;  %v4139_v11 = vmul.f32 0.1, %v4053_v24  ;;  %v5452_v10 = vadd.f32 %v8232_v40, %v3832_v63  ;;  %v3834_v6 = vpop.f32.mrb[103].mxu0 }
 0x74b   : > { %4234 = vst [vmem:[%s8242_s30 + $0x88] sm:$0xff] %v4202_v49  ;;  %v4171_v16 = vmax.f32 %v4053_v24, %v4139_v11  ;;  %v4058_v20 = vadd.f32 %v5452_v10, %v8879_v4  ;;  %v8886_v11 = vld [vmem:[#allocation25_spill] sm:$0xff] }
 0x74c   : > { %v3837_v58 = vpop.f32.mrb[104].mxu0 }
 0x74d   : > { %v4203_v15 = vadd.f32 %v4171_v16, %v8880_v3  ;;  %v4140_v2 = vmul.f32 0.1, %v4058_v20  ;;  %v5453_v14 = vadd.f32 %v8232_v40, %v3837_v58  ;;  %v3839_v43 = vpop.f32.mrb[105].mxu0  ;;  %v8887_v3 = vld [vmem:[#allocation26_spill] sm:$0xff] }
 0x74f   : > { %4235 = vst [vmem:[%s8242_s30 + $0x90] sm:$0xff] %v4203_v15  ;;  %v4172_v25 = vmax.f32 %v4058_v20, %v4140_v2  ;;  %v4063_v22 = vadd.f32 %v5453_v14, %v8145_v62 }
 0x750   : > { %v3842_v35 = vpop.f32.mrb[106].mxu0 }
 0x751   : > { %v4204_v48 = vadd.f32 %v4172_v25, %v8881_v13  ;;  %v4141_v9 = vmul.f32 0.1, %v4063_v22  ;;  %v5454_v19 = vadd.f32 %v8232_v40, %v3842_v35  ;;  %v3844_v5 = vpop.f32.mrb[107].mxu0  ;;  %v8888_v35 = vld [vmem:[#allocation27_spill] sm:$0xff] }
 0x753   : > { %4236 = vst [vmem:[%s8242_s30 + $0x98] sm:$0xff] %v4204_v48  ;;  %v4173_v61 = vmax.f32 %v4063_v22, %v4141_v9  ;;  %v4068_v47 = vadd.f32 %v5454_v19, %v8142_v41 }
 0x754   : > { %v3847_v21 = vpop.f32.mrb[108].mxu0 }
 0x755   : > { %v4205_v46 = vadd.f32 %v4173_v61, %v8882_v53  ;;  %v4142_v29 = vmul.f32 0.1, %v4068_v47  ;;  %v5455_v7 = vadd.f32 %v8232_v40, %v3847_v21  ;;  %v3849_v30 = vpop.f32.mrb[109].mxu0 }
 0x757   : > { %4237 = vst [vmem:[%s8242_s30 + $0xa0] sm:$0xff] %v4205_v46  ;;  %v4174_v62 = vmax.f32 %v4068_v47, %v4142_v29  ;;  %v4073_v39 = vadd.f32 %v5455_v7, %v8157_v33  ;;  %v8889_v47 = vld [vmem:[#allocation28_spill] sm:$0xff] }
 0x758   : > { %v3852_v27 = vpop.f32.mrb[110].mxu0 }
 0x759   : > { %v4206_v60 = vadd.f32 %v4174_v62, %v8883_v37  ;;  %v4143_v34 = vmul.f32 0.1, %v4073_v39  ;;  %v5456_v36 = vadd.f32 %v8232_v40, %v3852_v27  ;;  %v3854_v57 = vpop.f32.mrb[111].mxu0  ;;  %v8890_v62 = vld [vmem:[#allocation29_spill] sm:$0xff] }
 0x75a   : > { %v8891_v57 = vld [vmem:[#allocation30_spill] sm:$0xff] }
 0x75b   : > { %4238 = vst [vmem:[%s8242_s30 + $0xa8] sm:$0xff] %v4206_v60  ;;  %v4175_v41 = vmax.f32 %v4073_v39, %v4143_v34  ;;  %v4078_v50 = vadd.f32 %v5456_v36, %v8154_v17 }
 0x75c   : > { %v3857_v55 = vpop.f32.mrb[112].mxu0 }
 0x75d   : > { %v4207_v54 = vadd.f32 %v4175_v41, %v8884_v32  ;;  %v4144_v18 = vmul.f32 0.1, %v4078_v50  ;;  %v5457_v38 = vadd.f32 %v8232_v40, %v3857_v55  ;;  %v3859_v0 = vpop.f32.mrb[113].mxu0 }
 0x75f   : > { %4239 = vst [vmem:[%s8242_s30 + $0xb0] sm:$0xff] %v4207_v54  ;;  %v4176_v33 = vmax.f32 %v4078_v50, %v4144_v18  ;;  %v4083_v31 = vadd.f32 %v5457_v38, %v8166_v42  ;;  %v8892_v18 = vld [vmem:[#allocation31_spill] sm:$0xff] }
 0x760   : > { %v3862_v45 = vpop.f32.mrb[114].mxu0 }
 0x761   : > { %v4208_v8 = vadd.f32 %v4176_v33, %v8885_v56  ;;  %v4145_v52 = vmul.f32 0.1, %v4083_v31  ;;  %v5458_v24 = vadd.f32 %v8232_v40, %v3862_v45  ;;  %v3864_v63 = vpop.f32.mrb[115].mxu0 }
 0x763   : > { %4240 = vst [vmem:[%s8242_s30 + $0xb8] sm:$0xff] %v4208_v8  ;;  %v4177_v17 = vmax.f32 %v4083_v31, %v4145_v52  ;;  %v4088_v28 = vadd.f32 %v5458_v24, %v8163_v23 }
 0x764   : > { %v3867_v49 = vpop.f32.mrb[116].mxu0 }
 0x765   : > { %v4209_v10 = vadd.f32 %v4177_v17, %v8886_v11  ;;  %v4146_v6 = vmul.f32 0.1, %v4088_v28  ;;  %v5459_v16 = vadd.f32 %v8232_v40, %v3867_v49  ;;  %v3869_v4 = vpop.f32.mrb[117].mxu0 }
 0x767   : > { %4241 = vst [vmem:[%s8242_s30 + $0xc0] sm:$0xff] %v4209_v10  ;;  %v4178_v42 = vmax.f32 %v4088_v28, %v4146_v6  ;;  %v4093_v20 = vadd.f32 %v5459_v16, %v8174_v59 }
 0x768   : > { %v3872_v58 = vpop.f32.mrb[118].mxu0 }
 0x769   : > { %v4210_v15 = vadd.f32 %v4178_v42, %v8887_v3  ;;  %v4147_v2 = vmul.f32 0.1, %v4093_v20  ;;  %v5460_v14 = vadd.f32 %v8232_v40, %v3872_v58  ;;  %v3874_v43 = vpop.f32.mrb[119].mxu0 }
 0x76b   : > { %4242 = vst [vmem:[%s8242_s30 + $0xc8] sm:$0xff] %v4210_v15  ;;  %v4179_v23 = vmax.f32 %v4093_v20, %v4147_v2  ;;  %v4098_v25 = vadd.f32 %v5460_v14, %v8171_v26 }
 0x76c   : > { %v3877_v22 = vpop.f32.mrb[120].mxu0 }
 0x76d   : > { %v4211_v13 = vadd.f32 %v4179_v23, %v8888_v35  ;;  %v4148_v48 = vmul.f32 0.1, %v4098_v25  ;;  %v5461_v9 = vadd.f32 %v8232_v40, %v3877_v22  ;;  %v3879_v19 = vpop.f32.mrb[121].mxu0 }
 0x76f   : > { %4243 = vst [vmem:[%s8242_s30 + $0xd0] sm:$0xff] %v4211_v13  ;;  %v4180_v59 = vmax.f32 %v4098_v25, %v4148_v48  ;;  %v4103_v5 = vadd.f32 %v5461_v9, %v8182_v1 }
 0x770   : > { %v3882_v61 = vpop.f32.mrb[122].mxu0 }
 0x771   : > { %v4212_v21 = vadd.f32 %v4180_v59, %v8889_v47  ;;  %v4149_v53 = vmul.f32 0.1, %v4103_v5  ;;  %v5462_v46 = vadd.f32 %v8232_v40, %v3882_v61  ;;  %v3884_v29 = vpop.f32.mrb[123].mxu0 }
 0x773   : > { %4244 = vst [vmem:[%s8242_s30 + $0xd8] sm:$0xff] %v4212_v21  ;;  %v4181_v26 = vmax.f32 %v4103_v5, %v4149_v53  ;;  %v4108_v7 = vadd.f32 %v5462_v46, %v8179_v51 }
 0x774   : > { %v3887_v30 = vpop.f32.mrb[124].mxu0 }
 0x775   : > { %v4213_v39 = vadd.f32 %v4181_v26, %v8890_v62  ;;  %v4150_v27 = vmul.f32 0.1, %v4108_v7  ;;  %v5463_v37 = vadd.f32 %v8232_v40, %v3887_v30  ;;  %v3889_v1 = vpop.f32.mrb[125].mxu0 }
 0x777   : > { %4245 = vst [vmem:[%s8242_s30 + $0xe0] sm:$0xff] %v4213_v39  ;;  %v4182_v60 = vmax.f32 %v4108_v7, %v4150_v27  ;;  %v4113_v34 = vadd.f32 %v5463_v37, %v8227_v12 }
 0x778   : > { %v3892_v36 = vpop.f32.mrb[126].mxu0 }
 0x779   : > { %v4214_v41 = vadd.f32 %v4182_v60, %v8891_v57  ;;  %v4151_v50 = vmul.f32 0.1, %v4113_v34  ;;  %v5464_v51 = vadd.f32 %v8232_v40, %v3892_v36  ;;  %v3894_v55 = vpop.f32.mrb[127].mxu0  ;;  %v8893_v40 = vld [vmem:[#allocation81_spill] sm:$0xff] }
 0x77b   : > { %4246 = vst [vmem:[%s8242_s30 + $0xe8] sm:$0xff] %v4214_v41  ;;  %v4183_v32 = vmax.f32 %v4113_v34, %v4151_v50  ;;  %v4118_v54 = vadd.f32 %v5464_v51, %v8225_v44 }
 0x77d   : > { %v4215_v38 = vadd.f32 %v4183_v32, %v8892_v18  ;;  %v4152_v0 = vmul.f32 0.1, %v4118_v54 }
 0x77f   : > { %4247 = vst [vmem:[%s8242_s30 + $0xf0] sm:$0xff] %v4215_v38  ;;  %v4184_v12 = vmax.f32 %v4118_v54, %v4152_v0 }
 0x781   : > { %v4216_v33 = vadd.f32 %v4184_v12, %v8893_v40 }
 0x783   : > { %4248 = vst [vmem:[%s8242_s30 + $0xf8] sm:$0xff] %v4216_v33 }
 0x784   : > { %6058 = shalt.err (!%p6055_p1)
}
 0x785   : > { %s6059_s16 = scalar_lea.hbm %s8369_s8, 4096  ;;  %s6063_s13 = scalar_lea.hbm %s8422_s5, 8192 }
 0x786   : > { %p6060_p13 = scmp.ne.s32.totalorder %s8369_s8, %s6059_s16  ;;  %p6064_p4 = scmp.lt.u32.totalorder %s8369_s8, %s8422_s5 }
 0x787   : > { %p6065_p5 = scmp.lt.u32.totalorder %s6063_s13, %s6059_s16  ;;  %p6067_p11 = scmp.lt.u32.totalorder %s6059_s16, %s8369_s8 }
 0x788   : > { %p6061_p6 = pnand %p6060_p13, %p8894_p0 }
 0x789   : > { %p6066_p8 = por %p6065_p5, %p6064_p4 }
 0x78a   : > { %p6062_p10 = pneg %p6061_p6 }
 0x78b   : > { %p6068_p2 = por %p6067_p11, %p6066_p8 }
 0x78d   : > { %p6069_p3 = pnand %p6068_p2, %p6062_p10 }
 0x78f   : > { %6072 = shalt.err (!%p6069_p3)
}
 0x790   : > { %s6125_s11 = smov 128   ;;  %s6126_s7 = smov 8  }
 0x791   : > { %5859 = dma.vmem_to_hbm [thread:$0]  (%p8894_p0), %s8371_s17, 4096, %s8369_s8, %s4250_s12, %s6125_s11, %s6125_s11, %s6126_s7  }
 0x792 PF: > { %s4278_s6 = sand.u32 1, %s6103_s18   ;;  %p8895_p7 = scmp.ne.s32.totalorder %s8588_s25, 0 }
 0x793   : > { %p8896_p9 = scmp.ge.s32.totalorder %s6115_s21, 2  ;;  %s4279_s24 = scalar_lea.sflag [#allocation5], %s4278_s6 }
 0x795   : > { %p5873_p12 = pnand %p8896_p9, %p8895_p7 }
 0x797   : > { %6098 = dma.done.wait (!%p5873_p12), %s4279_s24, 4096  }
 0x798   : > { %6100 = vsyncadd (!%p5873_p12), %s4279_s24, 4294963200  ;;  %p19_p1 = scmp.ge.s32.totalorder %s6273_s29, 4   ;;  %s8897_s18 = smov %s6107_s19 }
 0x799   : > { %s8898_s19 = smov %s6111_s20  ;;  %s8899_s20 = smov %s6289_s27 }
 0x79a   : > { %s8900_s21 = smov %s6273_s29  ;;  %21 = sbr.rel (!%p19_p1) target bundleno = 6 (0x6), region = 96 }
 0x7a1   :  { %4284 = vsyncpa [#allocation4], 1 }
 0x7a2   :  { %4286 = vsyncpa [#allocation4 + $0x1], 1 }
 0x7a3   :  { %4287 = vsyncpa [#allocation7], 1 }
 0x7a4   :  { %4288 = vsyncpa [#allocation5], 1 }
 0x7a5   :  { %4290 = vsyncpa [#allocation5 + $0x1], 1 }

</bundles_post_ra>
